<compile_context>
chip_gen: v5e
topology: v5e:2x2
jax: 0.10.0
libtpu: 0.0.40
codegen_flags: <defaults>
</compile_context>

<pallas_src>
import functools

import jax
import jax.numpy as jnp
from jax.experimental import pallas as pl
from jax.experimental.pallas import tpu as pltpu


# ----------------------------------------------------------------------------
# Pallas kernel: entire SE_Res2Block forward for ONE batch element.
# ----------------------------------------------------------------------------
def _se_res2block_kernel(
    x_ref,                                   # (1, C_in, T_pad)   compute dtype
    w01_ref, b01_ref,                        # fused [shortcut; conv1] weights
    s1_ref, t1_ref,                          # folded BN1
    wr_ref, br_ref, sr_ref, tr_ref,          # Res2 fused-tap convs + folded BNs
    w2_ref, b2_ref, s2_ref, t2_ref,          # Conv1dReluBn2 (1x1) + folded BN
    a1_ref, c1_ref, a2_ref, c2_ref,          # SE_Connect linears
    o_ref,                                   # (1, C, T_pad)
    res2_ref,                                # VMEM scratch (C, T_pad), cdt
    taps_ref,                                # VMEM scratch (k*width, T_pad), cdt
    *, scale, kernel_size, dilation, padding, t_valid,
):
    f32 = jnp.float32
    cdt = x_ref.dtype                        # matmul-operand dtype (bf16 or f32)
    C = w2_ref.shape[0]
    width = C // scale
    nums = scale if scale == 1 else scale - 1
    Tp = x_ref.shape[2]

    x = x_ref[0]                             # (C_in, T_pad), compute dtype

    # time-validity mask: lanes >= t_valid are zero padding
    t_idx = jax.lax.broadcasted_iota(jnp.int32, (1, Tp), 1)
    valid = t_idx < t_valid                  # (1, T_pad) bool

    # ---- fused shortcut 1x1 conv + Conv1dReluBn1 1x1 conv: one MXU pass ----
    y = jnp.dot(w01_ref[...], x, preferred_element_type=f32) + b01_ref[...]
    residual = y[:C].astype(cdt)             # live for the whole kernel: keep narrow
    h1 = jnp.maximum(y[C:], 0.0) * s1_ref[...] + t1_ref[...]   # (C, T_pad) f32
    h1 = jnp.where(valid, h1, 0.0)           # padded tail must be exactly zero

    # ---- Res2Conv1dReluBn: sequential dilated convs over channel groups ----
    # Each group: cast the conv input to cdt once, roll the k (dilated) shifted
    # views (XLU slot) into a persistent (k*width, T_pad) tap scratch at static
    # sublane offsets, then do ONE (width, k*width) x (k*width, T_pad) matmul.
    sp = None
    for i in range(nums):
        g = h1[i * width:(i + 1) * width, :]
        sp = g if i == 0 else sp + g                           # f32 carry
        sp_c = sp.astype(cdt)                                  # narrow conv input
        for j in range(kernel_size):
            sh = (padding - j * dilation) % Tp
            taps_ref[j * width:(j + 1) * width, :] = (
                sp_c if sh == 0 else pltpu.roll(sp_c, shift=sh, axis=1))
        acc = jnp.dot(wr_ref[i], taps_ref[...],
                      preferred_element_type=f32) + br_ref[i]  # (w, T_pad) f32
        sp = jnp.maximum(acc, 0.0) * sr_ref[i] + tr_ref[i]
        sp = jnp.where(valid, sp, 0.0)       # keep the zero-tail invariant
        res2_ref[i * width:(i + 1) * width, :] = sp.astype(res2_ref.dtype)
    if scale != 1:
        res2_ref[nums * width:, :] = h1[nums * width:, :].astype(res2_ref.dtype)

    # ---- Conv1dReluBn2: 1x1 conv -> ReLU -> BN(scale, shift) ----
    h2 = jnp.dot(w2_ref[...], res2_ref[...],
                 preferred_element_type=f32) + b2_ref[...]
    h2 = jnp.maximum(h2, 0.0) * s2_ref[...] + t2_ref[...]      # (C, T_pad) f32

    # ---- SE_Connect: mean over (true) time -> FC -> ReLU -> FC -> sigmoid ----
    # Padded columns of res2 are exactly zero, so padded columns of h2 equal
    # relu(b2)*s2 + t2; correct the T_pad sum analytically (no third mask).
    pad_col = jnp.maximum(b2_ref[...], 0.0) * s2_ref[...] + t2_ref[...]   # (C,1)
    m = (jnp.sum(h2, axis=1, keepdims=True)
         - float(Tp - t_valid) * pad_col) * (1.0 / t_valid)               # (C,1)
    z = jnp.dot(a1_ref[...], m.astype(cdt), preferred_element_type=f32) + c1_ref[...]
    z = jnp.maximum(z, 0.0)
    s = jnp.dot(a2_ref[...], z.astype(cdt), preferred_element_type=f32) + c2_ref[...]
    s = jax.nn.sigmoid(s)                                                 # (C,1)

    # Final gate + residual (residual promotes to f32 in the add).
    # Padded tail of the output is garbage; the wrapper slices it off.
    o_ref[0] = (h2 * s + residual).astype(o_ref.dtype)


# ----------------------------------------------------------------------------
# Wrapper
# ----------------------------------------------------------------------------
def se_res2block(x, p, *, scale, kernel_size, dilation, padding,
                 compute_dtype=jnp.bfloat16, out_dtype=None, slice_output=True):
    if out_dtype is None:
        out_dtype = compute_dtype            # halve HBM writeback by default
    B, C_in, T = x.shape
    C = p["w1"].shape[0]
    assert C % scale == 0, f"{C} % {scale} != 0"
    width = C // scale
    # Static sublane slices (group slices, res2/tap scratch writes) need 8-row
    # alignment; width % 16 == 0 is preferred when compute_dtype is bf16.
    assert width % 8 == 0, "width = out_channels/scale must be a multiple of 8"
    nums = scale if scale == 1 else scale - 1
    k = kernel_size
    bneck = p["a1"].shape[0]

    # Lane-dense time axis.  The halo must cover BOTH the left zero-padding and
    # the dilated right lookahead so roll-based taps never wrap into valid data.
    halo = max(padding, dilation * (k - 1) - padding)
    T_pad = max(128, ((T + halo + 127) // 128) * 128)

    cdt = compute_dtype
    f32 = jnp.float32
    col = lambda v: v.reshape(-1, 1).astype(f32)      # (N,)   -> (N,1)
    col3 = lambda v: v[..., None].astype(f32)         # (n, w) -> (n, w, 1)

    x_p = jnp.pad(x, ((0, 0), (0, 0), (0, T_pad - T))).astype(cdt)

    # shortcut conv exists only when in_channels != out_channels; otherwise the
    # module's residual is the identity.
    w_sc = p.get("w_sc", None)
    b_sc = p.get("b_sc", None)
    if w_sc is None:
        assert C_in == C, "identity shortcut requires in_channels == out_channels"
        w_sc = jnp.eye(C, dtype=f32)
        b_sc = jnp.zeros((C,), f32)

    # Fuse shortcut + conv1 weights into one (2C, C_in) matmul operand.
    w01 = jnp.concatenate([w_sc, p["w1"]], axis=0).astype(cdt)
    b01 = jnp.concatenate([b_sc, p["b1"]], axis=0).reshape(-1, 1).astype(f32)

    # Fuse the k taps of each Res2 conv: (nums, k, w_out, w_in) -> (nums, w_out, k*w_in)
    wr_f = jnp.transpose(p["wr"], (0, 2, 1, 3)).reshape(nums, width, k * width)
    wr_f = wr_f.astype(cdt)

    args = (
        w01, b01, col(p["s1"]), col(p["t1"]),
        wr_f, col3(p["br"]), col3(p["sr"]), col3(p["tr"]),
        p["w2"].astype(cdt), col(p["b2"]), col(p["s2"]), col(p["t2"]),
        p["a1"].astype(cdt), col(p["c1"]), p["a2"].astype(cdt), col(p["c2"]),
    )

    kernel = functools.partial(
        _se_res2block_kernel,
        scale=scale, kernel_size=k, dilation=dilation, padding=padding,
        t_valid=T,
    )

    # ---- VMEM budget: derive the scoped limit instead of hard-coding 32 MiB ----
    cdt_b = jnp.dtype(cdt).itemsize
    out_b = jnp.dtype(out_dtype).itemsize
    param_bytes = sum(int(a.size) * a.dtype.itemsize for a in args)
    est = (2 * C_in * T_pad * cdt_b            # input slab (double-buffered)
           + 2 * C * T_pad * out_b             # output slab (double-buffered)
           + C * T_pad * cdt_b                 # res2 scratch
           + k * width * T_pad * cdt_b         # tap scratch
           + 2 * param_bytes                   # conservative (if single-buffer rejected)
           + 6 * C * T_pad * 4)                # live f32 temporaries (y=2C, h1, h2, ...)
    cap = 100 * 1024 * 1024                    # ~100 MiB on 128 MiB parts (v5e/v6e)
    try:
        cap = min(cap, int(pltpu.get_tpu_info().vmem_capacity_bytes) - 8 * 1024 * 1024)
    except Exception:
        pass                                   # keep conservative default cap
    if est > cap:
        # TODO(synk): T-tiled / two-pass-SE variant removes this ceiling.
        raise ValueError(
            f"SE_Res2Block un-tiled slab needs ~{est >> 20} MiB VMEM but only "
            f"~{cap >> 20} MiB is budgeted; reduce T or use a T-tiled variant.")
    vmem_limit = int(min(cap, max(32 * 1024 * 1024, est * 2)))

    # Advisory cost hint for the XLA scheduler.
    flops = B * T_pad * (2 * (2 * C) * C_in
                         + nums * 2 * width * (k * width)
                         + 2 * C * C)
    flops += B * 2 * (2 * bneck * C)
    bytes_accessed = (int(x_p.size) * x_p.dtype.itemsize
                      + param_bytes
                      + B * C * T_pad * out_b)
    cost = pl.CostEstimate(flops=int(flops), transcendentals=int(B * C),
                           bytes_accessed=int(bytes_accessed))

    def _const_spec(a, single_buffer):
        nd = a.ndim
        idx = lambda b, nd=nd: (0,) * nd
        if single_buffer:
            # Constant index_map -> fetched once; don't waste a second buffer.
            return pl.BlockSpec(a.shape, idx, pipeline_mode=pl.Buffered(1))
        return pl.BlockSpec(a.shape, idx)

    def _call(single_buffer_params):
        in_specs = [pl.BlockSpec((1, C_in, T_pad), lambda b: (b, 0, 0))]
        in_specs += [_const_spec(a, single_buffer_params) for a in args]
        return pl.pallas_call(
            kernel,
            out_shape=jax.ShapeDtypeStruct((B, C, T_pad), out_dtype),
            grid=(B,),
            in_specs=in_specs,
            out_specs=pl.BlockSpec((1, C, T_pad), lambda b: (b, 0, 0)),
            scratch_shapes=[pltpu.VMEM((C, T_pad), cdt),
                            pltpu.VMEM((k * width, T_pad), cdt)],
            compiler_params=pltpu.CompilerParams(
                dimension_semantics=("parallel",),
                vmem_limit_bytes=vmem_limit,
            ),
            cost_estimate=cost,
        )(x_p, *args)

    try:
        out = _call(True)
    except Exception:
        # pipeline_mode=pl.Buffered(1) not supported on this JAX version:
        # fall back to default (double-buffered) parameter specs.
        out = _call(False)

    return out[:, :, :T] if slice_output else out


# ----------------------------------------------------------------------------
# Pure-JAX reference (uses lax conv) for verification.
# ----------------------------------------------------------------------------
def _conv1d_ref(x, w, b, padding=0, dilation=1):
    out = jax.lax.conv_general_dilated(
        x, w, window_strides=(1,), padding=[(padding, padding)],
        rhs_dilation=(dilation,), dimension_numbers=("NCH", "OIH", "NCH"))
    return out + b[None, :, None]


def _ref_forward(x, p, *, scale, kernel_size, dilation, padding):
    residual = _conv1d_ref(x, p["w_sc"][:, :, None], p["b_sc"])
    h = _conv1d_ref(x, p["w1"][:, :, None], p["b1"])
    h = jnp.maximum(h, 0.0)
    h = h * p["s1"][None, :, None] + p["t1"][None, :, None]

    C = h.shape[1]
    width = C // scale
    nums = scale if scale == 1 else scale - 1
    outs = []
    sp = None
    for i in range(nums):
        g = h[:, i * width:(i + 1) * width, :]
        sp = g if i == 0 else sp + g
        wconv = jnp.transpose(p["wr"][i], (1, 2, 0))          # (k,co,ci)->(co,ci,k)
        sp = _conv1d_ref(sp, wconv, p["br"][i], padding=padding, dilation=dilation)
        sp = jnp.maximum(sp, 0.0)
        sp = sp * p["sr"][i][None, :, None] + p["tr"][i][None, :, None]
        outs.append(sp)
    if scale != 1:
        outs.append(h[:, nums * width:, :])
    h = jnp.concatenate(outs, axis=1)

    h = _conv1d_ref(h, p["w2"][:, :, None], p["b2"])
    h = jnp.maximum(h, 0.0)
    h = h * p["s2"][None, :, None] + p["t2"][None, :, None]

    m = h.mean(axis=2)                                         # (B, C)
    z = jnp.maximum(m @ p["a1"].T + p["c1"], 0.0)
    s = jax.nn.sigmoid(z @ p["a2"].T + p["c2"])
    h = h * s[:, :, None]
    return h + residual


# ----------------------------------------------------------------------------
# Deterministic parameter construction
# ----------------------------------------------------------------------------
def _fold_bn(gamma, beta, mean, var, eps=1e-5):
    scale = gamma / jnp.sqrt(var + eps)
    shift = beta - mean * scale
    return scale, shift


def make_params(key, c_in, c_out, kernel_size, scale, bneck):
    width = c_out // scale
    nums = scale if scale == 1 else scale - 1
    keys = iter(jax.random.split(key, 128))
    nrm = lambda shape, s=0.2: (jax.random.normal(next(keys), shape) * s).astype(jnp.float32)
    uni = lambda shape, lo, hi: jax.random.uniform(
        next(keys), shape, minval=lo, maxval=hi).astype(jnp.float32)

    def bn(c):
        gamma, beta = uni((c,), 0.8, 1.2), nrm((c,), 0.1)
        mean, var = nrm((c,), 0.1), uni((c,), 0.5, 1.5)
        return _fold_bn(gamma, beta, mean, var)

    s1, t1 = bn(c_out)
    sr_list, tr_list = [], []
    for _ in range(nums):
        a, b = bn(width)
        sr_list.append(a)
        tr_list.append(b)
    sr, tr = jnp.stack(sr_list), jnp.stack(tr_list)
    s2, t2 = bn(c_out)

    return dict(
        w_sc=nrm((c_out, c_in)), b_sc=nrm((c_out,)),
        w1=nrm((c_out, c_in)), b1=nrm((c_out,)), s1=s1, t1=t1,
        # wr layout: (nums, k, c_out_group, c_in_group)
        wr=nrm((nums, kernel_size, width, width)), br=nrm((nums, width)),
        sr=sr, tr=tr,
        w2=nrm((c_out, c_out)), b2=nrm((c_out,)), s2=s2, t2=t2,
        a1=nrm((bneck, c_out)), c1=nrm((bneck,)),
        a2=nrm((c_out, bneck)), c2=nrm((c_out,)),
    )


if __name__ == "__main__":
    # Module hyperparameters (small ECAPA-style block): in != out -> shortcut conv.
    # width = C_OUT/SCALE = 16 keeps all sublane slices aligned for bf16 packing.
    B, C_IN, C_OUT, T = 2, 16, 64, 40
    KERNEL, DIL, PAD, SCALE, BNECK = 3, 2, 2, 4, 32

    key = jax.random.PRNGKey(0)
    kx, kp = jax.random.split(key)
    x = jax.random.normal(kx, (B, C_IN, T), dtype=jnp.float32)
    params = make_params(kp, C_IN, C_OUT, KERNEL, SCALE, BNECK)

    ref = _ref_forward(x, params, scale=SCALE, kernel_size=KERNEL,
                       dilation=DIL, padding=PAD)

    # Exact-numerics path (f32 matmul operands + f32 output): tight check.
    out_f32 = se_res2block(x, params, scale=SCALE, kernel_size=KERNEL,
                           dilation=DIL, padding=PAD,
                           compute_dtype=jnp.float32, out_dtype=jnp.float32)
    out_f32 = jax.block_until_ready(out_f32)
    assert out_f32.shape == (B, C_OUT, T), out_f32.shape
    err = float(jnp.max(jnp.abs(out_f32 - ref)))
    assert err < 1e-4, f"f32 path max abs err {err}"

    # Fast path (bf16 matmul operands / bf16 output, f32 accumulation): loose check.
    out_bf16 = se_res2block(x, params, scale=SCALE, kernel_size=KERNEL,
                            dilation=DIL, padding=PAD)
    out_bf16 = jax.block_until_ready(out_bf16)
    assert out_bf16.dtype == jnp.bfloat16
    rel = float(jnp.linalg.norm(out_bf16.astype(jnp.float32) - ref)
                / (jnp.linalg.norm(ref) + 1e-12))
    assert rel < 5e-2, f"bf16 path rel err {rel}"

    print("KERNEL_OK")
</pallas_src>

<mosaic_0001>
module attributes {stable_mosaic.version = 11 : i64} {
  func.func @_se_res2block_kernel(%arg0: i32, %arg1: memref<1x16x128xf32, #tpu.memory_space<vmem>>, %arg2: memref<128x16xf32, #tpu.memory_space<vmem>>, %arg3: memref<128x1xf32, #tpu.memory_space<vmem>>, %arg4: memref<64x1xf32, #tpu.memory_space<vmem>>, %arg5: memref<64x1xf32, #tpu.memory_space<vmem>>, %arg6: memref<3x16x48xf32, #tpu.memory_space<vmem>>, %arg7: memref<3x16x1xf32, #tpu.memory_space<vmem>>, %arg8: memref<3x16x1xf32, #tpu.memory_space<vmem>>, %arg9: memref<3x16x1xf32, #tpu.memory_space<vmem>>, %arg10: memref<64x64xf32, #tpu.memory_space<vmem>>, %arg11: memref<64x1xf32, #tpu.memory_space<vmem>>, %arg12: memref<64x1xf32, #tpu.memory_space<vmem>>, %arg13: memref<64x1xf32, #tpu.memory_space<vmem>>, %arg14: memref<32x64xf32, #tpu.memory_space<vmem>>, %arg15: memref<32x1xf32, #tpu.memory_space<vmem>>, %arg16: memref<64x32xf32, #tpu.memory_space<vmem>>, %arg17: memref<64x1xf32, #tpu.memory_space<vmem>>, %arg18: memref<1x64x128xf32, #tpu.memory_space<vmem>>, %arg19: memref<64x128xf32, #tpu.memory_space<vmem>>, %arg20: memref<48x128xf32, #tpu.memory_space<vmem>>) attributes {dimension_semantics = [#tpu.dimension_semantics<parallel>], iteration_bounds = array<i64: 2>, scalar_prefetch = 0 : i64, scratch_operands = 2 : i64, tpu.core_type = #tpu.core_type<tc>, window_params = [{transform_indices = @transform_0, window_bounds = array<i64: 1, 16, 128>}, {pipeline_mode = #tpu.pipeline_mode<synchronous>, transform_indices = @transform_1, window_bounds = array<i64: 128, 16>}, {pipeline_mode = #tpu.pipeline_mode<synchronous>, transform_indices = @transform_2, window_bounds = array<i64: 128, 1>}, {pipeline_mode = #tpu.pipeline_mode<synchronous>, transform_indices = @transform_3, window_bounds = array<i64: 64, 1>}, {pipeline_mode = #tpu.pipeline_mode<synchronous>, transform_indices = @transform_4, window_bounds = array<i64: 64, 1>}, {pipeline_mode = #tpu.pipeline_mode<synchronous>, transform_indices = @transform_5, window_bounds = array<i64: 3, 16, 48>}, {pipeline_mode = #tpu.pipeline_mode<synchronous>, transform_indices = @transform_6, window_bounds = array<i64: 3, 16, 1>}, {pipeline_mode = #tpu.pipeline_mode<synchronous>, transform_indices = @transform_7, window_bounds = array<i64: 3, 16, 1>}, {pipeline_mode = #tpu.pipeline_mode<synchronous>, transform_indices = @transform_8, window_bounds = array<i64: 3, 16, 1>}, {pipeline_mode = #tpu.pipeline_mode<synchronous>, transform_indices = @transform_9, window_bounds = array<i64: 64, 64>}, {pipeline_mode = #tpu.pipeline_mode<synchronous>, transform_indices = @transform_10, window_bounds = array<i64: 64, 1>}, {pipeline_mode = #tpu.pipeline_mode<synchronous>, transform_indices = @transform_11, window_bounds = array<i64: 64, 1>}, {pipeline_mode = #tpu.pipeline_mode<synchronous>, transform_indices = @transform_12, window_bounds = array<i64: 64, 1>}, {pipeline_mode = #tpu.pipeline_mode<synchronous>, transform_indices = @transform_13, window_bounds = array<i64: 32, 64>}, {pipeline_mode = #tpu.pipeline_mode<synchronous>, transform_indices = @transform_14, window_bounds = array<i64: 32, 1>}, {pipeline_mode = #tpu.pipeline_mode<synchronous>, transform_indices = @transform_15, window_bounds = array<i64: 64, 32>}, {pipeline_mode = #tpu.pipeline_mode<synchronous>, transform_indices = @transform_16, window_bounds = array<i64: 64, 1>}, {transform_indices = @transform_17, window_bounds = array<i64: 1, 64, 128>}]} {
    %c0 = arith.constant 0 : index
    %c0_0 = arith.constant 0 : index
    %c0_1 = arith.constant 0 : index
    %0 = vector.load %arg1[%c0, %c0_0, %c0_1] : memref<1x16x128xf32, #tpu.memory_space<vmem>>, vector<1x16x128xf32>
    %1 = vector.shape_cast %0 : vector<1x16x128xf32> to vector<16x128xf32>
    %2 = tpu.iota {dimensions = array<i32: 1>} : vector<1x128xi32>
    %c40_i32 = arith.constant 40 : i32
    %3 = vector.broadcast %c40_i32 : i32 to vector<1x128xi32>
    %4 = arith.cmpi slt, %2, %3 : vector<1x128xi32>
    %c0_2 = arith.constant 0 : index
    %c0_3 = arith.constant 0 : index
    %5 = vector.load %arg2[%c0_2, %c0_3] : memref<128x16xf32, #tpu.memory_space<vmem>>, vector<128x16xf32>
    %cst = arith.constant dense<0.000000e+00> : vector<128x128xf32>
    %6 = tpu.matmul %5, %1, %cst {dimension_numbers = #tpu.dot_dimension_numbers<[1], [0], [0], [1], [0, 0, 1, 1], [], []>} : vector<128x16xf32>, vector<16x128xf32>, vector<128x128xf32> -> vector<128x128xf32>
    %c0_4 = arith.constant 0 : index
    %c0_5 = arith.constant 0 : index
    %7 = vector.load %arg3[%c0_4, %c0_5] : memref<128x1xf32, #tpu.memory_space<vmem>>, vector<128x1xf32>
    %8 = vector.broadcast %7 : vector<128x1xf32> to vector<128x128xf32>
    %9 = arith.addf %6, %8 : vector<128x128xf32>
    %10 = vector.extract_strided_slice %9 {offsets = [0, 0], sizes = [64, 128], strides = [1, 1]} : vector<128x128xf32> to vector<64x128xf32>
    %11 = vector.extract_strided_slice %9 {offsets = [64, 0], sizes = [64, 128], strides = [1, 1]} : vector<128x128xf32> to vector<64x128xf32>
    %cst_6 = arith.constant 0.000000e+00 : f32
    %12 = vector.broadcast %cst_6 : f32 to vector<64x128xf32>
    %13 = arith.maximumf %11, %12 : vector<64x128xf32>
    %c0_7 = arith.constant 0 : index
    %c0_8 = arith.constant 0 : index
    %14 = vector.load %arg4[%c0_7, %c0_8] : memref<64x1xf32, #tpu.memory_space<vmem>>, vector<64x1xf32>
    %15 = vector.broadcast %14 : vector<64x1xf32> to vector<64x128xf32>
    %16 = arith.mulf %13, %15 : vector<64x128xf32>
    %c0_9 = arith.constant 0 : index
    %c0_10 = arith.constant 0 : index
    %17 = vector.load %arg5[%c0_9, %c0_10] : memref<64x1xf32, #tpu.memory_space<vmem>>, vector<64x1xf32>
    %18 = vector.broadcast %17 : vector<64x1xf32> to vector<64x128xf32>
    %19 = arith.addf %16, %18 : vector<64x128xf32>
    %cst_11 = arith.constant 0.000000e+00 : f32
    %20 = vector.shape_cast %4 : vector<1x128xi1> to vector<1x128xi1>
    %21 = vector.broadcast %20 : vector<1x128xi1> to vector<64x128xi1>
    %22 = vector.broadcast %cst_11 : f32 to vector<64x128xf32>
    %23 = arith.select %21, %19, %22 : vector<64x128xi1>, vector<64x128xf32>
    %24 = vector.extract_strided_slice %23 {offsets = [0, 0], sizes = [16, 128], strides = [1, 1]} : vector<64x128xf32> to vector<16x128xf32>
    %c2_i32 = arith.constant 2 : i32
    %25 = tpu.dynamic_rotate %24 by %c2_i32 dim 1 : vector<16x128xf32>, i32 -> vector<16x128xf32>
    %c0_12 = arith.constant 0 : index
    %c0_13 = arith.constant 0 : index
    %26 = vector.load %arg20[%c0_12, %c0_13] : memref<48x128xf32, #tpu.memory_space<vmem>>, vector<16x128xf32>
    tpu.vector_store %arg20[%c0_12, %c0_13], %25 {strides = array<i32>} : memref<48x128xf32, #tpu.memory_space<vmem>>, vector<16x128xf32>,
    %c16 = arith.constant 16 : index
    %c0_14 = arith.constant 0 : index
    %27 = vector.load %arg20[%c16, %c0_14] : memref<48x128xf32, #tpu.memory_space<vmem>>, vector<16x128xf32>
    tpu.vector_store %arg20[%c16, %c0_14], %24 {strides = array<i32>} : memref<48x128xf32, #tpu.memory_space<vmem>>, vector<16x128xf32>,
    %c126_i32 = arith.constant 126 : i32
    %28 = tpu.dynamic_rotate %24 by %c126_i32 dim 1 : vector<16x128xf32>, i32 -> vector<16x128xf32>
    %c32 = arith.constant 32 : index
    %c0_15 = arith.constant 0 : index
    %29 = vector.load %arg20[%c32, %c0_15] : memref<48x128xf32, #tpu.memory_space<vmem>>, vector<16x128xf32>
    tpu.vector_store %arg20[%c32, %c0_15], %28 {strides = array<i32>} : memref<48x128xf32, #tpu.memory_space<vmem>>, vector<16x128xf32>,
    %c0_16 = arith.constant 0 : index
    %c0_17 = arith.constant 0 : index
    %c0_18 = arith.constant 0 : index
    %30 = vector.load %arg6[%c0_16, %c0_17, %c0_18] : memref<3x16x48xf32, #tpu.memory_space<vmem>>, vector<1x16x48xf32>
    %31 = vector.shape_cast %30 : vector<1x16x48xf32> to vector<16x48xf32>
    %c0_19 = arith.constant 0 : index
    %c0_20 = arith.constant 0 : index
    %32 = vector.load %arg20[%c0_19, %c0_20] : memref<48x128xf32, #tpu.memory_space<vmem>>, vector<48x128xf32>
    %cst_21 = arith.constant dense<0.000000e+00> : vector<16x128xf32>
    %33 = tpu.matmul %31, %32, %cst_21 {dimension_numbers = #tpu.dot_dimension_numbers<[1], [0], [0], [1], [0, 0, 1, 1], [], []>} : vector<16x48xf32>, vector<48x128xf32>, vector<16x128xf32> -> vector<16x128xf32>
    %c0_22 = arith.constant 0 : index
    %c0_23 = arith.constant 0 : index
    %c0_24 = arith.constant 0 : index
    %34 = vector.load %arg7[%c0_22, %c0_23, %c0_24] : memref<3x16x1xf32, #tpu.memory_space<vmem>>, vector<1x16x1xf32>
    %35 = vector.shape_cast %34 : vector<1x16x1xf32> to vector<16x1xf32>
    %36 = vector.broadcast %35 : vector<16x1xf32> to vector<16x128xf32>
    %37 = arith.addf %33, %36 : vector<16x128xf32>
    %cst_25 = arith.constant 0.000000e+00 : f32
    %38 = vector.broadcast %cst_25 : f32 to vector<16x128xf32>
    %39 = arith.maximumf %37, %38 : vector<16x128xf32>
    %c0_26 = arith.constant 0 : index
    %c0_27 = arith.constant 0 : index
    %c0_28 = arith.constant 0 : index
    %40 = vector.load %arg8[%c0_26, %c0_27, %c0_28] : memref<3x16x1xf32, #tpu.memory_space<vmem>>, vector<1x16x1xf32>
    %41 = vector.shape_cast %40 : vector<1x16x1xf32> to vector<16x1xf32>
    %42 = vector.broadcast %41 : vector<16x1xf32> to vector<16x128xf32>
    %43 = arith.mulf %39, %42 : vector<16x128xf32>
    %c0_29 = arith.constant 0 : index
    %c0_30 = arith.constant 0 : index
    %c0_31 = arith.constant 0 : index
    %44 = vector.load %arg9[%c0_29, %c0_30, %c0_31] : memref<3x16x1xf32, #tpu.memory_space<vmem>>, vector<1x16x1xf32>
    %45 = vector.shape_cast %44 : vector<1x16x1xf32> to vector<16x1xf32>
    %46 = vector.broadcast %45 : vector<16x1xf32> to vector<16x128xf32>
    %47 = arith.addf %43, %46 : vector<16x128xf32>
    %cst_32 = arith.constant 0.000000e+00 : f32
    %48 = vector.shape_cast %4 : vector<1x128xi1> to vector<1x128xi1>
    %49 = vector.broadcast %48 : vector<1x128xi1> to vector<16x128xi1>
    %50 = vector.broadcast %cst_32 : f32 to vector<16x128xf32>
    %51 = arith.select %49, %47, %50 : vector<16x128xi1>, vector<16x128xf32>
    %c0_33 = arith.constant 0 : index
    %c0_34 = arith.constant 0 : index
    %52 = vector.load %arg19[%c0_33, %c0_34] : memref<64x128xf32, #tpu.memory_space<vmem>>, vector<16x128xf32>
    tpu.vector_store %arg19[%c0_33, %c0_34], %51 {strides = array<i32>} : memref<64x128xf32, #tpu.memory_space<vmem>>, vector<16x128xf32>,
    %53 = vector.extract_strided_slice %23 {offsets = [16, 0], sizes = [16, 128], strides = [1, 1]} : vector<64x128xf32> to vector<16x128xf32>
    %54 = arith.addf %51, %53 : vector<16x128xf32>
    %c2_i32_35 = arith.constant 2 : i32
    %55 = tpu.dynamic_rotate %54 by %c2_i32_35 dim 1 : vector<16x128xf32>, i32 -> vector<16x128xf32>
    %c0_36 = arith.constant 0 : index
    %c0_37 = arith.constant 0 : index
    %56 = vector.load %arg20[%c0_36, %c0_37] : memref<48x128xf32, #tpu.memory_space<vmem>>, vector<16x128xf32>
    tpu.vector_store %arg20[%c0_36, %c0_37], %55 {strides = array<i32>} : memref<48x128xf32, #tpu.memory_space<vmem>>, vector<16x128xf32>,
    %c16_38 = arith.constant 16 : index
    %c0_39 = arith.constant 0 : index
    %57 = vector.load %arg20[%c16_38, %c0_39] : memref<48x128xf32, #tpu.memory_space<vmem>>, vector<16x128xf32>
    tpu.vector_store %arg20[%c16_38, %c0_39], %54 {strides = array<i32>} : memref<48x128xf32, #tpu.memory_space<vmem>>, vector<16x128xf32>,
    %c126_i32_40 = arith.constant 126 : i32
    %58 = tpu.dynamic_rotate %54 by %c126_i32_40 dim 1 : vector<16x128xf32>, i32 -> vector<16x128xf32>
    %c32_41 = arith.constant 32 : index
    %c0_42 = arith.constant 0 : index
    %59 = vector.load %arg20[%c32_41, %c0_42] : memref<48x128xf32, #tpu.memory_space<vmem>>, vector<16x128xf32>
    tpu.vector_store %arg20[%c32_41, %c0_42], %58 {strides = array<i32>} : memref<48x128xf32, #tpu.memory_space<vmem>>, vector<16x128xf32>,
    %c1 = arith.constant 1 : index
    %c0_43 = arith.constant 0 : index
    %c0_44 = arith.constant 0 : index
    %60 = vector.load %arg6[%c1, %c0_43, %c0_44] : memref<3x16x48xf32, #tpu.memory_space<vmem>>, vector<1x16x48xf32>
    %61 = vector.shape_cast %60 : vector<1x16x48xf32> to vector<16x48xf32>
    %c0_45 = arith.constant 0 : index
    %c0_46 = arith.constant 0 : index
    %62 = vector.load %arg20[%c0_45, %c0_46] : memref<48x128xf32, #tpu.memory_space<vmem>>, vector<48x128xf32>
    %cst_47 = arith.constant dense<0.000000e+00> : vector<16x128xf32>
    %63 = tpu.matmul %61, %62, %cst_47 {dimension_numbers = #tpu.dot_dimension_numbers<[1], [0], [0], [1], [0, 0, 1, 1], [], []>} : vector<16x48xf32>, vector<48x128xf32>, vector<16x128xf32> -> vector<16x128xf32>
    %c1_48 = arith.constant 1 : index
    %c0_49 = arith.constant 0 : index
    %c0_50 = arith.constant 0 : index
    %64 = vector.load %arg7[%c1_48, %c0_49, %c0_50] : memref<3x16x1xf32, #tpu.memory_space<vmem>>, vector<1x16x1xf32>
    %65 = vector.shape_cast %64 : vector<1x16x1xf32> to vector<16x1xf32>
    %66 = vector.broadcast %65 : vector<16x1xf32> to vector<16x128xf32>
    %67 = arith.addf %63, %66 : vector<16x128xf32>
    %cst_51 = arith.constant 0.000000e+00 : f32
    %68 = vector.broadcast %cst_51 : f32 to vector<16x128xf32>
    %69 = arith.maximumf %67, %68 : vector<16x128xf32>
    %c1_52 = arith.constant 1 : index
    %c0_53 = arith.constant 0 : index
    %c0_54 = arith.constant 0 : index
    %70 = vector.load %arg8[%c1_52, %c0_53, %c0_54] : memref<3x16x1xf32, #tpu.memory_space<vmem>>, vector<1x16x1xf32>
    %71 = vector.shape_cast %70 : vector<1x16x1xf32> to vector<16x1xf32>
    %72 = vector.broadcast %71 : vector<16x1xf32> to vector<16x128xf32>
    %73 = arith.mulf %69, %72 : vector<16x128xf32>
    %c1_55 = arith.constant 1 : index
    %c0_56 = arith.constant 0 : index
    %c0_57 = arith.constant 0 : index
    %74 = vector.load %arg9[%c1_55, %c0_56, %c0_57] : memref<3x16x1xf32, #tpu.memory_space<vmem>>, vector<1x16x1xf32>
    %75 = vector.shape_cast %74 : vector<1x16x1xf32> to vector<16x1xf32>
    %76 = vector.broadcast %75 : vector<16x1xf32> to vector<16x128xf32>
    %77 = arith.addf %73, %76 : vector<16x128xf32>
    %cst_58 = arith.constant 0.000000e+00 : f32
    %78 = vector.shape_cast %4 : vector<1x128xi1> to vector<1x128xi1>
    %79 = vector.broadcast %78 : vector<1x128xi1> to vector<16x128xi1>
    %80 = vector.broadcast %cst_58 : f32 to vector<16x128xf32>
    %81 = arith.select %79, %77, %80 : vector<16x128xi1>, vector<16x128xf32>
    %c16_59 = arith.constant 16 : index
    %c0_60 = arith.constant 0 : index
    %82 = vector.load %arg19[%c16_59, %c0_60] : memref<64x128xf32, #tpu.memory_space<vmem>>, vector<16x128xf32>
    tpu.vector_store %arg19[%c16_59, %c0_60], %81 {strides = array<i32>} : memref<64x128xf32, #tpu.memory_space<vmem>>, vector<16x128xf32>,
    %83 = vector.extract_strided_slice %23 {offsets = [32, 0], sizes = [16, 128], strides = [1, 1]} : vector<64x128xf32> to vector<16x128xf32>
    %84 = arith.addf %81, %83 : vector<16x128xf32>
    %c2_i32_61 = arith.constant 2 : i32
    %85 = tpu.dynamic_rotate %84 by %c2_i32_61 dim 1 : vector<16x128xf32>, i32 -> vector<16x128xf32>
    %c0_62 = arith.constant 0 : index
    %c0_63 = arith.constant 0 : index
    %86 = vector.load %arg20[%c0_62, %c0_63] : memref<48x128xf32, #tpu.memory_space<vmem>>, vector<16x128xf32>
    tpu.vector_store %arg20[%c0_62, %c0_63], %85 {strides = array<i32>} : memref<48x128xf32, #tpu.memory_space<vmem>>, vector<16x128xf32>,
    %c16_64 = arith.constant 16 : index
    %c0_65 = arith.constant 0 : index
    %87 = vector.load %arg20[%c16_64, %c0_65] : memref<48x128xf32, #tpu.memory_space<vmem>>, vector<16x128xf32>
    tpu.vector_store %arg20[%c16_64, %c0_65], %84 {strides = array<i32>} : memref<48x128xf32, #tpu.memory_space<vmem>>, vector<16x128xf32>,
    %c126_i32_66 = arith.constant 126 : i32
    %88 = tpu.dynamic_rotate %84 by %c126_i32_66 dim 1 : vector<16x128xf32>, i32 -> vector<16x128xf32>
    %c32_67 = arith.constant 32 : index
    %c0_68 = arith.constant 0 : index
    %89 = vector.load %arg20[%c32_67, %c0_68] : memref<48x128xf32, #tpu.memory_space<vmem>>, vector<16x128xf32>
    tpu.vector_store %arg20[%c32_67, %c0_68], %88 {strides = array<i32>} : memref<48x128xf32, #tpu.memory_space<vmem>>, vector<16x128xf32>,
    %c2 = arith.constant 2 : index
    %c0_69 = arith.constant 0 : index
    %c0_70 = arith.constant 0 : index
    %90 = vector.load %arg6[%c2, %c0_69, %c0_70] : memref<3x16x48xf32, #tpu.memory_space<vmem>>, vector<1x16x48xf32>
    %91 = vector.shape_cast %90 : vector<1x16x48xf32> to vector<16x48xf32>
    %c0_71 = arith.constant 0 : index
    %c0_72 = arith.constant 0 : index
    %92 = vector.load %arg20[%c0_71, %c0_72] : memref<48x128xf32, #tpu.memory_space<vmem>>, vector<48x128xf32>
    %cst_73 = arith.constant dense<0.000000e+00> : vector<16x128xf32>
    %93 = tpu.matmul %91, %92, %cst_73 {dimension_numbers = #tpu.dot_dimension_numbers<[1], [0], [0], [1], [0, 0, 1, 1], [], []>} : vector<16x48xf32>, vector<48x128xf32>, vector<16x128xf32> -> vector<16x128xf32>
    %c2_74 = arith.constant 2 : index
    %c0_75 = arith.constant 0 : index
    %c0_76 = arith.constant 0 : index
    %94 = vector.load %arg7[%c2_74, %c0_75, %c0_76] : memref<3x16x1xf32, #tpu.memory_space<vmem>>, vector<1x16x1xf32>
    %95 = vector.shape_cast %94 : vector<1x16x1xf32> to vector<16x1xf32>
    %96 = vector.broadcast %95 : vector<16x1xf32> to vector<16x128xf32>
    %97 = arith.addf %93, %96 : vector<16x128xf32>
    %cst_77 = arith.constant 0.000000e+00 : f32
    %98 = vector.broadcast %cst_77 : f32 to vector<16x128xf32>
    %99 = arith.maximumf %97, %98 : vector<16x128xf32>
    %c2_78 = arith.constant 2 : index
    %c0_79 = arith.constant 0 : index
    %c0_80 = arith.constant 0 : index
    %100 = vector.load %arg8[%c2_78, %c0_79, %c0_80] : memref<3x16x1xf32, #tpu.memory_space<vmem>>, vector<1x16x1xf32>
    %101 = vector.shape_cast %100 : vector<1x16x1xf32> to vector<16x1xf32>
    %102 = vector.broadcast %101 : vector<16x1xf32> to vector<16x128xf32>
    %103 = arith.mulf %99, %102 : vector<16x128xf32>
    %c2_81 = arith.constant 2 : index
    %c0_82 = arith.constant 0 : index
    %c0_83 = arith.constant 0 : index
    %104 = vector.load %arg9[%c2_81, %c0_82, %c0_83] : memref<3x16x1xf32, #tpu.memory_space<vmem>>, vector<1x16x1xf32>
    %105 = vector.shape_cast %104 : vector<1x16x1xf32> to vector<16x1xf32>
    %106 = vector.broadcast %105 : vector<16x1xf32> to vector<16x128xf32>
    %107 = arith.addf %103, %106 : vector<16x128xf32>
    %cst_84 = arith.constant 0.000000e+00 : f32
    %108 = vector.shape_cast %4 : vector<1x128xi1> to vector<1x128xi1>
    %109 = vector.broadcast %108 : vector<1x128xi1> to vector<16x128xi1>
    %110 = vector.broadcast %cst_84 : f32 to vector<16x128xf32>
    %111 = arith.select %109, %107, %110 : vector<16x128xi1>, vector<16x128xf32>
    %c32_85 = arith.constant 32 : index
    %c0_86 = arith.constant 0 : index
    %112 = vector.load %arg19[%c32_85, %c0_86] : memref<64x128xf32, #tpu.memory_space<vmem>>, vector<16x128xf32>
    tpu.vector_store %arg19[%c32_85, %c0_86], %111 {strides = array<i32>} : memref<64x128xf32, #tpu.memory_space<vmem>>, vector<16x128xf32>,
    %113 = vector.extract_strided_slice %23 {offsets = [48, 0], sizes = [16, 128], strides = [1, 1]} : vector<64x128xf32> to vector<16x128xf32>
    %c48 = arith.constant 48 : index
    %c0_87 = arith.constant 0 : index
    %114 = vector.load %arg19[%c48, %c0_87] : memref<64x128xf32, #tpu.memory_space<vmem>>, vector<16x128xf32>
    tpu.vector_store %arg19[%c48, %c0_87], %113 {strides = array<i32>} : memref<64x128xf32, #tpu.memory_space<vmem>>, vector<16x128xf32>,
    %c0_88 = arith.constant 0 : index
    %c0_89 = arith.constant 0 : index
    %115 = vector.load %arg10[%c0_88, %c0_89] : memref<64x64xf32, #tpu.memory_space<vmem>>, vector<64x64xf32>
    %c0_90 = arith.constant 0 : index
    %c0_91 = arith.constant 0 : index
    %116 = vector.load %arg19[%c0_90, %c0_91] : memref<64x128xf32, #tpu.memory_space<vmem>>, vector<64x128xf32>
    %cst_92 = arith.constant dense<0.000000e+00> : vector<64x128xf32>
    %117 = tpu.matmul %115, %116, %cst_92 {dimension_numbers = #tpu.dot_dimension_numbers<[1], [0], [0], [1], [0, 0, 1, 1], [], []>} : vector<64x64xf32>, vector<64x128xf32>, vector<64x128xf32> -> vector<64x128xf32>
    %c0_93 = arith.constant 0 : index
    %c0_94 = arith.constant 0 : index
    %118 = vector.load %arg11[%c0_93, %c0_94] : memref<64x1xf32, #tpu.memory_space<vmem>>, vector<64x1xf32>
    %119 = vector.broadcast %118 : vector<64x1xf32> to vector<64x128xf32>
    %120 = arith.addf %117, %119 : vector<64x128xf32>
    %cst_95 = arith.constant 0.000000e+00 : f32
    %121 = vector.broadcast %cst_95 : f32 to vector<64x128xf32>
    %122 = arith.maximumf %120, %121 : vector<64x128xf32>
    %c0_96 = arith.constant 0 : index
    %c0_97 = arith.constant 0 : index
    %123 = vector.load %arg12[%c0_96, %c0_97] : memref<64x1xf32, #tpu.memory_space<vmem>>, vector<64x1xf32>
    %124 = vector.broadcast %123 : vector<64x1xf32> to vector<64x128xf32>
    %125 = arith.mulf %122, %124 : vector<64x128xf32>
    %c0_98 = arith.constant 0 : index
    %c0_99 = arith.constant 0 : index
    %126 = vector.load %arg13[%c0_98, %c0_99] : memref<64x1xf32, #tpu.memory_space<vmem>>, vector<64x1xf32>
    %127 = vector.broadcast %126 : vector<64x1xf32> to vector<64x128xf32>
    %128 = arith.addf %125, %127 : vector<64x128xf32>
    %c0_100 = arith.constant 0 : index
    %c0_101 = arith.constant 0 : index
    %129 = vector.load %arg11[%c0_100, %c0_101] : memref<64x1xf32, #tpu.memory_space<vmem>>, vector<64x1xf32>
    %cst_102 = arith.constant 0.000000e+00 : f32
    %130 = vector.broadcast %cst_102 : f32 to vector<64x1xf32>
    %131 = arith.maximumf %129, %130 : vector<64x1xf32>
    %c0_103 = arith.constant 0 : index
    %c0_104 = arith.constant 0 : index
    %132 = vector.load %arg12[%c0_103, %c0_104] : memref<64x1xf32, #tpu.memory_space<vmem>>, vector<64x1xf32>
    %133 = arith.mulf %131, %132 : vector<64x1xf32>
    %c0_105 = arith.constant 0 : index
    %c0_106 = arith.constant 0 : index
    %134 = vector.load %arg13[%c0_105, %c0_106] : memref<64x1xf32, #tpu.memory_space<vmem>>, vector<64x1xf32>
    %135 = arith.addf %133, %134 : vector<64x1xf32>
    %cst_107 = arith.constant dense<0.000000e+00> : vector<64xf32>
    %136 = vector.multi_reduction <add>, %128, %cst_107 [1] : vector<64x128xf32> to vector<64xf32>
    %137 = vector.shape_cast %136 : vector<64xf32> to vector<64x1xf32>
    %cst_108 = arith.constant 8.800000e+01 : f32
    %138 = vector.broadcast %cst_108 : f32 to vector<64x1xf32>
    %139 = arith.mulf %138, %135 : vector<64x1xf32>
    %140 = arith.subf %137, %139 : vector<64x1xf32>
    %cst_109 = arith.constant 2.500000e-02 : f32
    %141 = vector.broadcast %cst_109 : f32 to vector<64x1xf32>
    %142 = arith.mulf %140, %141 : vector<64x1xf32>
    %c0_110 = arith.constant 0 : index
    %c0_111 = arith.constant 0 : index
    %143 = vector.load %arg14[%c0_110, %c0_111] : memref<32x64xf32, #tpu.memory_space<vmem>>, vector<32x64xf32>
    %cst_112 = arith.constant dense<0.000000e+00> : vector<32x1xf32>
    %144 = tpu.matmul %143, %142, %cst_112 {dimension_numbers = #tpu.dot_dimension_numbers<[1], [0], [0], [1], [0, 0, 1, 1], [], []>} : vector<32x64xf32>, vector<64x1xf32>, vector<32x1xf32> -> vector<32x1xf32>
    %c0_113 = arith.constant 0 : index
    %c0_114 = arith.constant 0 : index
    %145 = vector.load %arg15[%c0_113, %c0_114] : memref<32x1xf32, #tpu.memory_space<vmem>>, vector<32x1xf32>
    %146 = arith.addf %144, %145 : vector<32x1xf32>
    %cst_115 = arith.constant 0.000000e+00 : f32
    %147 = vector.broadcast %cst_115 : f32 to vector<32x1xf32>
    %148 = arith.maximumf %146, %147 : vector<32x1xf32>
    %c0_116 = arith.constant 0 : index
    %c0_117 = arith.constant 0 : index
    %149 = vector.load %arg16[%c0_116, %c0_117] : memref<64x32xf32, #tpu.memory_space<vmem>>, vector<64x32xf32>
    %cst_118 = arith.constant dense<0.000000e+00> : vector<64x1xf32>
    %150 = tpu.matmul %149, %148, %cst_118 {dimension_numbers = #tpu.dot_dimension_numbers<[1], [0], [0], [1], [0, 0, 1, 1], [], []>} : vector<64x32xf32>, vector<32x1xf32>, vector<64x1xf32> -> vector<64x1xf32>
    %c0_119 = arith.constant 0 : index
    %c0_120 = arith.constant 0 : index
    %151 = vector.load %arg17[%c0_119, %c0_120] : memref<64x1xf32, #tpu.memory_space<vmem>>, vector<64x1xf32>
    %152 = arith.addf %150, %151 : vector<64x1xf32>
    %153 = arith.negf %152 : vector<64x1xf32>
    %154 = math.exp %153 : vector<64x1xf32>
    %cst_121 = arith.constant 1.000000e+00 : f32
    %155 = vector.broadcast %cst_121 : f32 to vector<64x1xf32>
    %156 = arith.addf %155, %154 : vector<64x1xf32>
    %157 = arith.divf %155, %156 : vector<64x1xf32>
    %158 = vector.broadcast %157 : vector<64x1xf32> to vector<64x128xf32>
    %159 = arith.mulf %128, %158 : vector<64x128xf32>
    %160 = arith.addf %159, %10 : vector<64x128xf32>
    %c0_122 = arith.constant 0 : index
    %c0_123 = arith.constant 0 : index
    %c0_124 = arith.constant 0 : index
    %161 = vector.load %arg18[%c0_122, %c0_123, %c0_124] : memref<1x64x128xf32, #tpu.memory_space<vmem>>, vector<1x64x128xf32>
    %162 = vector.shape_cast %161 : vector<1x64x128xf32> to vector<64x128xf32>
    %163 = vector.shape_cast %160 : vector<64x128xf32> to vector<1x64x128xf32>
    tpu.vector_store %arg18[%c0_122, %c0_123, %c0_124], %163 {strides = array<i32>} : memref<1x64x128xf32, #tpu.memory_space<vmem>>, vector<1x64x128xf32>,
    return
  }
  func.func @transform_0(%arg0: i32) -> (i32, i32, i32) {
    %c0_i32 = arith.constant 0 : i32
    %c0_i32_0 = arith.constant 0 : i32
    %c0_i32_1 = arith.constant 0 : i32
    return %arg0, %c0_i32, %c0_i32_0 : i32, i32, i32
  }
  func.func @transform_1(%arg0: i32) -> (i32, i32) {
    %c0_i32 = arith.constant 0 : i32
    %c0_i32_0 = arith.constant 0 : i32
    %c0_i32_1 = arith.constant 0 : i32
    return %c0_i32, %c0_i32_0 : i32, i32
  }
  func.func @transform_2(%arg0: i32) -> (i32, i32) {
    %c0_i32 = arith.constant 0 : i32
    %c0_i32_0 = arith.constant 0 : i32
    %c0_i32_1 = arith.constant 0 : i32
    return %c0_i32, %c0_i32_0 : i32, i32
  }
  func.func @transform_3(%arg0: i32) -> (i32, i32) {
    %c0_i32 = arith.constant 0 : i32
    %c0_i32_0 = arith.constant 0 : i32
    %c0_i32_1 = arith.constant 0 : i32
    return %c0_i32, %c0_i32_0 : i32, i32
  }
  func.func @transform_4(%arg0: i32) -> (i32, i32) {
    %c0_i32 = arith.constant 0 : i32
    %c0_i32_0 = arith.constant 0 : i32
    %c0_i32_1 = arith.constant 0 : i32
    return %c0_i32, %c0_i32_0 : i32, i32
  }
  func.func @transform_5(%arg0: i32) -> (i32, i32, i32) {
    %c0_i32 = arith.constant 0 : i32
    %c0_i32_0 = arith.constant 0 : i32
    %c0_i32_1 = arith.constant 0 : i32
    %c0_i32_2 = arith.constant 0 : i32
    return %c0_i32, %c0_i32_0, %c0_i32_1 : i32, i32, i32
  }
  func.func @transform_6(%arg0: i32) -> (i32, i32, i32) {
    %c0_i32 = arith.constant 0 : i32
    %c0_i32_0 = arith.constant 0 : i32
    %c0_i32_1 = arith.constant 0 : i32
    %c0_i32_2 = arith.constant 0 : i32
    return %c0_i32, %c0_i32_0, %c0_i32_1 : i32, i32, i32
  }
  func.func @transform_7(%arg0: i32) -> (i32, i32, i32) {
    %c0_i32 = arith.constant 0 : i32
    %c0_i32_0 = arith.constant 0 : i32
    %c0_i32_1 = arith.constant 0 : i32
    %c0_i32_2 = arith.constant 0 : i32
    return %c0_i32, %c0_i32_0, %c0_i32_1 : i32, i32, i32
  }
  func.func @transform_8(%arg0: i32) -> (i32, i32, i32) {
    %c0_i32 = arith.constant 0 : i32
    %c0_i32_0 = arith.constant 0 : i32
    %c0_i32_1 = arith.constant 0 : i32
    %c0_i32_2 = arith.constant 0 : i32
    return %c0_i32, %c0_i32_0, %c0_i32_1 : i32, i32, i32
  }
  func.func @transform_9(%arg0: i32) -> (i32, i32) {
    %c0_i32 = arith.constant 0 : i32
    %c0_i32_0 = arith.constant 0 : i32
    %c0_i32_1 = arith.constant 0 : i32
    return %c0_i32, %c0_i32_0 : i32, i32
  }
  func.func @transform_10(%arg0: i32) -> (i32, i32) {
    %c0_i32 = arith.constant 0 : i32
    %c0_i32_0 = arith.constant 0 : i32
    %c0_i32_1 = arith.constant 0 : i32
    return %c0_i32, %c0_i32_0 : i32, i32
  }
  func.func @transform_11(%arg0: i32) -> (i32, i32) {
    %c0_i32 = arith.constant 0 : i32
    %c0_i32_0 = arith.constant 0 : i32
    %c0_i32_1 = arith.constant 0 : i32
    return %c0_i32, %c0_i32_0 : i32, i32
  }
  func.func @transform_12(%arg0: i32) -> (i32, i32) {
    %c0_i32 = arith.constant 0 : i32
    %c0_i32_0 = arith.constant 0 : i32
    %c0_i32_1 = arith.constant 0 : i32
    return %c0_i32, %c0_i32_0 : i32, i32
  }
  func.func @transform_13(%arg0: i32) -> (i32, i32) {
    %c0_i32 = arith.constant 0 : i32
    %c0_i32_0 = arith.constant 0 : i32
    %c0_i32_1 = arith.constant 0 : i32
    return %c0_i32, %c0_i32_0 : i32, i32
  }
  func.func @transform_14(%arg0: i32) -> (i32, i32) {
    %c0_i32 = arith.constant 0 : i32
    %c0_i32_0 = arith.constant 0 : i32
    %c0_i32_1 = arith.constant 0 : i32
    return %c0_i32, %c0_i32_0 : i32, i32
  }
  func.func @transform_15(%arg0: i32) -> (i32, i32) {
    %c0_i32 = arith.constant 0 : i32
    %c0_i32_0 = arith.constant 0 : i32
    %c0_i32_1 = arith.constant 0 : i32
    return %c0_i32, %c0_i32_0 : i32, i32
  }
  func.func @transform_16(%arg0: i32) -> (i32, i32) {
    %c0_i32 = arith.constant 0 : i32
    %c0_i32_0 = arith.constant 0 : i32
    %c0_i32_1 = arith.constant 0 : i32
    return %c0_i32, %c0_i32_0 : i32, i32
  }
  func.func @transform_17(%arg0: i32) -> (i32, i32, i32) {
    %c0_i32 = arith.constant 0 : i32
    %c0_i32_0 = arith.constant 0 : i32
    %c0_i32_1 = arith.constant 0 : i32
    return %arg0, %c0_i32, %c0_i32_0 : i32, i32, i32
  }
}

module attributes {stable_mosaic.version = 11 : i64} {
  func.func @_se_res2block_kernel(%arg0: i32, %arg1: memref<1x16x128xf32, #tpu.memory_space<vmem>>, %arg2: memref<128x16xf32, #tpu.memory_space<vmem>>, %arg3: memref<128x1xf32, #tpu.memory_space<vmem>>, %arg4: memref<64x1xf32, #tpu.memory_space<vmem>>, %arg5: memref<64x1xf32, #tpu.memory_space<vmem>>, %arg6: memref<3x16x48xf32, #tpu.memory_space<vmem>>, %arg7: memref<3x16x1xf32, #tpu.memory_space<vmem>>, %arg8: memref<3x16x1xf32, #tpu.memory_space<vmem>>, %arg9: memref<3x16x1xf32, #tpu.memory_space<vmem>>, %arg10: memref<64x64xf32, #tpu.memory_space<vmem>>, %arg11: memref<64x1xf32, #tpu.memory_space<vmem>>, %arg12: memref<64x1xf32, #tpu.memory_space<vmem>>, %arg13: memref<64x1xf32, #tpu.memory_space<vmem>>, %arg14: memref<32x64xf32, #tpu.memory_space<vmem>>, %arg15: memref<32x1xf32, #tpu.memory_space<vmem>>, %arg16: memref<64x32xf32, #tpu.memory_space<vmem>>, %arg17: memref<64x1xf32, #tpu.memory_space<vmem>>, %arg18: memref<1x64x128xf32, #tpu.memory_space<vmem>>, %arg19: memref<64x128xf32, #tpu.memory_space<vmem>>, %arg20: memref<48x128xf32, #tpu.memory_space<vmem>>) attributes {dimension_semantics = [#tpu.dimension_semantics<parallel>], iteration_bounds = array<i64: 2>, scalar_prefetch = 0 : i64, scratch_operands = 2 : i64, tpu.core_type = #tpu.core_type<tc>, window_params = [{transform_indices = @transform_0, window_bounds = array<i64: 1, 16, 128>}, {pipeline_mode = #tpu.pipeline_mode<synchronous>, transform_indices = @transform_1, window_bounds = array<i64: 128, 16>}, {pipeline_mode = #tpu.pipeline_mode<synchronous>, transform_indices = @transform_2, window_bounds = array<i64: 128, 1>}, {pipeline_mode = #tpu.pipeline_mode<synchronous>, transform_indices = @transform_3, window_bounds = array<i64: 64, 1>}, {pipeline_mode = #tpu.pipeline_mode<synchronous>, transform_indices = @transform_4, window_bounds = array<i64: 64, 1>}, {pipeline_mode = #tpu.pipeline_mode<synchronous>, transform_indices = @transform_5, window_bounds = array<i64: 3, 16, 48>}, {pipeline_mode = #tpu.pipeline_mode<synchronous>, transform_indices = @transform_6, window_bounds = array<i64: 3, 16, 1>}, {pipeline_mode = #tpu.pipeline_mode<synchronous>, transform_indices = @transform_7, window_bounds = array<i64: 3, 16, 1>}, {pipeline_mode = #tpu.pipeline_mode<synchronous>, transform_indices = @transform_8, window_bounds = array<i64: 3, 16, 1>}, {pipeline_mode = #tpu.pipeline_mode<synchronous>, transform_indices = @transform_9, window_bounds = array<i64: 64, 64>}, {pipeline_mode = #tpu.pipeline_mode<synchronous>, transform_indices = @transform_10, window_bounds = array<i64: 64, 1>}, {pipeline_mode = #tpu.pipeline_mode<synchronous>, transform_indices = @transform_11, window_bounds = array<i64: 64, 1>}, {pipeline_mode = #tpu.pipeline_mode<synchronous>, transform_indices = @transform_12, window_bounds = array<i64: 64, 1>}, {pipeline_mode = #tpu.pipeline_mode<synchronous>, transform_indices = @transform_13, window_bounds = array<i64: 32, 64>}, {pipeline_mode = #tpu.pipeline_mode<synchronous>, transform_indices = @transform_14, window_bounds = array<i64: 32, 1>}, {pipeline_mode = #tpu.pipeline_mode<synchronous>, transform_indices = @transform_15, window_bounds = array<i64: 64, 32>}, {pipeline_mode = #tpu.pipeline_mode<synchronous>, transform_indices = @transform_16, window_bounds = array<i64: 64, 1>}, {transform_indices = @transform_17, window_bounds = array<i64: 1, 64, 128>}]} {
    %c0 = arith.constant 0 : index
    %c0_0 = arith.constant 0 : index
    %c0_1 = arith.constant 0 : index
    %0 = vector.load %arg1[%c0, %c0_0, %c0_1] : memref<1x16x128xf32, #tpu.memory_space<vmem>>, vector<1x16x128xf32>
    %1 = vector.shape_cast %0 : vector<1x16x128xf32> to vector<16x128xf32>
    %2 = tpu.iota {dimensions = array<i32: 1>} : vector<1x128xi32>
    %c40_i32 = arith.constant 40 : i32
    %3 = vector.broadcast %c40_i32 : i32 to vector<1x128xi32>
    %4 = arith.cmpi slt, %2, %3 : vector<1x128xi32>
    %c0_2 = arith.constant 0 : index
    %c0_3 = arith.constant 0 : index
    %5 = vector.load %arg2[%c0_2, %c0_3] : memref<128x16xf32, #tpu.memory_space<vmem>>, vector<128x16xf32>
    %cst = arith.constant dense<0.000000e+00> : vector<128x128xf32>
    %6 = tpu.matmul %5, %1, %cst {dimension_numbers = #tpu.dot_dimension_numbers<[1], [0], [0], [1], [0, 0, 1, 1], [], []>} : vector<128x16xf32>, vector<16x128xf32>, vector<128x128xf32> -> vector<128x128xf32>
    %c0_4 = arith.constant 0 : index
    %c0_5 = arith.constant 0 : index
    %7 = vector.load %arg3[%c0_4, %c0_5] : memref<128x1xf32, #tpu.memory_space<vmem>>, vector<128x1xf32>
    %8 = vector.broadcast %7 : vector<128x1xf32> to vector<128x128xf32>
    %9 = arith.addf %6, %8 : vector<128x128xf32>
    %10 = vector.extract_strided_slice %9 {offsets = [0, 0], sizes = [64, 128], strides = [1, 1]} : vector<128x128xf32> to vector<64x128xf32>
    %11 = vector.extract_strided_slice %9 {offsets = [64, 0], sizes = [64, 128], strides = [1, 1]} : vector<128x128xf32> to vector<64x128xf32>
    %cst_6 = arith.constant 0.000000e+00 : f32
    %12 = vector.broadcast %cst_6 : f32 to vector<64x128xf32>
    %13 = arith.maximumf %11, %12 : vector<64x128xf32>
    %c0_7 = arith.constant 0 : index
    %c0_8 = arith.constant 0 : index
    %14 = vector.load %arg4[%c0_7, %c0_8] : memref<64x1xf32, #tpu.memory_space<vmem>>, vector<64x1xf32>
    %15 = vector.broadcast %14 : vector<64x1xf32> to vector<64x128xf32>
    %16 = arith.mulf %13, %15 : vector<64x128xf32>
    %c0_9 = arith.constant 0 : index
    %c0_10 = arith.constant 0 : index
    %17 = vector.load %arg5[%c0_9, %c0_10] : memref<64x1xf32, #tpu.memory_space<vmem>>, vector<64x1xf32>
    %18 = vector.broadcast %17 : vector<64x1xf32> to vector<64x128xf32>
    %19 = arith.addf %16, %18 : vector<64x128xf32>
    %cst_11 = arith.constant 0.000000e+00 : f32
    %20 = vector.shape_cast %4 : vector<1x128xi1> to vector<1x128xi1>
    %21 = vector.broadcast %20 : vector<1x128xi1> to vector<64x128xi1>
    %22 = vector.broadcast %cst_11 : f32 to vector<64x128xf32>
    %23 = arith.select %21, %19, %22 : vector<64x128xi1>, vector<64x128xf32>
    %24 = vector.extract_strided_slice %23 {offsets = [0, 0], sizes = [16, 128], strides = [1, 1]} : vector<64x128xf32> to vector<16x128xf32>
    %c2_i32 = arith.constant 2 : i32
    %25 = tpu.dynamic_rotate %24 by %c2_i32 dim 1 : vector<16x128xf32>, i32 -> vector<16x128xf32>
    %c0_12 = arith.constant 0 : index
    %c0_13 = arith.constant 0 : index
    %26 = vector.load %arg20[%c0_12, %c0_13] : memref<48x128xf32, #tpu.memory_space<vmem>>, vector<16x128xf32>
    tpu.vector_store %arg20[%c0_12, %c0_13], %25 {strides = array<i32>} : memref<48x128xf32, #tpu.memory_space<vmem>>, vector<16x128xf32>,
    %c16 = arith.constant 16 : index
    %c0_14 = arith.constant 0 : index
    %27 = vector.load %arg20[%c16, %c0_14] : memref<48x128xf32, #tpu.memory_space<vmem>>, vector<16x128xf32>
    tpu.vector_store %arg20[%c16, %c0_14], %24 {strides = array<i32>} : memref<48x128xf32, #tpu.memory_space<vmem>>, vector<16x128xf32>,
    %c126_i32 = arith.constant 126 : i32
    %28 = tpu.dynamic_rotate %24 by %c126_i32 dim 1 : vector<16x128xf32>, i32 -> vector<16x128xf32>
    %c32 = arith.constant 32 : index
    %c0_15 = arith.constant 0 : index
    %29 = vector.load %arg20[%c32, %c0_15] : memref<48x128xf32, #tpu.memory_space<vmem>>, vector<16x128xf32>
    tpu.vector_store %arg20[%c32, %c0_15], %28 {strides = array<i32>} : memref<48x128xf32, #tpu.memory_space<vmem>>, vector<16x128xf32>,
    %c0_16 = arith.constant 0 : index
    %c0_17 = arith.constant 0 : index
    %c0_18 = arith.constant 0 : index
    %30 = vector.load %arg6[%c0_16, %c0_17, %c0_18] : memref<3x16x48xf32, #tpu.memory_space<vmem>>, vector<1x16x48xf32>
    %31 = vector.shape_cast %30 : vector<1x16x48xf32> to vector<16x48xf32>
    %c0_19 = arith.constant 0 : index
    %c0_20 = arith.constant 0 : index
    %32 = vector.load %arg20[%c0_19, %c0_20] : memref<48x128xf32, #tpu.memory_space<vmem>>, vector<48x128xf32>
    %cst_21 = arith.constant dense<0.000000e+00> : vector<16x128xf32>
    %33 = tpu.matmul %31, %32, %cst_21 {dimension_numbers = #tpu.dot_dimension_numbers<[1], [0], [0], [1], [0, 0, 1, 1], [], []>} : vector<16x48xf32>, vector<48x128xf32>, vector<16x128xf32> -> vector<16x128xf32>
    %c0_22 = arith.constant 0 : index
    %c0_23 = arith.constant 0 : index
    %c0_24 = arith.constant 0 : index
    %34 = vector.load %arg7[%c0_22, %c0_23, %c0_24] : memref<3x16x1xf32, #tpu.memory_space<vmem>>, vector<1x16x1xf32>
    %35 = vector.shape_cast %34 : vector<1x16x1xf32> to vector<16x1xf32>
    %36 = vector.broadcast %35 : vector<16x1xf32> to vector<16x128xf32>
    %37 = arith.addf %33, %36 : vector<16x128xf32>
    %cst_25 = arith.constant 0.000000e+00 : f32
    %38 = vector.broadcast %cst_25 : f32 to vector<16x128xf32>
    %39 = arith.maximumf %37, %38 : vector<16x128xf32>
    %c0_26 = arith.constant 0 : index
    %c0_27 = arith.constant 0 : index
    %c0_28 = arith.constant 0 : index
    %40 = vector.load %arg8[%c0_26, %c0_27, %c0_28] : memref<3x16x1xf32, #tpu.memory_space<vmem>>, vector<1x16x1xf32>
    %41 = vector.shape_cast %40 : vector<1x16x1xf32> to vector<16x1xf32>
    %42 = vector.broadcast %41 : vector<16x1xf32> to vector<16x128xf32>
    %43 = arith.mulf %39, %42 : vector<16x128xf32>
    %c0_29 = arith.constant 0 : index
    %c0_30 = arith.constant 0 : index
    %c0_31 = arith.constant 0 : index
    %44 = vector.load %arg9[%c0_29, %c0_30, %c0_31] : memref<3x16x1xf32, #tpu.memory_space<vmem>>, vector<1x16x1xf32>
    %45 = vector.shape_cast %44 : vector<1x16x1xf32> to vector<16x1xf32>
    %46 = vector.broadcast %45 : vector<16x1xf32> to vector<16x128xf32>
    %47 = arith.addf %43, %46 : vector<16x128xf32>
    %cst_32 = arith.constant 0.000000e+00 : f32
    %48 = vector.shape_cast %4 : vector<1x128xi1> to vector<1x128xi1>
    %49 = vector.broadcast %48 : vector<1x128xi1> to vector<16x128xi1>
    %50 = vector.broadcast %cst_32 : f32 to vector<16x128xf32>
    %51 = arith.select %49, %47, %50 : vector<16x128xi1>, vector<16x128xf32>
    %c0_33 = arith.constant 0 : index
    %c0_34 = arith.constant 0 : index
    %52 = vector.load %arg19[%c0_33, %c0_34] : memref<64x128xf32, #tpu.memory_space<vmem>>, vector<16x128xf32>
    tpu.vector_store %arg19[%c0_33, %c0_34], %51 {strides = array<i32>} : memref<64x128xf32, #tpu.memory_space<vmem>>, vector<16x128xf32>,
    %53 = vector.extract_strided_slice %23 {offsets = [16, 0], sizes = [16, 128], strides = [1, 1]} : vector<64x128xf32> to vector<16x128xf32>
    %54 = arith.addf %51, %53 : vector<16x128xf32>
    %c2_i32_35 = arith.constant 2 : i32
    %55 = tpu.dynamic_rotate %54 by %c2_i32_35 dim 1 : vector<16x128xf32>, i32 -> vector<16x128xf32>
    %c0_36 = arith.constant 0 : index
    %c0_37 = arith.constant 0 : index
    %56 = vector.load %arg20[%c0_36, %c0_37] : memref<48x128xf32, #tpu.memory_space<vmem>>, vector<16x128xf32>
    tpu.vector_store %arg20[%c0_36, %c0_37], %55 {strides = array<i32>} : memref<48x128xf32, #tpu.memory_space<vmem>>, vector<16x128xf32>,
    %c16_38 = arith.constant 16 : index
    %c0_39 = arith.constant 0 : index
    %57 = vector.load %arg20[%c16_38, %c0_39] : memref<48x128xf32, #tpu.memory_space<vmem>>, vector<16x128xf32>
    tpu.vector_store %arg20[%c16_38, %c0_39], %54 {strides = array<i32>} : memref<48x128xf32, #tpu.memory_space<vmem>>, vector<16x128xf32>,
    %c126_i32_40 = arith.constant 126 : i32
    %58 = tpu.dynamic_rotate %54 by %c126_i32_40 dim 1 : vector<16x128xf32>, i32 -> vector<16x128xf32>
    %c32_41 = arith.constant 32 : index
    %c0_42 = arith.constant 0 : index
    %59 = vector.load %arg20[%c32_41, %c0_42] : memref<48x128xf32, #tpu.memory_space<vmem>>, vector<16x128xf32>
    tpu.vector_store %arg20[%c32_41, %c0_42], %58 {strides = array<i32>} : memref<48x128xf32, #tpu.memory_space<vmem>>, vector<16x128xf32>,
    %c1 = arith.constant 1 : index
    %c0_43 = arith.constant 0 : index
    %c0_44 = arith.constant 0 : index
    %60 = vector.load %arg6[%c1, %c0_43, %c0_44] : memref<3x16x48xf32, #tpu.memory_space<vmem>>, vector<1x16x48xf32>
    %61 = vector.shape_cast %60 : vector<1x16x48xf32> to vector<16x48xf32>
    %c0_45 = arith.constant 0 : index
    %c0_46 = arith.constant 0 : index
    %62 = vector.load %arg20[%c0_45, %c0_46] : memref<48x128xf32, #tpu.memory_space<vmem>>, vector<48x128xf32>
    %cst_47 = arith.constant dense<0.000000e+00> : vector<16x128xf32>
    %63 = tpu.matmul %61, %62, %cst_47 {dimension_numbers = #tpu.dot_dimension_numbers<[1], [0], [0], [1], [0, 0, 1, 1], [], []>} : vector<16x48xf32>, vector<48x128xf32>, vector<16x128xf32> -> vector<16x128xf32>
    %c1_48 = arith.constant 1 : index
    %c0_49 = arith.constant 0 : index
    %c0_50 = arith.constant 0 : index
    %64 = vector.load %arg7[%c1_48, %c0_49, %c0_50] : memref<3x16x1xf32, #tpu.memory_space<vmem>>, vector<1x16x1xf32>
    %65 = vector.shape_cast %64 : vector<1x16x1xf32> to vector<16x1xf32>
    %66 = vector.broadcast %65 : vector<16x1xf32> to vector<16x128xf32>
    %67 = arith.addf %63, %66 : vector<16x128xf32>
    %cst_51 = arith.constant 0.000000e+00 : f32
    %68 = vector.broadcast %cst_51 : f32 to vector<16x128xf32>
    %69 = arith.maximumf %67, %68 : vector<16x128xf32>
    %c1_52 = arith.constant 1 : index
    %c0_53 = arith.constant 0 : index
    %c0_54 = arith.constant 0 : index
    %70 = vector.load %arg8[%c1_52, %c0_53, %c0_54] : memref<3x16x1xf32, #tpu.memory_space<vmem>>, vector<1x16x1xf32>
    %71 = vector.shape_cast %70 : vector<1x16x1xf32> to vector<16x1xf32>
    %72 = vector.broadcast %71 : vector<16x1xf32> to vector<16x128xf32>
    %73 = arith.mulf %69, %72 : vector<16x128xf32>
    %c1_55 = arith.constant 1 : index
    %c0_56 = arith.constant 0 : index
    %c0_57 = arith.constant 0 : index
    %74 = vector.load %arg9[%c1_55, %c0_56, %c0_57] : memref<3x16x1xf32, #tpu.memory_space<vmem>>, vector<1x16x1xf32>
    %75 = vector.shape_cast %74 : vector<1x16x1xf32> to vector<16x1xf32>
    %76 = vector.broadcast %75 : vector<16x1xf32> to vector<16x128xf32>
    %77 = arith.addf %73, %76 : vector<16x128xf32>
    %cst_58 = arith.constant 0.000000e+00 : f32
    %78 = vector.shape_cast %4 : vector<1x128xi1> to vector<1x128xi1>
    %79 = vector.broadcast %78 : vector<1x128xi1> to vector<16x128xi1>
    %80 = vector.broadcast %cst_58 : f32 to vector<16x128xf32>
    %81 = arith.select %79, %77, %80 : vector<16x128xi1>, vector<16x128xf32>
    %c16_59 = arith.constant 16 : index
    %c0_60 = arith.constant 0 : index
    %82 = vector.load %arg19[%c16_59, %c0_60] : memref<64x128xf32, #tpu.memory_space<vmem>>, vector<16x128xf32>
    tpu.vector_store %arg19[%c16_59, %c0_60], %81 {strides = array<i32>} : memref<64x128xf32, #tpu.memory_space<vmem>>, vector<16x128xf32>,
    %83 = vector.extract_strided_slice %23 {offsets = [32, 0], sizes = [16, 128], strides = [1, 1]} : vector<64x128xf32> to vector<16x128xf32>
    %84 = arith.addf %81, %83 : vector<16x128xf32>
    %c2_i32_61 = arith.constant 2 : i32
    %85 = tpu.dynamic_rotate %84 by %c2_i32_61 dim 1 : vector<16x128xf32>, i32 -> vector<16x128xf32>
    %c0_62 = arith.constant 0 : index
    %c0_63 = arith.constant 0 : index
    %86 = vector.load %arg20[%c0_62, %c0_63] : memref<48x128xf32, #tpu.memory_space<vmem>>, vector<16x128xf32>
    tpu.vector_store %arg20[%c0_62, %c0_63], %85 {strides = array<i32>} : memref<48x128xf32, #tpu.memory_space<vmem>>, vector<16x128xf32>,
    %c16_64 = arith.constant 16 : index
    %c0_65 = arith.constant 0 : index
    %87 = vector.load %arg20[%c16_64, %c0_65] : memref<48x128xf32, #tpu.memory_space<vmem>>, vector<16x128xf32>
    tpu.vector_store %arg20[%c16_64, %c0_65], %84 {strides = array<i32>} : memref<48x128xf32, #tpu.memory_space<vmem>>, vector<16x128xf32>,
    %c126_i32_66 = arith.constant 126 : i32
    %88 = tpu.dynamic_rotate %84 by %c126_i32_66 dim 1 : vector<16x128xf32>, i32 -> vector<16x128xf32>
    %c32_67 = arith.constant 32 : index
    %c0_68 = arith.constant 0 : index
    %89 = vector.load %arg20[%c32_67, %c0_68] : memref<48x128xf32, #tpu.memory_space<vmem>>, vector<16x128xf32>
    tpu.vector_store %arg20[%c32_67, %c0_68], %88 {strides = array<i32>} : memref<48x128xf32, #tpu.memory_space<vmem>>, vector<16x128xf32>,
    %c2 = arith.constant 2 : index
    %c0_69 = arith.constant 0 : index
    %c0_70 = arith.constant 0 : index
    %90 = vector.load %arg6[%c2, %c0_69, %c0_70] : memref<3x16x48xf32, #tpu.memory_space<vmem>>, vector<1x16x48xf32>
    %91 = vector.shape_cast %90 : vector<1x16x48xf32> to vector<16x48xf32>
    %c0_71 = arith.constant 0 : index
    %c0_72 = arith.constant 0 : index
    %92 = vector.load %arg20[%c0_71, %c0_72] : memref<48x128xf32, #tpu.memory_space<vmem>>, vector<48x128xf32>
    %cst_73 = arith.constant dense<0.000000e+00> : vector<16x128xf32>
    %93 = tpu.matmul %91, %92, %cst_73 {dimension_numbers = #tpu.dot_dimension_numbers<[1], [0], [0], [1], [0, 0, 1, 1], [], []>} : vector<16x48xf32>, vector<48x128xf32>, vector<16x128xf32> -> vector<16x128xf32>
    %c2_74 = arith.constant 2 : index
    %c0_75 = arith.constant 0 : index
    %c0_76 = arith.constant 0 : index
    %94 = vector.load %arg7[%c2_74, %c0_75, %c0_76] : memref<3x16x1xf32, #tpu.memory_space<vmem>>, vector<1x16x1xf32>
    %95 = vector.shape_cast %94 : vector<1x16x1xf32> to vector<16x1xf32>
    %96 = vector.broadcast %95 : vector<16x1xf32> to vector<16x128xf32>
    %97 = arith.addf %93, %96 : vector<16x128xf32>
    %cst_77 = arith.constant 0.000000e+00 : f32
    %98 = vector.broadcast %cst_77 : f32 to vector<16x128xf32>
    %99 = arith.maximumf %97, %98 : vector<16x128xf32>
    %c2_78 = arith.constant 2 : index
    %c0_79 = arith.constant 0 : index
    %c0_80 = arith.constant 0 : index
    %100 = vector.load %arg8[%c2_78, %c0_79, %c0_80] : memref<3x16x1xf32, #tpu.memory_space<vmem>>, vector<1x16x1xf32>
    %101 = vector.shape_cast %100 : vector<1x16x1xf32> to vector<16x1xf32>
    %102 = vector.broadcast %101 : vector<16x1xf32> to vector<16x128xf32>
    %103 = arith.mulf %99, %102 : vector<16x128xf32>
    %c2_81 = arith.constant 2 : index
    %c0_82 = arith.constant 0 : index
    %c0_83 = arith.constant 0 : index
    %104 = vector.load %arg9[%c2_81, %c0_82, %c0_83] : memref<3x16x1xf32, #tpu.memory_space<vmem>>, vector<1x16x1xf32>
    %105 = vector.shape_cast %104 : vector<1x16x1xf32> to vector<16x1xf32>
    %106 = vector.broadcast %105 : vector<16x1xf32> to vector<16x128xf32>
    %107 = arith.addf %103, %106 : vector<16x128xf32>
    %cst_84 = arith.constant 0.000000e+00 : f32
    %108 = vector.shape_cast %4 : vector<1x128xi1> to vector<1x128xi1>
    %109 = vector.broadcast %108 : vector<1x128xi1> to vector<16x128xi1>
    %110 = vector.broadcast %cst_84 : f32 to vector<16x128xf32>
    %111 = arith.select %109, %107, %110 : vector<16x128xi1>, vector<16x128xf32>
    %c32_85 = arith.constant 32 : index
    %c0_86 = arith.constant 0 : index
    %112 = vector.load %arg19[%c32_85, %c0_86] : memref<64x128xf32, #tpu.memory_space<vmem>>, vector<16x128xf32>
    tpu.vector_store %arg19[%c32_85, %c0_86], %111 {strides = array<i32>} : memref<64x128xf32, #tpu.memory_space<vmem>>, vector<16x128xf32>,
    %113 = vector.extract_strided_slice %23 {offsets = [48, 0], sizes = [16, 128], strides = [1, 1]} : vector<64x128xf32> to vector<16x128xf32>
    %c48 = arith.constant 48 : index
    %c0_87 = arith.constant 0 : index
    %114 = vector.load %arg19[%c48, %c0_87] : memref<64x128xf32, #tpu.memory_space<vmem>>, vector<16x128xf32>
    tpu.vector_store %arg19[%c48, %c0_87], %113 {strides = array<i32>} : memref<64x128xf32, #tpu.memory_space<vmem>>, vector<16x128xf32>,
    %c0_88 = arith.constant 0 : index
    %c0_89 = arith.constant 0 : index
    %115 = vector.load %arg10[%c0_88, %c0_89] : memref<64x64xf32, #tpu.memory_space<vmem>>, vector<64x64xf32>
    %c0_90 = arith.constant 0 : index
    %c0_91 = arith.constant 0 : index
    %116 = vector.load %arg19[%c0_90, %c0_91] : memref<64x128xf32, #tpu.memory_space<vmem>>, vector<64x128xf32>
    %cst_92 = arith.constant dense<0.000000e+00> : vector<64x128xf32>
    %117 = tpu.matmul %115, %116, %cst_92 {dimension_numbers = #tpu.dot_dimension_numbers<[1], [0], [0], [1], [0, 0, 1, 1], [], []>} : vector<64x64xf32>, vector<64x128xf32>, vector<64x128xf32> -> vector<64x128xf32>
    %c0_93 = arith.constant 0 : index
    %c0_94 = arith.constant 0 : index
    %118 = vector.load %arg11[%c0_93, %c0_94] : memref<64x1xf32, #tpu.memory_space<vmem>>, vector<64x1xf32>
    %119 = vector.broadcast %118 : vector<64x1xf32> to vector<64x128xf32>
    %120 = arith.addf %117, %119 : vector<64x128xf32>
    %cst_95 = arith.constant 0.000000e+00 : f32
    %121 = vector.broadcast %cst_95 : f32 to vector<64x128xf32>
    %122 = arith.maximumf %120, %121 : vector<64x128xf32>
    %c0_96 = arith.constant 0 : index
    %c0_97 = arith.constant 0 : index
    %123 = vector.load %arg12[%c0_96, %c0_97] : memref<64x1xf32, #tpu.memory_space<vmem>>, vector<64x1xf32>
    %124 = vector.broadcast %123 : vector<64x1xf32> to vector<64x128xf32>
    %125 = arith.mulf %122, %124 : vector<64x128xf32>
    %c0_98 = arith.constant 0 : index
    %c0_99 = arith.constant 0 : index
    %126 = vector.load %arg13[%c0_98, %c0_99] : memref<64x1xf32, #tpu.memory_space<vmem>>, vector<64x1xf32>
    %127 = vector.broadcast %126 : vector<64x1xf32> to vector<64x128xf32>
    %128 = arith.addf %125, %127 : vector<64x128xf32>
    %c0_100 = arith.constant 0 : index
    %c0_101 = arith.constant 0 : index
    %129 = vector.load %arg11[%c0_100, %c0_101] : memref<64x1xf32, #tpu.memory_space<vmem>>, vector<64x1xf32>
    %cst_102 = arith.constant 0.000000e+00 : f32
    %130 = vector.broadcast %cst_102 : f32 to vector<64x1xf32>
    %131 = arith.maximumf %129, %130 : vector<64x1xf32>
    %c0_103 = arith.constant 0 : index
    %c0_104 = arith.constant 0 : index
    %132 = vector.load %arg12[%c0_103, %c0_104] : memref<64x1xf32, #tpu.memory_space<vmem>>, vector<64x1xf32>
    %133 = arith.mulf %131, %132 : vector<64x1xf32>
    %c0_105 = arith.constant 0 : index
    %c0_106 = arith.constant 0 : index
    %134 = vector.load %arg13[%c0_105, %c0_106] : memref<64x1xf32, #tpu.memory_space<vmem>>, vector<64x1xf32>
    %135 = arith.addf %133, %134 : vector<64x1xf32>
    %cst_107 = arith.constant dense<0.000000e+00> : vector<64xf32>
    %136 = vector.multi_reduction <add>, %128, %cst_107 [1] : vector<64x128xf32> to vector<64xf32>
    %137 = vector.shape_cast %136 : vector<64xf32> to vector<64x1xf32>
    %cst_108 = arith.constant 8.800000e+01 : f32
    %138 = vector.broadcast %cst_108 : f32 to vector<64x1xf32>
    %139 = arith.mulf %138, %135 : vector<64x1xf32>
    %140 = arith.subf %137, %139 : vector<64x1xf32>
    %cst_109 = arith.constant 2.500000e-02 : f32
    %141 = vector.broadcast %cst_109 : f32 to vector<64x1xf32>
    %142 = arith.mulf %140, %141 : vector<64x1xf32>
    %c0_110 = arith.constant 0 : index
    %c0_111 = arith.constant 0 : index
    %143 = vector.load %arg14[%c0_110, %c0_111] : memref<32x64xf32, #tpu.memory_space<vmem>>, vector<32x64xf32>
    %cst_112 = arith.constant dense<0.000000e+00> : vector<32x1xf32>
    %144 = tpu.matmul %143, %142, %cst_112 {dimension_numbers = #tpu.dot_dimension_numbers<[1], [0], [0], [1], [0, 0, 1, 1], [], []>} : vector<32x64xf32>, vector<64x1xf32>, vector<32x1xf32> -> vector<32x1xf32>
    %c0_113 = arith.constant 0 : index
    %c0_114 = arith.constant 0 : index
    %145 = vector.load %arg15[%c0_113, %c0_114] : memref<32x1xf32, #tpu.memory_space<vmem>>, vector<32x1xf32>
    %146 = arith.addf %144, %145 : vector<32x1xf32>
    %cst_115 = arith.constant 0.000000e+00 : f32
    %147 = vector.broadcast %cst_115 : f32 to vector<32x1xf32>
    %148 = arith.maximumf %146, %147 : vector<32x1xf32>
    %c0_116 = arith.constant 0 : index
    %c0_117 = arith.constant 0 : index
    %149 = vector.load %arg16[%c0_116, %c0_117] : memref<64x32xf32, #tpu.memory_space<vmem>>, vector<64x32xf32>
    %cst_118 = arith.constant dense<0.000000e+00> : vector<64x1xf32>
    %150 = tpu.matmul %149, %148, %cst_118 {dimension_numbers = #tpu.dot_dimension_numbers<[1], [0], [0], [1], [0, 0, 1, 1], [], []>} : vector<64x32xf32>, vector<32x1xf32>, vector<64x1xf32> -> vector<64x1xf32>
    %c0_119 = arith.constant 0 : index
    %c0_120 = arith.constant 0 : index
    %151 = vector.load %arg17[%c0_119, %c0_120] : memref<64x1xf32, #tpu.memory_space<vmem>>, vector<64x1xf32>
    %152 = arith.addf %150, %151 : vector<64x1xf32>
    %153 = arith.negf %152 : vector<64x1xf32>
    %154 = math.exp %153 : vector<64x1xf32>
    %cst_121 = arith.constant 1.000000e+00 : f32
    %155 = vector.broadcast %cst_121 : f32 to vector<64x1xf32>
    %156 = arith.addf %155, %154 : vector<64x1xf32>
    %157 = arith.divf %155, %156 : vector<64x1xf32>
    %158 = vector.broadcast %157 : vector<64x1xf32> to vector<64x128xf32>
    %159 = arith.mulf %128, %158 : vector<64x128xf32>
    %160 = arith.addf %159, %10 : vector<64x128xf32>
    %c0_122 = arith.constant 0 : index
    %c0_123 = arith.constant 0 : index
    %c0_124 = arith.constant 0 : index
    %161 = vector.load %arg18[%c0_122, %c0_123, %c0_124] : memref<1x64x128xf32, #tpu.memory_space<vmem>>, vector<1x64x128xf32>
    %162 = vector.shape_cast %161 : vector<1x64x128xf32> to vector<64x128xf32>
    %163 = vector.shape_cast %160 : vector<64x128xf32> to vector<1x64x128xf32>
    tpu.vector_store %arg18[%c0_122, %c0_123, %c0_124], %163 {strides = array<i32>} : memref<1x64x128xf32, #tpu.memory_space<vmem>>, vector<1x64x128xf32>,
    return
  }
  func.func @transform_0(%arg0: i32) -> (i32, i32, i32) {
    %c0_i32 = arith.constant 0 : i32
    %c0_i32_0 = arith.constant 0 : i32
    %c0_i32_1 = arith.constant 0 : i32
    return %arg0, %c0_i32, %c0_i32_0 : i32, i32, i32
  }
  func.func @transform_1(%arg0: i32) -> (i32, i32) {
    %c0_i32 = arith.constant 0 : i32
    %c0_i32_0 = arith.constant 0 : i32
    %c0_i32_1 = arith.constant 0 : i32
    return %c0_i32, %c0_i32_0 : i32, i32
  }
  func.func @transform_2(%arg0: i32) -> (i32, i32) {
    %c0_i32 = arith.constant 0 : i32
    %c0_i32_0 = arith.constant 0 : i32
    %c0_i32_1 = arith.constant 0 : i32
    return %c0_i32, %c0_i32_0 : i32, i32
  }
  func.func @transform_3(%arg0: i32) -> (i32, i32) {
    %c0_i32 = arith.constant 0 : i32
    %c0_i32_0 = arith.constant 0 : i32
    %c0_i32_1 = arith.constant 0 : i32
    return %c0_i32, %c0_i32_0 : i32, i32
  }
  func.func @transform_4(%arg0: i32) -> (i32, i32) {
    %c0_i32 = arith.constant 0 : i32
    %c0_i32_0 = arith.constant 0 : i32
    %c0_i32_1 = arith.constant 0 : i32
    return %c0_i32, %c0_i32_0 : i32, i32
  }
  func.func @transform_5(%arg0: i32) -> (i32, i32, i32) {
    %c0_i32 = arith.constant 0 : i32
    %c0_i32_0 = arith.constant 0 : i32
    %c0_i32_1 = arith.constant 0 : i32
    %c0_i32_2 = arith.constant 0 : i32
    return %c0_i32, %c0_i32_0, %c0_i32_1 : i32, i32, i32
  }
  func.func @transform_6(%arg0: i32) -> (i32, i32, i32) {
    %c0_i32 = arith.constant 0 : i32
    %c0_i32_0 = arith.constant 0 : i32
    %c0_i32_1 = arith.constant 0 : i32
    %c0_i32_2 = arith.constant 0 : i32
    return %c0_i32, %c0_i32_0, %c0_i32_1 : i32, i32, i32
  }
  func.func @transform_7(%arg0: i32) -> (i32, i32, i32) {
    %c0_i32 = arith.constant 0 : i32
    %c0_i32_0 = arith.constant 0 : i32
    %c0_i32_1 = arith.constant 0 : i32
    %c0_i32_2 = arith.constant 0 : i32
    return %c0_i32, %c0_i32_0, %c0_i32_1 : i32, i32, i32
  }
  func.func @transform_8(%arg0: i32) -> (i32, i32, i32) {
    %c0_i32 = arith.constant 0 : i32
    %c0_i32_0 = arith.constant 0 : i32
    %c0_i32_1 = arith.constant 0 : i32
    %c0_i32_2 = arith.constant 0 : i32
    return %c0_i32, %c0_i32_0, %c0_i32_1 : i32, i32, i32
  }
  func.func @transform_9(%arg0: i32) -> (i32, i32) {
    %c0_i32 = arith.constant 0 : i32
    %c0_i32_0 = arith.constant 0 : i32
    %c0_i32_1 = arith.constant 0 : i32
    return %c0_i32, %c0_i32_0 : i32, i32
  }
  func.func @transform_10(%arg0: i32) -> (i32, i32) {
    %c0_i32 = arith.constant 0 : i32
    %c0_i32_0 = arith.constant 0 : i32
    %c0_i32_1 = arith.constant 0 : i32
    return %c0_i32, %c0_i32_0 : i32, i32
  }
  func.func @transform_11(%arg0: i32) -> (i32, i32) {
    %c0_i32 = arith.constant 0 : i32
    %c0_i32_0 = arith.constant 0 : i32
    %c0_i32_1 = arith.constant 0 : i32
    return %c0_i32, %c0_i32_0 : i32, i32
  }
  func.func @transform_12(%arg0: i32) -> (i32, i32) {
    %c0_i32 = arith.constant 0 : i32
    %c0_i32_0 = arith.constant 0 : i32
    %c0_i32_1 = arith.constant 0 : i32
    return %c0_i32, %c0_i32_0 : i32, i32
  }
  func.func @transform_13(%arg0: i32) -> (i32, i32) {
    %c0_i32 = arith.constant 0 : i32
    %c0_i32_0 = arith.constant 0 : i32
    %c0_i32_1 = arith.constant 0 : i32
    return %c0_i32, %c0_i32_0 : i32, i32
  }
  func.func @transform_14(%arg0: i32) -> (i32, i32) {
    %c0_i32 = arith.constant 0 : i32
    %c0_i32_0 = arith.constant 0 : i32
    %c0_i32_1 = arith.constant 0 : i32
    return %c0_i32, %c0_i32_0 : i32, i32
  }
  func.func @transform_15(%arg0: i32) -> (i32, i32) {
    %c0_i32 = arith.constant 0 : i32
    %c0_i32_0 = arith.constant 0 : i32
    %c0_i32_1 = arith.constant 0 : i32
    return %c0_i32, %c0_i32_0 : i32, i32
  }
  func.func @transform_16(%arg0: i32) -> (i32, i32) {
    %c0_i32 = arith.constant 0 : i32
    %c0_i32_0 = arith.constant 0 : i32
    %c0_i32_1 = arith.constant 0 : i32
    return %c0_i32, %c0_i32_0 : i32, i32
  }
  func.func @transform_17(%arg0: i32) -> (i32, i32, i32) {
    %c0_i32 = arith.constant 0 : i32
    %c0_i32_0 = arith.constant 0 : i32
    %c0_i32_1 = arith.constant 0 : i32
    return %arg0, %c0_i32, %c0_i32_0 : i32, i32, i32
  }
}

</mosaic_0001>

<bundles_post_ra>
// kernel: tpu_custom_call.1
= control target key start
LH: loop header
LB: loop body
LE: loop exit
PB: predicated region body
PF: predicated region fallthrough
CT: control target
= control target key end

     0   :  { %s3022_s0 = inlined_call_operand.vmem [shape: f32[2,16,128], index: 0, kind: input, shape index: {}]   ;;  %s3023_s1 = inlined_call_operand.vmem [shape: f32[128,16], index: 1, kind: input, shape index: {}]   ;;  %s3024_s2 = inlined_call_operand.vmem [shape: f32[128,1], index: 2, kind: input, shape index: {}]   ;;  %s3025_s3 = inlined_call_operand.vmem [shape: f32[64,1], index: 3, kind: input, shape index: {}]   ;;  %s3026_s4 = inlined_call_operand.vmem [shape: f32[64,1], index: 4, kind: input, shape index: {}]   ;;  %s3027_s5 = inlined_call_operand.vmem [shape: f32[3,16,48], index: 5, kind: input, shape index: {}]   ;;  %s3028_s6 = inlined_call_operand.vmem [shape: f32[3,16,1], index: 6, kind: input, shape index: {}]   ;;  %s3029_s7 = inlined_call_operand.vmem [shape: f32[3,16,1], index: 7, kind: input, shape index: {}]   ;;  %s3030_s8 = inlined_call_operand.vmem [shape: f32[3,16,1], index: 8, kind: input, shape index: {}]   ;;  %s3031_s9 = inlined_call_operand.vmem [shape: f32[64,64], index: 9, kind: input, shape index: {}]   ;;  %s3032_s10 = inlined_call_operand.vmem [shape: f32[64,1], index: 10, kind: input, shape index: {}]   ;;  %s3033_s11 = inlined_call_operand.vmem [shape: f32[64,1], index: 11, kind: input, shape index: {}]   ;;  %s3034_s12 = inlined_call_operand.vmem [shape: f32[64,1], index: 12, kind: input, shape index: {}]   ;;  %s3035_s13 = inlined_call_operand.vmem [shape: f32[32,64], index: 13, kind: input, shape index: {}]   ;;  %s3036_s14 = inlined_call_operand.vmem [shape: f32[32,1], index: 14, kind: input, shape index: {}]   ;;  %s3037_s15 = inlined_call_operand.vmem [shape: f32[64,32], index: 15, kind: input, shape index: {}]   ;;  %s3038_s16 = inlined_call_operand.vmem [shape: f32[64,1], index: 16, kind: input, shape index: {}]   ;;  %s3039_s17 = inlined_call_operand.hbm [shape: f32[2,64,128], index: 17, kind: output, shape index: {}]  }
   0x1   :  { %3052 = sst [smem:[#allocation13_spill]] %s3022_s0 }
   0x2   :  { %3053 = sst [smem:[#allocation14_spill]] %s3023_s1 }
   0x3   :  { %3054 = sst [smem:[#allocation15_spill]] %s3024_s2 }
   0x4   :  { %3055 = sst [smem:[#allocation16_spill]] %s3025_s3 }
   0x5   :  { %22 = vsyncpa [#allocation5], 0 }
   0x6   :  { %24 = vsyncpa [#allocation5 + $0x1], 0  ;;  %s2317_s24 = smov 0   ;;  %s2319_s25 = smov 0  }
   0x7   :  { %s2321_s26 = smov 0   ;;  %s2323_s27 = smov 0  }
   0x8 LB: > { %3056 = sst [smem:[#allocation7_spill]] %s2208_s24  ;;  %s2338_s28 = sadd.s32 4294967295, %s2220_s27   ;;  %s2220_s27 = sphi %s2323_s27, %s3073_s27   ;;  %s2216_s26 = sphi %s2321_s26, %s3078_s26   ;;  %s2212_s25 = sphi %s2319_s25, %s3077_s25   ;;  %s2208_s24 = sphi %s2317_s24, %s3076_s24  }
   0x9   : > { %3057 = sst [smem:[#allocation8_spill]] %s2216_s26  ;;  %s1957_s29 = sadd.s32 4294967294, %s2220_s27  }
   0xa   : > { %3058 = sst [smem:[#allocation9_spill]] %s2220_s27  ;;  %s2342_s0 = sadd.s32 1, %s2220_s27  }
   0xb   : > { %3059 = sst [smem:[#allocation10_spill]] %s2342_s0  ;;  %s399_s30 = sadd.s32 1, %s2216_s26 }
   0xc   : > { %s396_s18 = ssub.s32 %s2220_s27, %s2342_s0  ;;  %p409_p0 = scmp.ne.s32.totalorder %s2216_s26, %s2212_s25 }
   0xd   : > { %p397_p1 = scmp.eq.s32.totalorder %s396_s18, 0  ;;  %p410_p2 = scmp.eq.s32.totalorder %s2338_s28, 1 }
   0xe   : > { %p415_p3 = scmp.ne.s32.totalorder %s2212_s25, %s2208_s24  ;;  %p416_p4 = scmp.eq.s32.totalorder %s1957_s29, 1 }
   0xf   : > { %s2353_s19 = scalar_select %p397_p1, %s2216_s26, %s399_s30  }
  0x10   : > { %p2355_p5 = por %p410_p2, %p409_p0  ;;  %p2359_p6 = por %p416_p4, %p415_p3 }
  0x11   : > { %3060 = sst [smem:[#allocation11_spill]] %s2353_s19  ;;  %p1960_p7 = scmp.ge.s32.totalorder %s2220_s27, 1 }
  0x12   : > { %s3062_s20 = scalar_select %p2359_p6, 1, 0 }
  0x13   : > { %p490_p8 = scmp.lt.s32.totalorder %s2220_s27, 3 }
  0x14   : > { %3063 = sst [smem:[#allocation12_spill]] %s3062_s20 }
  0x15   : > { %p491_p9 = pnand %p1960_p7, %p490_p8 }
  0x16   : > { %p542_p10 = scmp.lt.s32.totalorder (!%p491_p9), %s2338_s28, 1  ;;  %s3064_s30 = sld [smem:[#allocation13_spill]] (!%p491_p9) }
  0x17   : > { %494 = sbr.rel (%p491_p9) target bundleno = 1915 (0x77b), region = 88  ;;  %s3065_s0 = sld [smem:[#allocation14_spill]] (!%p491_p9) }
  0x18   : > { %s3066_s2 = sld [smem:[#allocation15_spill]] (!%p491_p9)  ;;  %s3048_s24 = smov (!%p491_p9), 2  }
  0x19   : > { %s3067_s3 = sld [smem:[#allocation16_spill]] (!%p491_p9)  ;;  %s3046_s20 = smov (!%p491_p9), 126  }
  0x1a   : > { %s2036_s29 = sshll.u32 (!%p491_p9), %s2338_s28, 6 }
  0x1c   : > { %s543_s21 = scalar_select %p542_p10, %s2338_s28, 1  ;;  %vm664_vm0 = vcmask 130048   ;;  %v2222_v6 = vmov 0   ;;  %v843_v9 = vld [vmem:[%s3026_s4 + $0x8] sm:$0xff]  ;;  %v842_v13 = vld [vmem:[%s3026_s4] sm:$0xff]  ;;  %v549_v43 = vlaneseq  ;;  %v845_v61 = vld [vmem:[%s3026_s4 + $0x18] sm:$0xff] }
  0x1d   : > { %v552_v2 = vld [vmem:[%s3065_s0] sm:$0xff]  ;;  %v553_v3 = vld [vmem:[%s3065_s0 + $0x8] sm:$0xff]  ;;  %v554_v4 = vld [vmem:[%s3065_s0 + $0x10] sm:$0xff]  ;;  %2095 = vset.pattern.permute.xlu2 %v2222_v6  ;;  %2093 = vset.pattern.permute.xlu0 %v2222_v6  ;;  %vm942_vm2 = vcmask 392192   ;;  %vm1278_vm3 = vcmask 523264   ;;  %vm1597_vm4 = vcmask 261120  }
  0x1e   : > { %s2035_s22 = sshll.u32 %s543_s21, 4  ;;  %v555_v5 = vld [vmem:[%s3065_s0 + $0x18] sm:$0xff]  ;;  %2094 = vset.pattern.permute.xlu1 %v2222_v6  ;;  %v556_v7 = vld [vmem:[%s3065_s0 + $0x20] sm:$0xff]  ;;  %v577_v10 = vld [vmem:[%s3066_s2 + $0x48] sm:$0xff]  ;;  %857 = vperm.xlu2 %2095, %v843_v9   ;;  %v2472_v47 = vand.u32 127, %v549_v43  ;;  %s1891_s21 = scalar_lea.hbm %s3039_s17, %s2036_s29 }
  0x1f   : > { %s546_s18 = scalar_lea.vmem %s3064_s30, %s2035_s22  ;;  %v563_v8 = vld [vmem:[%s3065_s0 + $0x58] sm:$0xff]  ;;  %v787_v11 = vld [vmem:[%s3067_s3 + $0x8] sm:$0xff]  ;;  %631 = vperm.xlu0 %2093, %v577_v10   ;;  %v576_v14 = vld [vmem:[%s3066_s2 + $0x40] sm:$0xff]  ;;  %s3068_s30 = smov 2  }
  0x20   : > { %v548_v0 = vld [vmem:[%s546_s18 + $0x8] sm:$0xff]  ;;  %v547_v1 = vld [vmem:[%s546_s18] sm:$0xff]  ;;  %801 = vperm.xlu1 %2094, %v787_v11   ;;  %v558_v16 = vld [vmem:[%s3065_s0 + $0x30] sm:$0xff]  ;;  %vm551_vm1 = vcmp.lt.s32.totalorder %v2472_v47, 40  ;;  %s3069_s18 = smov 126   ;;  %s2178_s29 = scalar_lea.hbm %s3039_s17, 128 }
  0x21   : > { %727 = vmatpush.msra.mxu0 %v548_v0  ;;  %2047 = vmatpush.msra.mxu2 %v548_v0  ;;  %v557_v12 = vld [vmem:[%s3065_s0 + $0x28] sm:$0xff]  ;;  %v786_v15 = vld [vmem:[%s3067_s3] sm:$0xff]  ;;  %v579_v17 = vld [vmem:[%s3066_s2 + $0x58] sm:$0xff] }
  0x22   : > { %v559_v18 = vld [vmem:[%s3065_s0 + $0x38] sm:$0xff]  ;;  %v930_v19 = vld [vmem:[%s3028_s6] sm:$0xff]  ;;  %v788_v21 = vld [vmem:[%s3067_s3 + $0x10] sm:$0xff] }
  0x23   : > { %728 = vmatpush.msra.mxu0 %v547_v1  ;;  %2048 = vmatpush.msra.mxu2 %v547_v1  ;;  %v560_v20 = vld [vmem:[%s3065_s0 + $0x40] sm:$0xff]  ;;  %v561_v22 = vld [vmem:[%s3065_s0 + $0x48] sm:$0xff]  ;;  %v562_v30 = vld [vmem:[%s3065_s0 + $0x50] sm:$0xff] }
  0x24   : > { %1964 = vmatmul.msk.f32.vlgmr.msra.gmra.mxu0 %vm664_vm0, %v552_v2  ;;  %1975 = vmatmul.msk.f32.vlgmr.msra.gmra.mxu2 %vm664_vm0, %v563_v8  ;;  %v989_v23 = vld [vmem:[%s3030_s8 + $0x8] sm:$0xff]  ;;  %v564_v35 = vld [vmem:[%s3065_s0 + $0x60] sm:$0xff]  ;;  %v578_v56 = vld [vmem:[%s3066_s2 + $0x50] sm:$0xff] }
  0x25   : > { %v565_v40 = vld [vmem:[%s3065_s0 + $0x68] sm:$0xff]  ;;  %v789_v59 = vld [vmem:[%s3067_s3 + $0x18] sm:$0xff]  ;;  %v974_v60 = vld [vmem:[%s3029_s7] sm:$0xff] }
  0x26   : > { %852 = vperm.xlu2 %2095, %v842_v13   ;;  %v931_v57 = vld [vmem:[%s3028_s6 + $0x8] sm:$0xff]  ;;  %v988_v62 = vld [vmem:[%s3030_s8] sm:$0xff]  ;;  %v844_v63 = vld [vmem:[%s3026_s4 + $0x10] sm:$0xff] }
  0x27   : > { %626 = vperm.xlu0 %2093, %v576_v14   ;;  %v975_v58 = vld [vmem:[%s3029_s7 + $0x8] sm:$0xff]  ;;  %v1984_v1 = vld [vmem:[%s3028_s6 + $0x10] sm:$0xff]  ;;  %v790_v2 = vld [vmem:[%s3067_s3 + $0x20] sm:$0xff] }
  0x28   : > { %796 = vperm.xlu1 %2094, %v786_v15   ;;  %v581_v0 = vld [vmem:[%s3066_s2 + $0x68] sm:$0xff]  ;;  %v922_v10 = vld [vmem:[%s3027_s5] sm:$0xff] }
  0x29   : > { %v923_v11 = vld [vmem:[%s3027_s5 + $0x8] sm:$0xff]  ;;  %v1218_v47 = vld [vmem:[%s3031_s9 + $0x20] sm:$0xff] }
  0x2c   : > { %1965 = vmatmul.msk.f32.gmra.mxu0 %vm664_vm0, %v553_v3  ;;  %1976 = vmatmul.msk.f32.gmra.mxu2 %vm664_vm0, %v564_v35  ;;  %v1991_v3 = vld [vmem:[%s3030_s8 + $0x18] sm:$0xff] }
  0x2e   : > { %641 = vperm.xlu2 %2095, %v579_v17  }
  0x34   : > { %1966 = vmatmul.msk.f32.gmra.mxu0 %vm664_vm0, %v554_v4  ;;  %1977 = vmatmul.msk.f32.gmra.mxu2 %vm664_vm0, %v565_v40 }
  0x36   : > { %934 = vperm.xlu2 %2095, %v930_v19  }
  0x3c   : > { %1967 = vmatmul.msk.f32.gmra.mxu0 %vm664_vm0, %v555_v5 }
  0x3e   : > { %806 = vperm.xlu2 %2095, %v788_v21  }
  0x44   : > { %1968 = vmatmul.msk.f32.gmra.mxu0 %vm664_vm0, %v556_v7 }
  0x46   : > { %997 = vperm.xlu2 %2095, %v989_v23  }
  0x4c   : > { %1969 = vmatmul.msk.f32.gmra.mxu0 %vm664_vm0, %v557_v12 }
  0x54   : > { %1970 = vmatmul.msk.f32.gmra.mxu0 %vm664_vm0, %v558_v16 }
  0x5c   : > { %1971 = vmatmul.msk.f32.gmra.mxu0 %vm664_vm0, %v559_v18  ;;  %v566_v18 = vld [vmem:[%s3065_s0 + $0x70] sm:$0xff] }
  0x5d   : > { %1978 = vmatmul.msk.f32.gmra.mxu2 %vm664_vm0, %v566_v18 }
  0x64   : > { %1972 = vmatmul.msk.f32.gmra.mxu0 %vm664_vm0, %v560_v20 }
  0x6c   : > { %1973 = vmatmul.msk.f32.gmra.mxu0 %vm664_vm0, %v561_v22 }
  0x74   : > { %1974 = vmatmul.msk.f32.gmra.mxu0 %vm664_vm0, %v562_v30 }
  0x78   : > { %v858_v39 = vpop.permute.xlu2 %857 }
  0x80   : > { %v853_v49 = vpop.permute.xlu2 %852 }
  0x88   : > { %v642_v14 = vpop.permute.xlu2 %641 }
  0x90   : > { %v935_v17 = vpop.permute.xlu2 %934 }
  0x91   : > { %v632_v32 = vpop.permute.xlu0 %631 }
  0x92   : > { %v802_v34 = vpop.permute.xlu1 %801 }
  0x98   : > { %v807_v35 = vpop.permute.xlu2 %806 }
  0x99   : > { %v627_v36 = vpop.permute.xlu0 %626 }
  0x9a   : > { %v797_v42 = vpop.permute.xlu1 %796 }
  0xa1   : > { %v2444_v24 = vpop.f32.mrf.mxu0 }
  0xa7   : > { %v763_v30 = vpop.f32.mrf.mxu2 }
  0xa9   : > { %v2446_v25 = vpop.f32.mrf.mxu0 }
  0xb1   : > { %v2448_v26 = vpop.f32.mrf.mxu0 }
  0xb9   : > { %v2450_v27 = vpop.f32.mrf.mxu0 }
  0xc1   : > { %v2452_v28 = vpop.f32.mrf.mxu0 }
  0xc9   : > { %v2454_v29 = vpop.f32.mrf.mxu0 }
  0xd1   : > { %v2459_v31 = vpop.f32.mrf.mxu0 }
  0xd9   : > { %v2462_v33 = vpop.f32.mrf.mxu0 }
  0xe1   : > { %v754_v37 = vpop.f32.mrf.mxu0 }
  0xe2   : > { %v755_v38 = vadd.f32 %v754_v37, %v627_v36  ;;  %v764_v36 = vadd.f32 %v763_v30, %v642_v14  ;;  %v567_v37 = vld [vmem:[%s3065_s0 + $0x78] sm:$0xff]  ;;  %v1994_v14 = vld [vmem:[%s3028_s6 + $0x20] sm:$0xff] }
  0xe3   : > { %1979 = vmatmul.msk.f32.gmra.mxu2 %vm664_vm0, %v567_v37  ;;  %v766_v37 = vpop.f32.mrf.mxu2 }
  0xe4   : > { %v778_v41 = vmax.f32 %v755_v38, 0.0 }
  0xe6   : > { %v834_v45 = vmul.f32 %v797_v42, %v778_v41  ;;  %v781_v41 = vmax.f32 %v764_v36, 0.0  ;;  %v1983_v36 = vld [vmem:[%s3027_s5 + $0x18] sm:$0xff] }
  0xe8   : > { %v890_v50 = vadd.f32 %v853_v49, %v834_v45 }
  0xe9   : > { %v757_v44 = vpop.f32.mrf.mxu0 }
  0xea   : > { %v758_v46 = vadd.f32 %v757_v44, %v632_v32  ;;  %v900_v53 = vsel %vm551_vm1, %v890_v50, 0.0 }
  0xec   : > { %v779_v48 = vmax.f32 %v758_v46, 0.0 }
  0xee   : > { %v835_v51 = vmul.f32 %v802_v34, %v779_v48 }
  0xf0   : > { %v891_v52 = vadd.f32 %v858_v39, %v835_v51 }
  0xf1   : > { %v760_v19 = vpop.f32.mrf.mxu0 }
  0xf2   : > { %v901_v54 = vsel %vm551_vm1, %v891_v52, 0.0 }
  0xf3   : > { %v2101_v55 = vpack.i.bf16 %v900_v53, %v901_v54  ;;  %v998_v53 = vpop.permute.xlu2 %997 }
  0xf5   : > { %2102 = vrot.lane.b32.xlu1 %v2101_v55, %s3048_s24  ;;  %2097 = vrot.lane.b32.xlu0 %v2101_v55, %s3046_s20  ;;  %s539_s24 = sand.u32 1, %s2212_s25  }
  0xf6   : > { %s1961_s20 = sshll.u32 %s539_s24, 6 }
  0xf7   : > { %s2964_s23 = scalar_lea.vmem [#allocation4], %s1961_s20 }
  0xf8   : > { %s1892_s22 = sshll.u32 %s2964_s23, 4  ;;  %s1893_s22 = int_to_ptr.vmem [resolvable:$true] %s1892_s22 }
  0xfd   : > { %636 = vperm.xlu1 %2094, %v578_v56   ;;  %939 = vperm.xlu0 %2093, %v931_v57  }
 0x105   : > { %983 = vperm.xlu1 %2094, %v975_v58   ;;  %811 = vperm.xlu0 %2093, %v789_v59  }
 0x10d   : > { %978 = vperm.xlu1 %2094, %v974_v60   ;;  %867 = vperm.xlu0 %2093, %v845_v61  }
 0x115   : > { %992 = vperm.xlu1 %2094, %v988_v62   ;;  %862 = vperm.xlu0 %2093, %v844_v63   ;;  %v580_v62 = vld [vmem:[%s3066_s2 + $0x60] sm:$0xff]  ;;  %v1985_v63 = vld [vmem:[%s3028_s6 + $0x18] sm:$0xff] }
 0x11d   : > { %651 = vperm.xlu1 %2094, %v581_v0   ;;  %v1989_v0 = vld [vmem:[%s3029_s7 + $0x18] sm:$0xff] }
 0x125   : > { %1036 = vperm.xlu1 %2094, %v1984_v1   ;;  %v791_v1 = vld [vmem:[%s3067_s3 + $0x28] sm:$0xff] }
 0x12d   : > { %816 = vperm.xlu1 %2094, %v790_v2   ;;  %v1988_v2 = vld [vmem:[%s3029_s7 + $0x10] sm:$0xff] }
 0x135   : > { %1100 = vperm.xlu1 %2094, %v1991_v3   ;;  %v847_v3 = vld [vmem:[%s3026_s4 + $0x28] sm:$0xff] }
 0x167   : > { %v2098_v4 = vpop.permute.xlu0 %2097  ;;  %v2103_v7 = vpop.permute.xlu1 %2102 }
 0x168   : > { %v2099_v5 = vunpack.i.l.bf16 %v2098_v4  ;;  %v2100_v6 = vunpack.i.h.bf16 %v2098_v4  ;;  %v2104_v8 = vunpack.i.l.bf16 %v2103_v7  ;;  %v2105_v9 = vunpack.i.h.bf16 %v2103_v7  ;;  %v1990_v4 = vld [vmem:[%s3030_s8 + $0x10] sm:$0xff]  ;;  %v583_v7 = vld [vmem:[%s3066_s2 + $0x78] sm:$0xff] }
 0x16a   : > { %959 = vmatpush.msra.mxu1 %v2099_v5  ;;  %v846_v5 = vld [vmem:[%s3026_s4 + $0x20] sm:$0xff] }
 0x16c   : > { %960 = vmatpush.msra.mxu1 %v2100_v6  ;;  %v1237_v6 = vld [vmem:[%s3032_s10 + $0x38] sm:$0xff] }
 0x16e   : > { %2037 = vmatpush.msk.msra.mxu1 %vm551_vm1, %v891_v52 }
 0x16f   : > { %v637_v12 = vpop.permute.xlu1 %636  ;;  %v940_v13 = vpop.permute.xlu0 %939 }
 0x170   : > { %2038 = vmatpush.msk.msra.mxu1 %vm551_vm1, %v890_v50  ;;  %v761_v32 = vadd.f32 %v760_v19, %v637_v12  ;;  %v1415_v12 = vld [vmem:[%s3034_s12 + $0x38] sm:$0xff]  ;;  %v2603_v19 = vld [vmem:[%s3034_s12 + $0x30] sm:$0xff] }
 0x172   : > { %963 = vmatpush.msra.mxu1 %v2104_v8  ;;  %v780_v38 = vmax.f32 %v761_v32, 0.0  ;;  %v1471_v8 = vmax.f32 %v1237_v6, 0.0  ;;  %v2621_v32 = vld [vmem:[%s3034_s12 + $0x18] sm:$0xff] }
 0x174   : > { %964 = vmatpush.msra.mxu1 %v2105_v9  ;;  %v836_v46 = vmul.f32 %v807_v35, %v780_v38  ;;  %v1359_v9 = vld [vmem:[%s3033_s11 + $0x38] sm:$0xff]  ;;  %v2631_v35 = vld [vmem:[%s3033_s11] sm:$0xff]  ;;  %v769_v38 = vpop.f32.mrf.mxu2 }
 0x175   : > { %1980 = vmatmul.msk.f32.vlgmr.msra.gmra.mxu1 %vm942_vm2, %v922_v10  ;;  %v1479_v10 = vmul.f32 %v1471_v8, %v1359_v9 }
 0x177   : > { %v984_v15 = vpop.permute.xlu1 %983  ;;  %v812_v16 = vpop.permute.xlu0 %811 }
 0x178   : > { %v837_v45 = vmul.f32 %v812_v16, %v781_v41 }
 0x17c   : > { %v2638_v41 = vpop.f32.mrf.mxu2 }
 0x17d   : > { %1981 = vmatmul.msk.f32.gmra.mxu1 %vm942_vm2, %v923_v11  ;;  %v1995_v11 = vld [vmem:[%s3028_s6 + $0x28] sm:$0xff] }
 0x17f   : > { %v979_v20 = vpop.permute.xlu1 %978  ;;  %v868_v21 = vpop.permute.xlu0 %867 }
 0x180   : > { %v893_v50 = vadd.f32 %v868_v21, %v837_v45  ;;  %v2615_v21 = vld [vmem:[%s3034_s12 + $0x20] sm:$0xff] }
 0x182   : > { %v903_v56 = vsel %vm551_vm1, %v893_v50, 0.0 }
 0x184   : > { %v2640_v45 = vpop.f32.mrf.mxu2 }
 0x187   : > { %v993_v43 = vpop.permute.xlu1 %992  ;;  %v863_v44 = vpop.permute.xlu0 %862 }
 0x188   : > { %v892_v51 = vadd.f32 %v863_v44, %v836_v46 }
 0x18a   : > { %v902_v57 = vsel %vm551_vm1, %v892_v51, 0.0 }
 0x1f2   : > { %v966_v22 = vpop.f32.mrf.mxu1 }
 0x1f3   : > { %v967_v23 = vadd.f32 %v966_v22, %v935_v17 }
 0x1f5   : > { %v972_v34 = vmax.f32 %v967_v23, 0.0 }
 0x1f7   : > { %v986_v39 = vmul.f32 %v979_v20, %v972_v34  ;;  %v2609_v20 = vld [vmem:[%s3034_s12 + $0x28] sm:$0xff]  ;;  %v1982_v34 = vld [vmem:[%s3027_s5 + $0x10] sm:$0xff] }
 0x1f9   : > { %v2537_v48 = vadd.f32 %v993_v43, %v986_v39 }
 0x1fa   : > { %v969_v40 = vpop.f32.mrf.mxu1 }
 0x1fb   : > { %v970_v42 = vadd.f32 %v969_v40, %v940_v13  ;;  %v1002_v54 = vsel %vm551_vm1, %v2537_v48, 0.0  ;;  %v2592_v13 = vadd.f32 %v1479_v10, %v1415_v12 }
 0x1fc   : > { %v1006_v59 = vadd.f32 %v1002_v54, %v902_v57 }
 0x1fd   : > { %v973_v49 = vmax.f32 %v970_v42, 0.0  ;;  %v652_v42 = vpop.permute.xlu1 %651 }
 0x1fe   : > { %v770_v57 = vadd.f32 %v769_v38, %v652_v42  ;;  %v849_v38 = vld [vmem:[%s3026_s4 + $0x38] sm:$0xff]  ;;  %v1357_v42 = vld [vmem:[%s3033_s11 + $0x28] sm:$0xff] }
 0x1ff   : > { %v987_v52 = vmul.f32 %v984_v15, %v973_v49  ;;  %v1998_v15 = vld [vmem:[%s3029_s7 + $0x20] sm:$0xff] }
 0x201   : > { %v2542_v55 = vadd.f32 %v998_v53, %v987_v52 }
 0x203   : > { %v1003_v58 = vsel %vm551_vm1, %v2542_v55, 0.0 }
 0x204   : > { %v1007_v60 = vadd.f32 %v1003_v58, %v903_v56 }
 0x205   : > { %v1037_v46 = vpop.permute.xlu1 %1036 }
 0x206   : > { %v2111_v61 = vpack.i.bf16 %v1006_v59, %v1007_v60 }
 0x208   : > { %2112 = vrot.lane.b32.xlu0 %v2111_v61, %s3068_s30  ;;  %2107 = vrot.lane.b32.xlu2 %v2111_v61, %s3069_s18  ;;  %v783_v61 = vmax.f32 %v770_v57, 0.0 }
 0x20d   : > { %v817_v56 = vpop.permute.xlu1 %816 }
 0x210   : > { %646 = vperm.xlu0 %2093, %v580_v62   ;;  %1041 = vperm.xlu2 %2095, %v1985_v63  }
 0x215   : > { %v1101_v8 = vpop.permute.xlu1 %1100 }
 0x218   : > { %1085 = vperm.xlu0 %2093, %v1989_v0   ;;  %821 = vperm.xlu2 %2095, %v791_v1  }
 0x220   : > { %1080 = vperm.xlu0 %2093, %v1988_v2   ;;  %877 = vperm.xlu2 %2095, %v847_v3  }
 0x228   : > { %1095 = vperm.xlu0 %2093, %v1990_v4   ;;  %872 = vperm.xlu2 %2095, %v846_v5  }
 0x230   : > { %661 = vperm.xlu0 %2093, %v583_v7  }
 0x238   : > { %1144 = vperm.xlu0 %2093, %v1995_v11  }
 0x240   : > { %1139 = vperm.xlu0 %2093, %v1994_v14  }
 0x248   : > { %1183 = vperm.xlu0 %2093, %v1998_v15  }
 0x250   : > { %1275 = vperm.xlu0 %2093, %v1237_v6  }
 0x258   : > { %1397 = vperm.xlu0 %2093, %v1359_v9  }
 0x260   : > { %1453 = vperm.xlu0 %2093, %v1415_v12  }
 0x262   : > { %v2108_v16 = vpop.permute.xlu2 %2107 }
 0x263   : > { %v2109_v17 = vunpack.i.l.bf16 %v2108_v16  ;;  %v2110_v18 = vunpack.i.h.bf16 %v2108_v16 }
 0x265   : > { %1060 = vmatpush.msrb.mxu2 %v2109_v17 }
 0x267   : > { %1061 = vmatpush.msrb.mxu2 %v2110_v18  ;;  %v793_v18 = vld [vmem:[%s3067_s3 + $0x38] sm:$0xff] }
 0x268   : > { %1448 = vperm.xlu0 %2093, %v2603_v19  }
 0x269   : > { %1062 = vmatpush.msrb.mxu2 %v1007_v60 }
 0x26a   : > { %v1042_v40 = vpop.permute.xlu2 %1041 }
 0x26b   : > { %1063 = vmatpush.msrb.mxu2 %v1006_v59 }
 0x270   : > { %1443 = vperm.xlu0 %2093, %v2609_v20  }
 0x272   : > { %v822_v44 = vpop.permute.xlu2 %821 }
 0x273   : > { %v839_v1 = vmul.f32 %v822_v44, %v783_v61  ;;  %v1234_v44 = vld [vmem:[%s3032_s10 + $0x20] sm:$0xff] }
 0x278   : > { %1438 = vperm.xlu0 %2093, %v2615_v21  }
 0x27a   : > { %v2113_v22 = vpop.permute.xlu0 %2112  ;;  %v878_v53 = vpop.permute.xlu2 %877 }
 0x27b   : > { %v2114_v23 = vunpack.i.l.bf16 %v2113_v22  ;;  %v2115_v30 = vunpack.i.h.bf16 %v2113_v22  ;;  %v895_v5 = vadd.f32 %v878_v53, %v839_v1  ;;  %v582_v22 = vld [vmem:[%s3066_s2 + $0x70] sm:$0xff]  ;;  %v1233_v53 = vld [vmem:[%s3032_s10 + $0x18] sm:$0xff] }
 0x27c   : > { %v1467_v57 = vmax.f32 %v1233_v53, 0.0 }
 0x27d   : > { %1064 = vmatpush.msrb.mxu2 %v2114_v23  ;;  %v905_v11 = vsel %vm551_vm1, %v895_v5, 0.0  ;;  %v1236_v23 = vld [vmem:[%s3032_s10 + $0x30] sm:$0xff]  ;;  %v1230_v5 = vld [vmem:[%s3032_s10] sm:$0xff] }
 0x27f   : > { %1065 = vmatpush.msrb.mxu2 %v2115_v30  ;;  %v1470_v30 = vmax.f32 %v1236_v23, 0.0 }
 0x280   : > { %1433 = vperm.xlu0 %2093, %v2621_v32   ;;  %1986 = vmatmul.msk.f32.vlgmr.msrb.gmra.mxu2 %vm942_vm2, %v1982_v34  ;;  %v1358_v34 = vld [vmem:[%s3033_s11 + $0x30] sm:$0xff] }
 0x282   : > { %v647_v39 = vpop.permute.xlu0 %646  ;;  %v873_v4 = vpop.permute.xlu2 %872 }
 0x283   : > { %v767_v51 = vadd.f32 %v766_v37, %v647_v39  ;;  %v1235_v37 = vld [vmem:[%s3032_s10 + $0x28] sm:$0xff]  ;;  %v792_v39 = vld [vmem:[%s3067_s3 + $0x30] sm:$0xff] }
 0x285   : > { %v782_v58 = vmax.f32 %v767_v51, 0.0  ;;  %v1356_v51 = vld [vmem:[%s3033_s11 + $0x20] sm:$0xff] }
 0x287   : > { %v838_v62 = vmul.f32 %v817_v56, %v782_v58  ;;  %v2001_v56 = vld [vmem:[%s3030_s8 + $0x28] sm:$0xff]  ;;  %v1355_v58 = vld [vmem:[%s3033_s11 + $0x18] sm:$0xff] }
 0x288   : > { %1362 = vperm.xlu0 %2093, %v2631_v35   ;;  %1987 = vmatmul.msk.f32.gmra.mxu2 %vm942_vm2, %v1983_v36  ;;  %v2676_v36 = vmul.f32 %v1470_v30, %v1358_v34 }
 0x289   : > { %v894_v6 = vadd.f32 %v873_v4, %v838_v62  ;;  %v1354_v62 = vld [vmem:[%s3033_s11 + $0x10] sm:$0xff] }
 0x28a   : > { %v1086_v43 = vpop.permute.xlu0 %1085 }
 0x28b   : > { %v904_v12 = vsel %vm551_vm1, %v894_v6, 0.0  ;;  %v1464_v6 = vmax.f32 %v1230_v5, 0.0 }
 0x292   : > { %v1081_v49 = vpop.permute.xlu0 %1080 }
 0x29a   : > { %v1096_v0 = vpop.permute.xlu0 %1095 }
 0x303   : > { %v1067_v50 = vpop.f32.mrf.mxu2 }
 0x304   : > { %v1068_v52 = vadd.f32 %v1067_v50, %v1037_v46  ;;  %v1999_v46 = vld [vmem:[%s3029_s7 + $0x28] sm:$0xff]  ;;  %v1468_v50 = vmax.f32 %v1234_v44, 0.0 }
 0x306   : > { %v1073_v54 = vmax.f32 %v1068_v52, 0.0  ;;  %v2704_v52 = vmul.f32 %v1468_v50, %v1356_v51 }
 0x308   : > { %v1088_v59 = vmul.f32 %v1081_v49, %v1073_v54  ;;  %v848_v49 = vld [vmem:[%s3026_s4 + $0x30] sm:$0xff]  ;;  %v2000_v54 = vld [vmem:[%s3030_s8 + $0x20] sm:$0xff] }
 0x30a   : > { %v2642_v2 = vadd.f32 %v1096_v0, %v1088_v59  ;;  %v2718_v59 = vmul.f32 %v1467_v57, %v1355_v58  ;;  %v1410_v0 = vld [vmem:[%s3034_s12 + $0x10] sm:$0xff] }
 0x30b   : > { %v1070_v60 = vpop.f32.mrf.mxu2 }
 0x30c   : > { %v1071_v63 = vadd.f32 %v1070_v60, %v1042_v40  ;;  %v1105_v9 = vsel %vm551_vm1, %v2642_v2, 0.0  ;;  %v1469_v40 = vmax.f32 %v1235_v37, 0.0  ;;  %v1232_v60 = vld [vmem:[%s3032_s10 + $0x10] sm:$0xff] }
 0x30d   : > { %v2656_v15 = vadd.f32 %v1105_v9, %v904_v12  ;;  %v1466_v61 = vmax.f32 %v1232_v60, 0.0  ;;  %v1472_v9 = vmul.f32 %v1464_v6, %v2631_v35 }
 0x30e   : > { %v1074_v3 = vmax.f32 %v1071_v63, 0.0 }
 0x30f   : > { %v1474_v63 = vmul.f32 %v1466_v61, %v1354_v62 }
 0x310   : > { %v1089_v7 = vmul.f32 %v1086_v43, %v1074_v3  ;;  %v2690_v43 = vmul.f32 %v1469_v40, %v1357_v42  ;;  %v1231_v3 = vld [vmem:[%s3032_s10 + $0x8] sm:$0xff] }
 0x311   : > { %v2729_v1 = vadd.f32 %v1474_v63, %v1410_v0  ;;  %v1465_v4 = vmax.f32 %v1231_v3, 0.0 }
 0x312   : > { %v2647_v10 = vadd.f32 %v1101_v8, %v1089_v7  ;;  %v1353_v7 = vld [vmem:[%s3033_s11 + $0x8] sm:$0xff] }
 0x313   : > { %v1473_v8 = vmul.f32 %v1465_v4, %v1353_v7 }
 0x314   : > { %v1106_v14 = vsel %vm551_vm1, %v2647_v10, 0.0 }
 0x315   : > { %v2658_v16 = vadd.f32 %v1106_v14, %v905_v11  ;;  %v1408_v11 = vld [vmem:[%s3034_s12] sm:$0xff]  ;;  %v1409_v14 = vld [vmem:[%s3034_s12 + $0x8] sm:$0xff] }
 0x316   : > { %v2744_v12 = vadd.f32 %v1472_v9, %v1408_v11 }
 0x317   : > { %v2121_v17 = vpack.i.bf16 %v2656_v15, %v2658_v16 }
 0x319   : > { %2122 = vrot.lane.b32.xlu2 %v2121_v17, %s3068_s30  ;;  %2117 = vrot.lane.b32.xlu1 %v2121_v17, %s3069_s18  ;;  %v2749_v17 = vadd.f32 %v1473_v8, %v1409_v14  ;;  %s1894_s30 = sshll.u32 %s1891_s21, 4  ;;  %s1880_s18 = scalar_lea.sflag [#allocation5], %s539_s24  ;;  %s1895_s30 = int_to_ptr.hbm [resolvable:$true] %s1894_s30 }
 0x31a   : > { %s2172_s26 = sshra.s32 %s1895_s30, 4  ;;  %s2173_s26 = int_to_ptr.hbm [resolvable:$true] %s2172_s26 }
 0x31b   : > { %s2174_s28 = scalar_lea.hbm %s2173_s26, 64  ;;  %p2179_p0 = scmp.lt.s32.totalorder %s2173_s26, %s3039_s17 }
 0x31c   : > { %p2175_p11 = scmp.ne.s32.totalorder %s2173_s26, %s2174_s28  ;;  %p2180_p1 = scmp.lt.s32.totalorder %s2178_s29, %s2174_s28 }
 0x31e   : > { %p2176_p12 = pnand %p2175_p11, %p2355_p5  ;;  %p2181_p2 = por %p2180_p1, %p2179_p0 }
 0x320   : > { %p2177_p13 = pneg %p2176_p12 }
 0x321   : > { %831 = vperm.xlu2 %2095, %v793_v18   ;;  %656 = vperm.xlu1 %2094, %v582_v22   ;;  %v662_v18 = vpop.permute.xlu0 %661 }
 0x322   : > { %p2182_p3 = pnand %p2181_p2, %p2177_p13 }
 0x329   : > { %887 = vperm.xlu2 %2095, %v849_v38   ;;  %826 = vperm.xlu1 %2094, %v792_v39   ;;  %v1145_v57 = vpop.permute.xlu0 %1144 }
 0x331   : > { %1188 = vperm.xlu2 %2095, %v1999_v46   ;;  %882 = vperm.xlu1 %2094, %v848_v49   ;;  %v1992_v49 = vld [vmem:[%s3027_s5 + $0x20] sm:$0xff] }
 0x339   : > { %1198 = vperm.xlu2 %2095, %v2000_v54   ;;  %1203 = vperm.xlu1 %2094, %v2001_v56  }
 0x341   : > { %1265 = vperm.xlu2 %2095, %v1235_v37   ;;  %1270 = vperm.xlu1 %2094, %v1236_v23   ;;  %v776_v23 = vadd.f32 %v2640_v45, %v662_v18  ;;  %v1221_v18 = vld [vmem:[%s3031_s9 + $0x38] sm:$0xff] }
 0x343   : > { %v785_v30 = vmax.f32 %v776_v23, 0.0 }
 0x349   : > { %1392 = vperm.xlu2 %2095, %v1358_v34   ;;  %1260 = vperm.xlu1 %2094, %v1234_v44  }
 0x351   : > { %1387 = vperm.xlu2 %2095, %v1357_v42   ;;  %1255 = vperm.xlu1 %2094, %v1233_v53  }
 0x359   : > { %1382 = vperm.xlu2 %2095, %v1356_v51   ;;  %1250 = vperm.xlu1 %2094, %v1232_v60   ;;  %v1140_v60 = vpop.permute.xlu0 %1139 }
 0x361   : > { %1377 = vperm.xlu2 %2095, %v1355_v58   ;;  %1245 = vperm.xlu1 %2094, %v1231_v3   ;;  %v1184_v4 = vpop.permute.xlu0 %1183 }
 0x369   : > { %1372 = vperm.xlu2 %2095, %v1354_v62   ;;  %1240 = vperm.xlu1 %2094, %v1230_v5   ;;  %v1276_v23 = vpop.permute.xlu0 %1275 }
 0x371   : > { %1428 = vperm.xlu2 %2095, %v1410_v0   ;;  %1367 = vperm.xlu1 %2094, %v1353_v7  }
 0x373   : > { %v2123_v35 = vpop.permute.xlu2 %2122 }
 0x374   : > { %v2124_v46 = vunpack.i.l.bf16 %v2123_v35  ;;  %v2125_v45 = vunpack.i.h.bf16 %v2123_v35  ;;  %v1220_v35 = vld [vmem:[%s3031_s9 + $0x30] sm:$0xff] }
 0x379   : > { %1418 = vperm.xlu2 %2095, %v1408_v11   ;;  %1423 = vperm.xlu1 %2094, %v1409_v14   ;;  %v1214_v14 = vld [vmem:[%s3031_s9] sm:$0xff] }
 0x37b   : > { %v832_v22 = vpop.permute.xlu2 %831 }
 0x37c   : > { %v841_v34 = vmul.f32 %v832_v22, %v785_v30 }
 0x383   : > { %v888_v37 = vpop.permute.xlu2 %887 }
 0x384   : > { %v897_v38 = vadd.f32 %v888_v37, %v841_v34  ;;  %v1398_v34 = vpop.permute.xlu0 %1397 }
 0x386   : > { %2039 = vmatpush.msk.msrb.mxu1 %vm551_vm1, %v897_v38 }
 0x38b   : > { %v2118_v39 = vpop.permute.xlu1 %2117  ;;  %v1189_v62 = vpop.permute.xlu2 %1188 }
 0x38c   : > { %v2119_v40 = vunpack.i.l.bf16 %v2118_v39  ;;  %v2120_v42 = vunpack.i.h.bf16 %v2118_v39 }
 0x38e   : > { %1163 = vmatpush.msra.mxu3 %v2119_v40  ;;  %v1454_v40 = vpop.permute.xlu0 %1453 }
 0x390   : > { %1164 = vmatpush.msra.mxu3 %v2120_v42 }
 0x392   : > { %1165 = vmatpush.msra.mxu3 %v2658_v16  ;;  %v1993_v16 = vld [vmem:[%s3027_s5 + $0x28] sm:$0xff] }
 0x393   : > { %v657_v44 = vpop.permute.xlu1 %656  ;;  %v1199_v9 = vpop.permute.xlu2 %1198 }
 0x394   : > { %1166 = vmatpush.msra.mxu3 %v2656_v15  ;;  %v773_v51 = vadd.f32 %v2638_v41, %v657_v44 }
 0x396   : > { %1167 = vmatpush.msra.mxu3 %v2124_v46  ;;  %v784_v53 = vmax.f32 %v773_v51, 0.0 }
 0x398   : > { %1168 = vmatpush.msra.mxu3 %v2125_v45 }
 0x399   : > { %1996 = vmatmul.msk.f32.vlgmr.msra.gmra.mxu3 %vm942_vm2, %v1992_v49  ;;  %v1449_v49 = vpop.permute.xlu0 %1448 }
 0x39b   : > { %v827_v50 = vpop.permute.xlu1 %826  ;;  %v1266_v38 = vpop.permute.xlu2 %1265 }
 0x39c   : > { %v840_v15 = vmul.f32 %v827_v50, %v784_v53 }
 0x3a1   : > { %1997 = vmatmul.msk.f32.gmra.mxu3 %vm942_vm2, %v1993_v16  ;;  %v1444_v53 = vpop.permute.xlu0 %1443 }
 0x3a3   : > { %v883_v54 = vpop.permute.xlu1 %882  ;;  %v1393_v44 = vpop.permute.xlu2 %1392 }
 0x3a4   : > { %v896_v56 = vadd.f32 %v883_v54, %v840_v15 }
 0x3a6   : > { %2040 = vmatpush.msk.msrb.mxu1 %vm551_vm1, %v896_v56 }
 0x3ab   : > { %v1204_v7 = vpop.permute.xlu1 %1203  ;;  %v1388_v50 = vpop.permute.xlu2 %1387 }
 0x3b3   : > { %v1271_v22 = vpop.permute.xlu1 %1270  ;;  %v1383_v15 = vpop.permute.xlu2 %1382 }
 0x3bb   : > { %v1261_v30 = vpop.permute.xlu1 %1260 }
 0x3c3   : > { %v1256_v39 = vpop.permute.xlu1 %1255 }
 0x3cb   : > { %v1251_v46 = vpop.permute.xlu1 %1250 }
 0x3d3   : > { %v1246_v51 = vpop.permute.xlu1 %1245 }
 0x41c   : > { %v1170_v58 = vpop.f32.mrf.mxu3 }
 0x41d   : > { %v1171_v61 = vadd.f32 %v1170_v58, %v1140_v60 }
 0x41f   : > { %v1176_v41 = vmax.f32 %v1171_v61, 0.0  ;;  %v1439_v61 = vpop.permute.xlu0 %1438 }
 0x421   : > { %v1191_v5 = vmul.f32 %v1184_v4, %v1176_v41 }
 0x423   : > { %v1206_v11 = vadd.f32 %v1199_v9, %v1191_v5 }
 0x424   : > { %v1173_v63 = vpop.f32.mrf.mxu3 }
 0x425   : > { %v1174_v0 = vadd.f32 %v1173_v63, %v1145_v57  ;;  %v1241_v57 = vpop.permute.xlu1 %1240 }
 0x427   : > { %v1177_v3 = vmax.f32 %v1174_v0, 0.0  ;;  %v1378_v0 = vpop.permute.xlu2 %1377 }
 0x429   : > { %v1192_v6 = vmul.f32 %v1189_v62, %v1177_v3 }
 0x42b   : > { %v1207_v8 = vadd.f32 %v1204_v7, %v1192_v6 }
 0x42d   : > { %2041 = vmatpush.msk.msrb.mxu1 %vm551_vm1, %v1207_v8  ;;  %v1368_v5 = vpop.permute.xlu1 %1367 }
 0x42f   : > { %2042 = vmatpush.msk.msrb.mxu1 %vm551_vm1, %v1206_v11 }
 0x431   : > { %2043 = vmatpush.msk.msrb.mxu1 %vm551_vm1, %v2647_v10  ;;  %v1215_v10 = vld [vmem:[%s3031_s9 + $0x8] sm:$0xff] }
 0x433   : > { %2044 = vmatpush.msk.msrb.mxu1 %vm551_vm1, %v2642_v2  ;;  %v1217_v2 = vld [vmem:[%s3031_s9 + $0x18] sm:$0xff] }
 0x435   : > { %2045 = vmatpush.msk.msrb.mxu1 %vm551_vm1, %v2542_v55  ;;  %v1216_v55 = vld [vmem:[%s3031_s9 + $0x10] sm:$0xff] }
 0x437   : > { %2046 = vmatpush.msk.msrb.mxu1 %vm551_vm1, %v2537_v48  ;;  %v1219_v48 = vld [vmem:[%s3031_s9 + $0x28] sm:$0xff] }
 0x438   : > { %2002 = vmatmul.msk.f32.vlgmr.msrb.gmra.mxu1 %vm1278_vm3, %v1214_v14 }
 0x440   : > { %2003 = vmatmul.msk.f32.gmra.mxu1 %vm1278_vm3, %v1215_v10 }
 0x448   : > { %2004 = vmatmul.msk.f32.gmra.mxu1 %vm1278_vm3, %v1216_v55 }
 0x450   : > { %2005 = vmatmul.msk.f32.gmra.mxu1 %vm1278_vm3, %v1217_v2  ;;  %v1373_v2 = vpop.permute.xlu2 %1372 }
 0x458   : > { %2006 = vmatmul.msk.f32.gmra.mxu1 %vm1278_vm3, %v1218_v47 }
 0x460   : > { %2007 = vmatmul.msk.f32.gmra.mxu1 %vm1278_vm3, %v1219_v48  ;;  %v1424_v48 = vpop.permute.xlu1 %1423 }
 0x468   : > { %2008 = vmatmul.msk.f32.gmra.mxu1 %vm1278_vm3, %v1220_v35 }
 0x470   : > { %2009 = vmatmul.msk.f32.gmra.mxu1 %vm1278_vm3, %v1221_v18 }
 0x4b5   : > { %v1320_v37 = vpop.f32.mrf.mxu1 }
 0x4bd   : > { %v1323_v42 = vpop.f32.mrf.mxu1 }
 0x4be   : > { %v1324_v3 = vadd.f32 %v1323_v42, %v1246_v51 }
 0x4c0   : > { %v1345_v7 = vmax.f32 %v1324_v3, 0.0  ;;  %v575_v3 = vld [vmem:[%s3066_s2 + $0x38] sm:$0xff] }
 0x4c2   : > { %v1401_v14 = vmul.f32 %v1368_v5, %v1345_v7  ;;  %v1486_v5 = vadd.f32 %v2676_v36, %v2603_v19 }
 0x4c5   : > { %v1326_v45 = vpop.f32.mrf.mxu1 }
 0x4c6   : > { %v1327_v10 = vadd.f32 %v1326_v45, %v1251_v46  ;;  %v1429_v46 = vpop.permute.xlu2 %1428 }
 0x4c8   : > { %v1346_v35 = vmax.f32 %v1327_v10, 0.0 }
 0x4cd   : > { %v1329_v16 = vpop.f32.mrf.mxu1 }
 0x4d5   : > { %v1332_v54 = vpop.f32.mrf.mxu1 }
 0x4d6   : > { %v1333_v56 = vadd.f32 %v1332_v54, %v1261_v30  ;;  %v2823_v30 = vadd.f32 %v1424_v48, %v1401_v14  ;;  %v1511_v14 = vmul.f32 88.0, %v2592_v13  ;;  %v1505_v13 = vmul.f32 88.0, %v2749_v17 }
 0x4d8   : > { %v1348_v58 = vmax.f32 %v1333_v56, 0.0 }
 0x4da   : > { %v1404_v60 = vmul.f32 %v1383_v15, %v1348_v58 }
 0x4dc   : > { %v2815_v62 = vadd.f32 %v1439_v61, %v1404_v60  ;;  %v571_v61 = vld [vmem:[%s3066_s2 + $0x18] sm:$0xff] }
 0x4dd   : > { %v1335_v63 = vpop.f32.mrf.mxu1 }
 0x4de   : > { %v1336_v41 = vadd.f32 %v1335_v63, %v1266_v38  ;;  %1496 = vadd.xlane.f32.xlu2 %v2815_v62  ;;  %v570_v63 = vld [vmem:[%s3066_s2 + $0x10] sm:$0xff] }
 0x4e0   : > { %v1349_v4 = vmax.f32 %v1336_v41, 0.0  ;;  %v574_v41 = vld [vmem:[%s3066_s2 + $0x30] sm:$0xff] }
 0x4e2   : > { %v1405_v6 = vmul.f32 %v1388_v50, %v1349_v4  ;;  %v1330_v50 = vadd.f32 %v1329_v16, %v1256_v39  ;;  %v1419_v16 = vpop.permute.xlu2 %1418 }
 0x4e4   : > { %v2818_v8 = vadd.f32 %v1444_v53, %v1405_v6  ;;  %v1347_v45 = vmax.f32 %v1330_v50, 0.0  ;;  %v1485_v6 = vadd.f32 %v2690_v43, %v2609_v20  ;;  %v1506_v43 = vmul.f32 88.0, %v2729_v1 }
 0x4e5   : > { %v1338_v9 = vpop.f32.mrf.mxu1  ;;  %v1504_v1 = vmul.f32 88.0, %v2744_v12  ;;  %v1530_v12 = vld [vmem:[%s3035_s13 + $0x10] sm:$0xff] }
 0x4e6   : > { %v1339_v11 = vadd.f32 %v1338_v9, %v1271_v22  ;;  %1498 = vadd.xlane.f32.xlu2 %v2818_v8  ;;  %v1402_v22 = vmul.f32 %v1373_v2, %v1346_v35  ;;  %v1403_v54 = vmul.f32 %v1378_v0, %v1347_v45  ;;  %v572_v0 = vld [vmem:[%s3066_s2 + $0x20] sm:$0xff]  ;;  %v1484_v9 = vadd.f32 %v2704_v52, %v2615_v21 }
 0x4e8   : > { %v1350_v55 = vmax.f32 %v1339_v11, 0.0  ;;  %v1510_v11 = vmul.f32 88.0, %v1486_v5  ;;  %v1532_v5 = vld [vmem:[%s3036_s14] sm:$0xff] }
 0x4ea   : > { %v1406_v47 = vmul.f32 %v1393_v44, %v1350_v55  ;;  %v2829_v44 = vadd.f32 %v1429_v46, %v1402_v22  ;;  %v1509_v55 = vmul.f32 88.0, %v1485_v6 }
 0x4ec   : > { %v2821_v18 = vadd.f32 %v1449_v49, %v1406_v47  ;;  %v1434_v49 = vpop.permute.xlu0 %1433  ;;  %v1508_v47 = vmul.f32 88.0, %v1484_v9 }
 0x4ed   : > { %v1341_v38 = vpop.f32.mrf.mxu1  ;;  %v2833_v58 = vadd.f32 %v1434_v49, %v1403_v54 }
 0x4ee   : > { %v1342_v42 = vadd.f32 %v1341_v38, %v1276_v23  ;;  %1500 = vadd.xlane.f32.xlu1 %v2821_v18  ;;  %1490 = vadd.xlane.f32.xlu2 %v2823_v30  ;;  %v1321_v23 = vadd.f32 %v1320_v37, %v1241_v57  ;;  %v573_v37 = vld [vmem:[%s3066_s2 + $0x28] sm:$0xff]  ;;  %v568_v57 = vld [vmem:[%s3066_s2] sm:$0xff]  ;;  %v1483_v38 = vadd.f32 %v2718_v59, %v2621_v32 }
 0x4f0   : > { %v1351_v51 = vmax.f32 %v1342_v42, 0.0  ;;  %v1344_v56 = vmax.f32 %v1321_v23, 0.0  ;;  %v1507_v21 = vmul.f32 88.0, %v1483_v38  ;;  %v1586_v38 = vld [vmem:[%s3037_s15 + $0x28] sm:$0xff] }
 0x4f2   : > { %v1407_v53 = vmul.f32 %v1398_v34, %v1351_v51 }
 0x4f4   : > { %v2827_v15 = vadd.f32 %v1454_v40, %v1407_v53  ;;  %v1363_v39 = vpop.permute.xlu0 %1362  ;;  %v569_v40 = vld [vmem:[%s3066_s2 + $0x8] sm:$0xff] }
 0x4f5   : > { %v1400_v34 = vmul.f32 %v1363_v39, %v1344_v56  ;;  %v1528_v39 = vld [vmem:[%s3035_s13] sm:$0xff] }
 0x4f6   : > { %1502 = vadd.xlane.f32.xlu0 %v2827_v15  ;;  %1492 = vadd.xlane.f32.xlu1 %v2829_v44 }
 0x4f7   : > { %v2839_v60 = vadd.f32 %v1419_v16, %v1400_v34  ;;  %v1529_v34 = vld [vmem:[%s3035_s13 + $0x8] sm:$0xff]  ;;  %v1531_v16 = vld [vmem:[%s3035_s13 + $0x18] sm:$0xff] }
 0x4fe   : > { %1494 = vadd.xlane.f32.xlu0 %v2833_v58 }
 0x506   : > { %591 = vperm.xlu2 %2095, %v569_v40   ;;  %1488 = vadd.xlane.f32.xlu0 %v2839_v60 }
 0x50e   : > { %611 = vperm.xlu2 %2095, %v573_v37  }
 0x50f   : > { %586 = vperm.xlu1 %2094, %v568_v57  }
 0x517   : > { %601 = vperm.xlu1 %2094, %v571_v61   ;;  %v1534_v61 = vld [vmem:[%s3036_s14 + $0x10] sm:$0xff] }
 0x51a   : > { %596 = vperm.xlu0 %2093, %v570_v63   ;;  %v1535_v63 = vld [vmem:[%s3036_s14 + $0x18] sm:$0xff] }
 0x51f   : > { %616 = vperm.xlu1 %2094, %v574_v41   ;;  %v1533_v41 = vld [vmem:[%s3036_s14 + $0x8] sm:$0xff] }
 0x522   : > { %606 = vperm.xlu0 %2093, %v572_v0  }
 0x52a   : > { %621 = vperm.xlu0 %2093, %v575_v3  }
 0x551   : > { %v1497_v4 = vpop.xlane.xlu2 %1496 }
 0x552   : > { %v1516_v42 = vsub.f32 %v1497_v4, %v1508_v47  ;;  %v1583_v47 = vld [vmem:[%s3037_s15 + $0x10] sm:$0xff] }
 0x554   : > { %v1524_v53 = vmul.f32 0.025, %v1516_v42  ;;  %v1589_v42 = vld [vmem:[%s3038_s16] sm:$0xff] }
 0x559   : > { %v1499_v10 = vpop.xlane.xlu2 %1498 }
 0x55a   : > { %v1517_v19 = vsub.f32 %v1499_v10, %v1509_v55  ;;  %v1581_v55 = vld [vmem:[%s3037_s15] sm:$0xff] }
 0x55c   : > { %v1525_v22 = vmul.f32 0.025, %v1517_v19  ;;  %v1587_v19 = vld [vmem:[%s3037_s15 + $0x30] sm:$0xff] }
 0x561   : > { %v1501_v7 = vpop.xlane.xlu1 %1500  ;;  %v1491_v50 = vpop.xlane.xlu2 %1490 }
 0x562   : > { %v1518_v48 = vsub.f32 %v1501_v7, %v1510_v11  ;;  %v1513_v32 = vsub.f32 %v1491_v50, %v1505_v13 }
 0x564   : > { %v1526_v20 = vmul.f32 0.025, %v1518_v48  ;;  %v1521_v23 = vmul.f32 0.025, %v1513_v32  ;;  %v1584_v48 = vld [vmem:[%s3037_s15 + $0x18] sm:$0xff] }
 0x569   : > { %v1503_v2 = vpop.xlane.xlu0 %1502  ;;  %v1493_v52 = vpop.xlane.xlu1 %1492 }
 0x56a   : > { %v1519_v35 = vsub.f32 %v1503_v2, %v1511_v14  ;;  %v1514_v46 = vsub.f32 %v1493_v52, %v1506_v43  ;;  %v1582_v2 = vld [vmem:[%s3037_s15 + $0x8] sm:$0xff] }
 0x56b   : > { %v1590_v52 = vld [vmem:[%s3038_s16 + $0x8] sm:$0xff] }
 0x56c   : > { %v1527_v36 = vmul.f32 0.025, %v1519_v35  ;;  %v1522_v49 = vmul.f32 0.025, %v1514_v46  ;;  %v1585_v35 = vld [vmem:[%s3037_s15 + $0x20] sm:$0xff]  ;;  %v1591_v46 = vld [vmem:[%s3038_s16 + $0x10] sm:$0xff] }
 0x56e   : > { %1556 = vmatpush.msra.mxu2 %v1527_v36  ;;  %v1588_v36 = vld [vmem:[%s3037_s15 + $0x38] sm:$0xff] }
 0x570   : > { %1557 = vmatpush.msra.mxu2 %v1526_v20 }
 0x571   : > { %v1495_v51 = vpop.xlane.xlu0 %1494 }
 0x572   : > { %v1515_v45 = vsub.f32 %v1495_v51, %v1507_v21  ;;  %1558 = vmatpush.msra.mxu2 %v1525_v22 }
 0x574   : > { %v1523_v59 = vmul.f32 0.025, %v1515_v45  ;;  %1559 = vmatpush.msra.mxu2 %v1524_v53 }
 0x576   : > { %1560 = vmatpush.msra.mxu2 %v1523_v59 }
 0x578   : > { %1561 = vmatpush.msra.mxu2 %v1522_v49 }
 0x579   : > { %v1489_v54 = vpop.xlane.xlu0 %1488 }
 0x57a   : > { %v1512_v56 = vsub.f32 %v1489_v54, %v1504_v1  ;;  %1562 = vmatpush.msra.mxu2 %v1521_v23 }
 0x57c   : > { %v1520_v17 = vmul.f32 0.025, %v1512_v56  ;;  %v1592_v56 = vld [vmem:[%s3038_s16 + $0x18] sm:$0xff] }
 0x57e   : > { %1563 = vmatpush.msra.mxu2 %v1520_v17 }
 0x57f   : > { %2010 = vmatmul.msk.f32.vlgmr.msra.gmra.mxu2 %vm1278_vm3, %v1528_v39 }
 0x587   : > { %2011 = vmatmul.msk.f32.gmra.mxu2 %vm1278_vm3, %v1529_v34 }
 0x58f   : > { %2012 = vmatmul.msk.f32.gmra.mxu2 %vm1278_vm3, %v1530_v12 }
 0x597   : > { %2013 = vmatmul.msk.f32.gmra.mxu2 %vm1278_vm3, %v1531_v16 }
 0x602   : > { %v1565_v40 = vpop.f32.mrf.mxu2 }
 0x603   : > { %v1566_v9 = vadd.f32 %v1565_v40, %v1532_v5 }
 0x605   : > { %v1577_v10 = vmax.f32 %v1566_v9, 0.0 }
 0x60a   : > { %v1568_v37 = vpop.f32.mrf.mxu2 }
 0x60b   : > { %v1569_v6 = vadd.f32 %v1568_v37, %v1533_v41 }
 0x60d   : > { %v1578_v14 = vmax.f32 %v1569_v6, 0.0  ;;  %v1593_v6 = vld [vmem:[%s3038_s16 + $0x20] sm:$0xff] }
 0x612   : > { %v1571_v57 = vpop.f32.mrf.mxu2 }
 0x613   : > { %v1572_v3 = vadd.f32 %v1571_v57, %v1534_v61 }
 0x615   : > { %v1579_v11 = vmax.f32 %v1572_v3, 0.0 }
 0x61a   : > { %v1574_v0 = vpop.f32.mrf.mxu2 }
 0x61b   : > { %v1575_v4 = vadd.f32 %v1574_v0, %v1535_v63 }
 0x61d   : > { %v1580_v7 = vmax.f32 %v1575_v4, 0.0 }
 0x61f   : > { %1634 = vmatpush.msrb.mxu3 %v1580_v7 }
 0x621   : > { %1635 = vmatpush.msrb.mxu3 %v1579_v11 }
 0x623   : > { %1636 = vmatpush.msrb.mxu3 %v1578_v14 }
 0x625   : > { %1637 = vmatpush.msrb.mxu3 %v1577_v10 }
 0x626   : > { %2014 = vmatmul.msk.f32.vlgmr.msrb.gmra.mxu3 %vm1597_vm4, %v1581_v55 }
 0x62e   : > { %2015 = vmatmul.msk.f32.gmra.mxu3 %vm1597_vm4, %v1582_v2 }
 0x636   : > { %2016 = vmatmul.msk.f32.gmra.mxu3 %vm1597_vm4, %v1583_v47 }
 0x63e   : > { %2017 = vmatmul.msk.f32.gmra.mxu3 %vm1597_vm4, %v1584_v48 }
 0x646   : > { %2018 = vmatmul.msk.f32.gmra.mxu3 %vm1597_vm4, %v1585_v35 }
 0x64e   : > { %2019 = vmatmul.msk.f32.gmra.mxu3 %vm1597_vm4, %v1586_v38 }
 0x656   : > { %2020 = vmatmul.msk.f32.gmra.mxu3 %vm1597_vm4, %v1587_v19 }
 0x65e   : > { %2021 = vmatmul.msk.f32.gmra.mxu3 %vm1597_vm4, %v1588_v36 }
 0x6a9   : > { %v1639_v20 = vpop.f32.mrf.mxu3 }
 0x6aa   : > { %v1640_v43 = vadd.f32 %v1639_v20, %v1589_v42 }
 0x6ac   : > { %v2022_v21 = vmul.f32 -1.442695, %v1640_v43  ;;  %v1594_v43 = vld [vmem:[%s3038_s16 + $0x28] sm:$0xff] }
 0x6ae   : > { %2126 = vpow2.f32 %v2022_v21 }
 0x6b1   : > { %v1642_v22 = vpop.f32.mrf.mxu3 }
 0x6b2   : > { %v1643_v13 = vadd.f32 %v1642_v22, %v1590_v52 }
 0x6b4   : > { %v2127_v50 = vpop.eup %2126  ;;  %v2023_v51 = vmul.f32 -1.442695, %v1643_v13 }
 0x6b5   : > { %v1687_v53 = vadd.f32 1.0, %v2127_v50 }
 0x6b6   : > { %2128 = vpow2.f32 %v2023_v51 }
 0x6b7   : > { %2130 = vrcp.f32 %v1687_v53  ;;  %v1706_v34 = vand.u32 2147483648, %v1687_v53  ;;  %v1704_v40 = vand.u32 2147483647, %v1687_v53  ;;  %vm1700_vm6 = vweird.f32 %v1687_v53 }
 0x6b9   : > { %v1645_v45 = vpop.f32.mrf.mxu3  ;;  %v1707_v0 = vor.u32 1.1754944e-38, %v1706_v34  ;;  %vm1705_vm8 = vcmp.eq.f32.partialorder %v1704_v40, 8.507059e+37 }
 0x6ba   : > { %v1646_v32 = vadd.f32 %v1645_v45, %v1591_v46 }
 0x6bc   : > { %v2129_v59 = vpop.eup %2128  ;;  %v2024_v49 = vmul.f32 -1.442695, %v1646_v32 }
 0x6bd   : > { %v2131_v1 = vpop.eup %2130  ;;  %v1688_v23 = vadd.f32 1.0, %v2129_v59 }
 0x6be   : > { %2132 = vpow2.f32 %v2024_v49  ;;  %v1696_v54 = vmul.f32 %v2131_v1, %v1687_v53  ;;  %vm1701_vm5 = vweird.f32 %v2131_v1 }
 0x6bf   : > { %2134 = vrcp.f32 %v1688_v23  ;;  %vm1702_vm7 = vmor %vm1700_vm6, %vm1701_vm5  ;;  %v1721_v11 = vand.u32 2147483648, %v1688_v23  ;;  %v1719_v55 = vand.u32 2147483647, %v1688_v23  ;;  %vm1715_vm10 = vweird.f32 %v1688_v23 }
 0x6c0   : > { %v1697_v17 = vsub.f32 1.0, %v1696_v54 }
 0x6c1   : > { %v1648_v39 = vpop.f32.mrf.mxu3  ;;  %v1722_v19 = vor.u32 1.1754944e-38, %v1721_v11  ;;  %vm1720_vm12 = vcmp.eq.f32.partialorder %v1719_v55, 8.507059e+37 }
 0x6c2   : > { %v1649_v12 = vadd.f32 %v1648_v39, %v1592_v56  ;;  %v1698_v16 = vmul.f32 %v2131_v1, %v1697_v17  ;;  %v1595_v56 = vld [vmem:[%s3038_s16 + $0x30] sm:$0xff] }
 0x6c4   : > { %v2133_v37 = vpop.eup %2132  ;;  %v2025_v57 = vmul.f32 -1.442695, %v1649_v12  ;;  %v1699_v61 = vadd.f32 %v2131_v1, %v1698_v16 }
 0x6c5   : > { %v2135_v63 = vpop.eup %2134  ;;  %v1689_v41 = vadd.f32 1.0, %v2133_v37 }
 0x6c6   : > { %2136 = vpow2.f32 %v2025_v57  ;;  %v1703_v3 = vsel %vm1702_vm7, %v2131_v1, %v1699_v61  ;;  %v1711_v4 = vmul.f32 %v2135_v63, %v1688_v23  ;;  %vm1716_vm9 = vweird.f32 %v2135_v63 }
 0x6c7   : > { %2138 = vrcp.f32 %v1689_v41  ;;  %v1708_v5 = vsel %vm1705_vm8, %v1707_v0, %v1703_v3  ;;  %vm1717_vm11 = vmor %vm1715_vm10, %vm1716_vm9  ;;  %v1736_v22 = vand.u32 2147483648, %v1689_v41  ;;  %v1734_v51 = vand.u32 2147483647, %v1689_v41 }
 0x6c8   : > { %1817 = vperm.xlu2 %2095, %v1708_v5   ;;  %v1712_v7 = vsub.f32 1.0, %v1711_v4  ;;  %vm1730_vm14 = vweird.f32 %v1689_v41 }
 0x6c9   : > { %v1651_v9 = vpop.f32.mrf.mxu3  ;;  %v1737_v49 = vor.u32 1.1754944e-38, %v1736_v22  ;;  %vm1735_vm0 = vcmp.eq.f32.partialorder %v1734_v51, 8.507059e+37 }
 0x6ca   : > { %v1652_v14 = vadd.f32 %v1651_v9, %v1593_v6  ;;  %v1713_v10 = vmul.f32 %v2135_v63, %v1712_v7  ;;  %v1596_v6 = vld [vmem:[%s3038_s16 + $0x38] sm:$0xff] }
 0x6cc   : > { %v2137_v2 = vpop.eup %2136  ;;  %v2026_v47 = vmul.f32 -1.442695, %v1652_v14  ;;  %v1714_v48 = vadd.f32 %v2135_v63, %v1713_v10 }
 0x6cd   : > { %v2139_v35 = vpop.eup %2138  ;;  %v1690_v38 = vadd.f32 1.0, %v2137_v2 }
 0x6ce   : > { %2140 = vpow2.f32 %v2026_v47  ;;  %v1718_v36 = vsel %vm1717_vm11, %v2135_v63, %v1714_v48  ;;  %v1726_v42 = vmul.f32 %v2139_v35, %v1689_v41  ;;  %vm1731_vm13 = vweird.f32 %v2139_v35 }
 0x6cf   : > { %2142 = vrcp.f32 %v1690_v38  ;;  %v1723_v20 = vsel %vm1720_vm12, %v1722_v19, %v1718_v36  ;;  %vm1732_vm15 = vmor %vm1730_vm14, %vm1731_vm13  ;;  %v1751_v34 = vand.u32 2147483648, %v1690_v38  ;;  %v1749_v40 = vand.u32 2147483647, %v1690_v38 }
 0x6d0   : > { %1822 = vperm.xlu1 %2094, %v1723_v20   ;;  %v1727_v21 = vsub.f32 1.0, %v1726_v42  ;;  %vm1745_vm2 = vweird.f32 %v1690_v38 }
 0x6d1   : > { %v1654_v52 = vpop.f32.mrf.mxu3  ;;  %v1752_v0 = vor.u32 1.1754944e-38, %v1751_v34  ;;  %vm1750_vm4 = vcmp.eq.f32.partialorder %v1749_v40, 8.507059e+37 }
 0x6d2   : > { %v1655_v13 = vadd.f32 %v1654_v52, %v1594_v43  ;;  %v1728_v50 = vmul.f32 %v2139_v35, %v1727_v21 }
 0x6d4   : > { %v2141_v53 = vpop.eup %2140  ;;  %v2027_v46 = vmul.f32 -1.442695, %v1655_v13  ;;  %v1729_v45 = vadd.f32 %v2139_v35, %v1728_v50 }
 0x6d5   : > { %v2143_v32 = vpop.eup %2142  ;;  %v1691_v59 = vadd.f32 1.0, %v2141_v53 }
 0x6d6   : > { %2144 = vpow2.f32 %v2027_v46  ;;  %v1733_v1 = vsel %vm1732_vm15, %v2139_v35, %v1729_v45  ;;  %v1741_v23 = vmul.f32 %v2143_v32, %v1690_v38  ;;  %vm1746_vm1 = vweird.f32 %v2143_v32 }
 0x6d7   : > { %2146 = vrcp.f32 %v1691_v59  ;;  %v1738_v54 = vsel %vm1735_vm0, %v1737_v49, %v1733_v1  ;;  %vm1747_vm3 = vmor %vm1745_vm2, %vm1746_vm1  ;;  %v1766_v11 = vand.u32 2147483648, %v1691_v59  ;;  %v1764_v55 = vand.u32 2147483647, %v1691_v59 }
 0x6d8   : > { %1827 = vperm.xlu0 %2093, %v1738_v54   ;;  %v1742_v17 = vsub.f32 1.0, %v1741_v23  ;;  %vm1760_vm6 = vweird.f32 %v1691_v59 }
 0x6d9   : > { %v1657_v39 = vpop.f32.mrf.mxu3  ;;  %v1767_v19 = vor.u32 1.1754944e-38, %v1766_v11  ;;  %vm1765_vm8 = vcmp.eq.f32.partialorder %v1764_v55, 8.507059e+37 }
 0x6da   : > { %v1658_v12 = vadd.f32 %v1657_v39, %v1595_v56  ;;  %v1743_v16 = vmul.f32 %v2143_v32, %v1742_v17 }
 0x6dc   : > { %v2145_v37 = vpop.eup %2144  ;;  %v2028_v57 = vmul.f32 -1.442695, %v1658_v12  ;;  %v1744_v61 = vadd.f32 %v2143_v32, %v1743_v16 }
 0x6dd   : > { %v2147_v63 = vpop.eup %2146  ;;  %v1692_v41 = vadd.f32 1.0, %v2145_v37 }
 0x6de   : > { %2148 = vpow2.f32 %v2028_v57  ;;  %v1748_v3 = vsel %vm1747_vm3, %v2143_v32, %v1744_v61  ;;  %v1756_v4 = vmul.f32 %v2147_v63, %v1691_v59  ;;  %vm1761_vm5 = vweird.f32 %v2147_v63 }
 0x6df   : > { %2150 = vrcp.f32 %v1692_v41  ;;  %v1753_v5 = vsel %vm1750_vm4, %v1752_v0, %v1748_v3  ;;  %vm1762_vm7 = vmor %vm1760_vm6, %vm1761_vm5  ;;  %v1781_v21 = vand.u32 2147483648, %v1692_v41  ;;  %v1779_v22 = vand.u32 2147483647, %v1692_v41 }
 0x6e0   : > { %1832 = vperm.xlu2 %2095, %v1753_v5   ;;  %v1757_v7 = vsub.f32 1.0, %v1756_v4  ;;  %vm1775_vm10 = vweird.f32 %v1692_v41  ;;  %v592_v4 = vpop.permute.xlu2 %591 }
 0x6e1   : > { %v1660_v9 = vpop.f32.mrf.mxu3  ;;  %v1782_v46 = vor.u32 1.1754944e-38, %v1781_v21  ;;  %vm1780_vm12 = vcmp.eq.f32.partialorder %v1779_v22, 8.507059e+37 }
 0x6e2   : > { %v1661_v14 = vadd.f32 %v1660_v9, %v1596_v6  ;;  %v1758_v10 = vmul.f32 %v2147_v63, %v1757_v7  ;;  %v587_v6 = vpop.permute.xlu1 %586 }
 0x6e3   : > { %v731_v9 = vadd.f32 %v2444_v24, %v587_v6 }
 0x6e4   : > { %v2149_v2 = vpop.eup %2148  ;;  %v2029_v47 = vmul.f32 -1.442695, %v1661_v14  ;;  %v1759_v48 = vadd.f32 %v2147_v63, %v1758_v10  ;;  %v597_v10 = vpop.permute.xlu0 %596 }
 0x6e5   : > { %v2151_v35 = vpop.eup %2150  ;;  %v1693_v38 = vadd.f32 1.0, %v2149_v2  ;;  %v737_v21 = vadd.f32 %v2448_v26, %v597_v10 }
 0x6e6   : > { %2152 = vpow2.f32 %v2029_v47  ;;  %v1763_v36 = vsel %vm1762_vm7, %v2147_v63, %v1759_v48  ;;  %v1771_v42 = vmul.f32 %v2151_v35, %v1692_v41  ;;  %vm1776_vm9 = vweird.f32 %v2151_v35 }
 0x6e7   : > { %2154 = vrcp.f32 %v1693_v38  ;;  %v1768_v20 = vsel %vm1765_vm8, %v1767_v19, %v1763_v36  ;;  %vm1777_vm11 = vmor %vm1775_vm10, %vm1776_vm9  ;;  %v1796_v1 = vand.u32 2147483648, %v1693_v38  ;;  %v1794_v54 = vand.u32 2147483647, %v1693_v38 }
 0x6e8   : > { %1837 = vperm.xlu1 %2094, %v1768_v20   ;;  %v1772_v43 = vsub.f32 1.0, %v1771_v42  ;;  %vm1790_vm14 = vweird.f32 %v1693_v38  ;;  %v612_v5 = vpop.permute.xlu2 %611  ;;  %v734_v36 = vadd.f32 %v2446_v25, %v592_v4 }
 0x6e9   : > { %v1797_v39 = vor.u32 1.1754944e-38, %v1796_v1  ;;  %vm1795_vm0 = vcmp.eq.f32.partialorder %v1794_v54, 8.507059e+37 }
 0x6ea   : > { %v1773_v52 = vmul.f32 %v2151_v35, %v1772_v43  ;;  %v602_v55 = vpop.permute.xlu1 %601 }
 0x6ec   : > { %v2153_v13 = vpop.eup %2152  ;;  %v1774_v50 = vadd.f32 %v2151_v35, %v1773_v52  ;;  %v607_v2 = vpop.permute.xlu0 %606 }
 0x6ed   : > { %v2155_v51 = vpop.eup %2154  ;;  %v1694_v53 = vadd.f32 1.0, %v2153_v13 }
 0x6ee   : > { %v1778_v45 = vsel %vm1777_vm11, %v2151_v35, %v1774_v50  ;;  %v1786_v32 = vmul.f32 %v2155_v51, %v1693_v38  ;;  %vm1791_vm13 = vweird.f32 %v2155_v51  ;;  %v740_v35 = vadd.f32 %v2450_v27, %v602_v55 }
 0x6ef   : > { %2156 = vrcp.f32 %v1694_v53  ;;  %v1783_v59 = vsel %vm1780_vm12, %v1782_v46, %v1778_v45  ;;  %vm1792_vm15 = vmor %vm1790_vm14, %vm1791_vm13  ;;  %v1811_v37 = vand.u32 2147483648, %v1694_v53  ;;  %v1809_v61 = vand.u32 2147483647, %v1694_v53 }
 0x6f0   : > { %1842 = vperm.xlu0 %2093, %v1783_v59   ;;  %v1787_v49 = vsub.f32 1.0, %v1786_v32  ;;  %vm1805_vm2 = vweird.f32 %v1694_v53  ;;  %v743_v50 = vadd.f32 %v2452_v28, %v607_v2 }
 0x6f1   : > { %v1812_v41 = vor.u32 1.1754944e-38, %v1811_v37  ;;  %vm1810_vm4 = vcmp.eq.f32.partialorder %v1809_v61, 8.507059e+37 }
 0x6f2   : > { %v1788_v23 = vmul.f32 %v2155_v51, %v1787_v49  ;;  %v617_v47 = vpop.permute.xlu1 %616 }
 0x6f3   : > { %v749_v22 = vadd.f32 %v2459_v31, %v617_v47 }
 0x6f4   : > { %v1789_v56 = vadd.f32 %v2155_v51, %v1788_v23 }
 0x6f5   : > { %v2157_v17 = vpop.eup %2156 }
 0x6f6   : > { %v1793_v34 = vsel %vm1792_vm15, %v2155_v51, %v1789_v56  ;;  %v1801_v12 = vmul.f32 %v2157_v17, %v1694_v53  ;;  %vm1806_vm1 = vweird.f32 %v2157_v17  ;;  %v746_v53 = vadd.f32 %v2454_v29, %v612_v5 }
 0x6f7   : > { %v1798_v16 = vsel %vm1795_vm0, %v1797_v39, %v1793_v34  ;;  %vm1807_vm3 = vmor %vm1805_vm2, %vm1806_vm1 }
 0x6f8   : > { %1847 = vperm.xlu2 %2095, %v1798_v16   ;;  %v1802_v40 = vsub.f32 1.0, %v1801_v12 }
 0x6fa   : > { %v1803_v57 = vmul.f32 %v2157_v17, %v1802_v40 }
 0x6fc   : > { %v1804_v63 = vadd.f32 %v2157_v17, %v1803_v57 }
 0x6fe   : > { %v1808_v0 = vsel %vm1807_vm3, %v2157_v17, %v1804_v63 }
 0x6ff   : > { %v1813_v3 = vsel %vm1810_vm4, %v1812_v41, %v1808_v0 }
 0x700   : > { %1852 = vperm.xlu1 %2094, %v1813_v3  }
 0x722   : > { %v1818_v7 = vpop.permute.xlu2 %1817 }
 0x723   : > { %v1855_v11 = vmul.f32 %v1818_v7, %v2839_v60  ;;  %v622_v60 = vpop.permute.xlu0 %621 }
 0x725   : > { %v1863_v14 = vadd.f32 %v1855_v11, %v731_v9 }
 0x727   : > { %1871 = vst [vmem:[%s2964_s23] sm:$0xff] %v1863_v14 }
 0x73a   : > { %v1833_v48 = vpop.permute.xlu2 %1832 }
 0x73b   : > { %v1858_v38 = vmul.f32 %v1833_v48, %v2833_v58 }
 0x73d   : > { %v1866_v24 = vadd.f32 %v1858_v38, %v740_v35 }
 0x73f   : > { %1874 = vst [vmem:[%s2964_s23 + $0x18] sm:$0xff] %v1866_v24 }
 0x742   : > { %v1823_v19 = vpop.permute.xlu1 %1822 }
 0x743   : > { %v1856_v42 = vmul.f32 %v1823_v19, %v2823_v30 }
 0x745   : > { %v1864_v20 = vadd.f32 %v1856_v42, %v734_v36 }
 0x747   : > { %1872 = vst [vmem:[%s2964_s23 + $0x8] sm:$0xff] %v1864_v20 }
 0x74a   : > { %v1828_v43 = vpop.permute.xlu0 %1827 }
 0x74b   : > { %v1857_v52 = vmul.f32 %v1828_v43, %v2829_v44 }
 0x74d   : > { %v1865_v27 = vadd.f32 %v1857_v52, %v737_v21 }
 0x74f   : > { %1873 = vst [vmem:[%s2964_s23 + $0x10] sm:$0xff] %v1865_v27 }
 0x752   : > { %v1848_v58 = vpop.permute.xlu2 %1847 }
 0x753   : > { %v1861_v25 = vmul.f32 %v1848_v58, %v2821_v18 }
 0x755   : > { %v1869_v13 = vadd.f32 %v1861_v25, %v749_v22 }
 0x757   : > { %1877 = vst [vmem:[%s2964_s23 + $0x30] sm:$0xff] %v1869_v13 }
 0x75a   : > { %v1838_v30 = vpop.permute.xlu1 %1837 }
 0x75b   : > { %v1859_v51 = vmul.f32 %v1838_v30, %v2815_v62  ;;  %v752_v62 = vadd.f32 %v2462_v33, %v622_v60 }
 0x75d   : > { %v1867_v26 = vadd.f32 %v1859_v51, %v743_v50 }
 0x75f   : > { %1875 = vst [vmem:[%s2964_s23 + $0x20] sm:$0xff] %v1867_v26 }
 0x762   : > { %v1843_v44 = vpop.permute.xlu0 %1842 }
 0x763   : > { %v1860_v46 = vmul.f32 %v1843_v44, %v2818_v8 }
 0x765   : > { %v1868_v31 = vadd.f32 %v1860_v46, %v746_v53 }
 0x767   : > { %1876 = vst [vmem:[%s2964_s23 + $0x28] sm:$0xff] %v1868_v31 }
 0x772   : > { %v1853_v28 = vpop.permute.xlu1 %1852 }
 0x773   : > { %v1862_v18 = vmul.f32 %v1853_v28, %v2827_v15 }
 0x775   : > { %v1870_v29 = vadd.f32 %v1862_v18, %v752_v62 }
 0x777   : > { %1878 = vst [vmem:[%s2964_s23 + $0x38] sm:$0xff] %v1870_v29 }
 0x778   : > { %2185 = shalt.err (!%p2182_p3)
}
 0x779   : > { %s2225_s24 = smov 128   ;;  %s2226_s23 = smov 8  }
 0x77a   : > { %2049 = dma.vmem_to_hbm [thread:$0]  (%p2355_p5), %s1893_s22, 1024, %s1895_s30, %s1880_s18, %s2225_s24, %s2225_s24, %s2226_s23  }
 0x77b PF: > { %s3070_s21 = sld [smem:[#allocation9_spill]] }
 0x77c   : > { %s3071_s2 = sld [smem:[#allocation7_spill]] }
 0x781   : > { %p2055_p4 = scmp.ge.s32.totalorder %s3070_s21, 2 }
 0x782   : > { %s1909_s19 = sand.u32 1, %s3071_s2  }
 0x783   : > { %p2052_p7 = pnand %p2055_p4, %p2359_p6  ;;  %s1910_s20 = scalar_lea.sflag [#allocation5], %s1909_s19 }
 0x785   : > { %p2053_p8 = pneg %p2052_p7 }
 0x787   : > { %2203 = dma.done.wait (%p2053_p8), %s1910_s20, 1024  }
 0x788   : > { %2205 = vsyncadd (%p2053_p8), %s1910_s20, 4294966272  ;;  %s3073_s27 = sld [smem:[#allocation10_spill]]  ;;  %s3076_s24 = smov %s2212_s25 }
 0x789   : > { %s3074_s26 = sld [smem:[#allocation8_spill]] }
 0x78a   : > { %s3075_s28 = sld [smem:[#allocation11_spill]] }
 0x78e   : > { %p27_p9 = scmp.ge.s32.totalorder %s3073_s27, 4  }
 0x78f   : > { %s3077_s25 = smov %s3074_s26 }
 0x790   : > { %s3078_s26 = smov %s3075_s28  ;;  %29 = sbr.rel (!%p27_p9) target bundleno = 8 (0x8), region = 131 }
 0x795   :  { %1916 = vsyncpa [#allocation5], 1 }
 0x796   :  { %1918 = vsyncpa [#allocation5 + $0x1], 1 }

// kernel: tpu_custom_call.1
= control target key start
LH: loop header
LB: loop body
LE: loop exit
PB: predicated region body
PF: predicated region fallthrough
CT: control target
= control target key end

     0   :  { %s3022_s0 = inlined_call_operand.vmem [shape: f32[2,16,128], index: 0, kind: input, shape index: {}]   ;;  %s3023_s1 = inlined_call_operand.vmem [shape: f32[128,16], index: 1, kind: input, shape index: {}]   ;;  %s3024_s2 = inlined_call_operand.vmem [shape: f32[128,1], index: 2, kind: input, shape index: {}]   ;;  %s3025_s3 = inlined_call_operand.vmem [shape: f32[64,1], index: 3, kind: input, shape index: {}]   ;;  %s3026_s4 = inlined_call_operand.vmem [shape: f32[64,1], index: 4, kind: input, shape index: {}]   ;;  %s3027_s5 = inlined_call_operand.vmem [shape: f32[3,16,48], index: 5, kind: input, shape index: {}]   ;;  %s3028_s6 = inlined_call_operand.vmem [shape: f32[3,16,1], index: 6, kind: input, shape index: {}]   ;;  %s3029_s7 = inlined_call_operand.vmem [shape: f32[3,16,1], index: 7, kind: input, shape index: {}]   ;;  %s3030_s8 = inlined_call_operand.vmem [shape: f32[3,16,1], index: 8, kind: input, shape index: {}]   ;;  %s3031_s9 = inlined_call_operand.vmem [shape: f32[64,64], index: 9, kind: input, shape index: {}]   ;;  %s3032_s10 = inlined_call_operand.vmem [shape: f32[64,1], index: 10, kind: input, shape index: {}]   ;;  %s3033_s11 = inlined_call_operand.vmem [shape: f32[64,1], index: 11, kind: input, shape index: {}]   ;;  %s3034_s12 = inlined_call_operand.vmem [shape: f32[64,1], index: 12, kind: input, shape index: {}]   ;;  %s3035_s13 = inlined_call_operand.vmem [shape: f32[32,64], index: 13, kind: input, shape index: {}]   ;;  %s3036_s14 = inlined_call_operand.vmem [shape: f32[32,1], index: 14, kind: input, shape index: {}]   ;;  %s3037_s15 = inlined_call_operand.vmem [shape: f32[64,32], index: 15, kind: input, shape index: {}]   ;;  %s3038_s16 = inlined_call_operand.vmem [shape: f32[64,1], index: 16, kind: input, shape index: {}]   ;;  %s3039_s17 = inlined_call_operand.hbm [shape: f32[2,64,128], index: 17, kind: output, shape index: {}]  }
   0x1   :  { %3052 = sst [smem:[#allocation13_spill]] %s3022_s0 }
   0x2   :  { %3053 = sst [smem:[#allocation14_spill]] %s3023_s1 }
   0x3   :  { %3054 = sst [smem:[#allocation15_spill]] %s3024_s2 }
   0x4   :  { %3055 = sst [smem:[#allocation16_spill]] %s3025_s3 }
   0x5   :  { %22 = vsyncpa [#allocation5], 0 }
   0x6   :  { %24 = vsyncpa [#allocation5 + $0x1], 0  ;;  %s2317_s24 = smov 0   ;;  %s2319_s25 = smov 0  }
   0x7   :  { %s2321_s26 = smov 0   ;;  %s2323_s27 = smov 0  }
   0x8 LB: > { %3056 = sst [smem:[#allocation7_spill]] %s2208_s24  ;;  %s2338_s28 = sadd.s32 4294967295, %s2220_s27   ;;  %s2220_s27 = sphi %s2323_s27, %s3073_s27   ;;  %s2216_s26 = sphi %s2321_s26, %s3078_s26   ;;  %s2212_s25 = sphi %s2319_s25, %s3077_s25   ;;  %s2208_s24 = sphi %s2317_s24, %s3076_s24  }
   0x9   : > { %3057 = sst [smem:[#allocation8_spill]] %s2216_s26  ;;  %s1957_s29 = sadd.s32 4294967294, %s2220_s27  }
   0xa   : > { %3058 = sst [smem:[#allocation9_spill]] %s2220_s27  ;;  %s2342_s0 = sadd.s32 1, %s2220_s27  }
   0xb   : > { %3059 = sst [smem:[#allocation10_spill]] %s2342_s0  ;;  %s399_s30 = sadd.s32 1, %s2216_s26 }
   0xc   : > { %s396_s18 = ssub.s32 %s2220_s27, %s2342_s0  ;;  %p409_p0 = scmp.ne.s32.totalorder %s2216_s26, %s2212_s25 }
   0xd   : > { %p397_p1 = scmp.eq.s32.totalorder %s396_s18, 0  ;;  %p410_p2 = scmp.eq.s32.totalorder %s2338_s28, 1 }
   0xe   : > { %p415_p3 = scmp.ne.s32.totalorder %s2212_s25, %s2208_s24  ;;  %p416_p4 = scmp.eq.s32.totalorder %s1957_s29, 1 }
   0xf   : > { %s2353_s19 = scalar_select %p397_p1, %s2216_s26, %s399_s30  }
  0x10   : > { %p2355_p5 = por %p410_p2, %p409_p0  ;;  %p2359_p6 = por %p416_p4, %p415_p3 }
  0x11   : > { %3060 = sst [smem:[#allocation11_spill]] %s2353_s19  ;;  %p1960_p7 = scmp.ge.s32.totalorder %s2220_s27, 1 }
  0x12   : > { %s3062_s20 = scalar_select %p2359_p6, 1, 0 }
  0x13   : > { %p490_p8 = scmp.lt.s32.totalorder %s2220_s27, 3 }
  0x14   : > { %3063 = sst [smem:[#allocation12_spill]] %s3062_s20 }
  0x15   : > { %p491_p9 = pnand %p1960_p7, %p490_p8 }
  0x16   : > { %p542_p10 = scmp.lt.s32.totalorder (!%p491_p9), %s2338_s28, 1  ;;  %s3064_s30 = sld [smem:[#allocation13_spill]] (!%p491_p9) }
  0x17   : > { %494 = sbr.rel (%p491_p9) target bundleno = 1915 (0x77b), region = 88  ;;  %s3065_s0 = sld [smem:[#allocation14_spill]] (!%p491_p9) }
  0x18   : > { %s3066_s2 = sld [smem:[#allocation15_spill]] (!%p491_p9)  ;;  %s3048_s24 = smov (!%p491_p9), 2  }
  0x19   : > { %s3067_s3 = sld [smem:[#allocation16_spill]] (!%p491_p9)  ;;  %s3046_s20 = smov (!%p491_p9), 126  }
  0x1a   : > { %s2036_s29 = sshll.u32 (!%p491_p9), %s2338_s28, 6 }
  0x1c   : > { %s543_s21 = scalar_select %p542_p10, %s2338_s28, 1  ;;  %vm664_vm0 = vcmask 130048   ;;  %v2222_v6 = vmov 0   ;;  %v843_v9 = vld [vmem:[%s3026_s4 + $0x8] sm:$0xff]  ;;  %v842_v13 = vld [vmem:[%s3026_s4] sm:$0xff]  ;;  %v549_v43 = vlaneseq  ;;  %v845_v61 = vld [vmem:[%s3026_s4 + $0x18] sm:$0xff] }
  0x1d   : > { %v552_v2 = vld [vmem:[%s3065_s0] sm:$0xff]  ;;  %v553_v3 = vld [vmem:[%s3065_s0 + $0x8] sm:$0xff]  ;;  %v554_v4 = vld [vmem:[%s3065_s0 + $0x10] sm:$0xff]  ;;  %2095 = vset.pattern.permute.xlu2 %v2222_v6  ;;  %2093 = vset.pattern.permute.xlu0 %v2222_v6  ;;  %vm942_vm2 = vcmask 392192   ;;  %vm1278_vm3 = vcmask 523264   ;;  %vm1597_vm4 = vcmask 261120  }
  0x1e   : > { %s2035_s22 = sshll.u32 %s543_s21, 4  ;;  %v555_v5 = vld [vmem:[%s3065_s0 + $0x18] sm:$0xff]  ;;  %2094 = vset.pattern.permute.xlu1 %v2222_v6  ;;  %v556_v7 = vld [vmem:[%s3065_s0 + $0x20] sm:$0xff]  ;;  %v577_v10 = vld [vmem:[%s3066_s2 + $0x48] sm:$0xff]  ;;  %857 = vperm.xlu2 %2095, %v843_v9   ;;  %v2472_v47 = vand.u32 127, %v549_v43  ;;  %s1891_s21 = scalar_lea.hbm %s3039_s17, %s2036_s29 }
  0x1f   : > { %s546_s18 = scalar_lea.vmem %s3064_s30, %s2035_s22  ;;  %v563_v8 = vld [vmem:[%s3065_s0 + $0x58] sm:$0xff]  ;;  %v787_v11 = vld [vmem:[%s3067_s3 + $0x8] sm:$0xff]  ;;  %631 = vperm.xlu0 %2093, %v577_v10   ;;  %v576_v14 = vld [vmem:[%s3066_s2 + $0x40] sm:$0xff]  ;;  %s3068_s30 = smov 2  }
  0x20   : > { %v548_v0 = vld [vmem:[%s546_s18 + $0x8] sm:$0xff]  ;;  %v547_v1 = vld [vmem:[%s546_s18] sm:$0xff]  ;;  %801 = vperm.xlu1 %2094, %v787_v11   ;;  %v558_v16 = vld [vmem:[%s3065_s0 + $0x30] sm:$0xff]  ;;  %vm551_vm1 = vcmp.lt.s32.totalorder %v2472_v47, 40  ;;  %s3069_s18 = smov 126   ;;  %s2178_s29 = scalar_lea.hbm %s3039_s17, 128 }
  0x21   : > { %727 = vmatpush.msra.mxu0 %v548_v0  ;;  %2047 = vmatpush.msra.mxu2 %v548_v0  ;;  %v557_v12 = vld [vmem:[%s3065_s0 + $0x28] sm:$0xff]  ;;  %v786_v15 = vld [vmem:[%s3067_s3] sm:$0xff]  ;;  %v579_v17 = vld [vmem:[%s3066_s2 + $0x58] sm:$0xff] }
  0x22   : > { %v559_v18 = vld [vmem:[%s3065_s0 + $0x38] sm:$0xff]  ;;  %v930_v19 = vld [vmem:[%s3028_s6] sm:$0xff]  ;;  %v788_v21 = vld [vmem:[%s3067_s3 + $0x10] sm:$0xff] }
  0x23   : > { %728 = vmatpush.msra.mxu0 %v547_v1  ;;  %2048 = vmatpush.msra.mxu2 %v547_v1  ;;  %v560_v20 = vld [vmem:[%s3065_s0 + $0x40] sm:$0xff]  ;;  %v561_v22 = vld [vmem:[%s3065_s0 + $0x48] sm:$0xff]  ;;  %v562_v30 = vld [vmem:[%s3065_s0 + $0x50] sm:$0xff] }
  0x24   : > { %1964 = vmatmul.msk.f32.vlgmr.msra.gmra.mxu0 %vm664_vm0, %v552_v2  ;;  %1975 = vmatmul.msk.f32.vlgmr.msra.gmra.mxu2 %vm664_vm0, %v563_v8  ;;  %v989_v23 = vld [vmem:[%s3030_s8 + $0x8] sm:$0xff]  ;;  %v564_v35 = vld [vmem:[%s3065_s0 + $0x60] sm:$0xff]  ;;  %v578_v56 = vld [vmem:[%s3066_s2 + $0x50] sm:$0xff] }
  0x25   : > { %v565_v40 = vld [vmem:[%s3065_s0 + $0x68] sm:$0xff]  ;;  %v789_v59 = vld [vmem:[%s3067_s3 + $0x18] sm:$0xff]  ;;  %v974_v60 = vld [vmem:[%s3029_s7] sm:$0xff] }
  0x26   : > { %852 = vperm.xlu2 %2095, %v842_v13   ;;  %v931_v57 = vld [vmem:[%s3028_s6 + $0x8] sm:$0xff]  ;;  %v988_v62 = vld [vmem:[%s3030_s8] sm:$0xff]  ;;  %v844_v63 = vld [vmem:[%s3026_s4 + $0x10] sm:$0xff] }
  0x27   : > { %626 = vperm.xlu0 %2093, %v576_v14   ;;  %v975_v58 = vld [vmem:[%s3029_s7 + $0x8] sm:$0xff]  ;;  %v1984_v1 = vld [vmem:[%s3028_s6 + $0x10] sm:$0xff]  ;;  %v790_v2 = vld [vmem:[%s3067_s3 + $0x20] sm:$0xff] }
  0x28   : > { %796 = vperm.xlu1 %2094, %v786_v15   ;;  %v581_v0 = vld [vmem:[%s3066_s2 + $0x68] sm:$0xff]  ;;  %v922_v10 = vld [vmem:[%s3027_s5] sm:$0xff] }
  0x29   : > { %v923_v11 = vld [vmem:[%s3027_s5 + $0x8] sm:$0xff]  ;;  %v1218_v47 = vld [vmem:[%s3031_s9 + $0x20] sm:$0xff] }
  0x2c   : > { %1965 = vmatmul.msk.f32.gmra.mxu0 %vm664_vm0, %v553_v3  ;;  %1976 = vmatmul.msk.f32.gmra.mxu2 %vm664_vm0, %v564_v35  ;;  %v1991_v3 = vld [vmem:[%s3030_s8 + $0x18] sm:$0xff] }
  0x2e   : > { %641 = vperm.xlu2 %2095, %v579_v17  }
  0x34   : > { %1966 = vmatmul.msk.f32.gmra.mxu0 %vm664_vm0, %v554_v4  ;;  %1977 = vmatmul.msk.f32.gmra.mxu2 %vm664_vm0, %v565_v40 }
  0x36   : > { %934 = vperm.xlu2 %2095, %v930_v19  }
  0x3c   : > { %1967 = vmatmul.msk.f32.gmra.mxu0 %vm664_vm0, %v555_v5 }
  0x3e   : > { %806 = vperm.xlu2 %2095, %v788_v21  }
  0x44   : > { %1968 = vmatmul.msk.f32.gmra.mxu0 %vm664_vm0, %v556_v7 }
  0x46   : > { %997 = vperm.xlu2 %2095, %v989_v23  }
  0x4c   : > { %1969 = vmatmul.msk.f32.gmra.mxu0 %vm664_vm0, %v557_v12 }
  0x54   : > { %1970 = vmatmul.msk.f32.gmra.mxu0 %vm664_vm0, %v558_v16 }
  0x5c   : > { %1971 = vmatmul.msk.f32.gmra.mxu0 %vm664_vm0, %v559_v18  ;;  %v566_v18 = vld [vmem:[%s3065_s0 + $0x70] sm:$0xff] }
  0x5d   : > { %1978 = vmatmul.msk.f32.gmra.mxu2 %vm664_vm0, %v566_v18 }
  0x64   : > { %1972 = vmatmul.msk.f32.gmra.mxu0 %vm664_vm0, %v560_v20 }
  0x6c   : > { %1973 = vmatmul.msk.f32.gmra.mxu0 %vm664_vm0, %v561_v22 }
  0x74   : > { %1974 = vmatmul.msk.f32.gmra.mxu0 %vm664_vm0, %v562_v30 }
  0x78   : > { %v858_v39 = vpop.permute.xlu2 %857 }
  0x80   : > { %v853_v49 = vpop.permute.xlu2 %852 }
  0x88   : > { %v642_v14 = vpop.permute.xlu2 %641 }
  0x90   : > { %v935_v17 = vpop.permute.xlu2 %934 }
  0x91   : > { %v632_v32 = vpop.permute.xlu0 %631 }
  0x92   : > { %v802_v34 = vpop.permute.xlu1 %801 }
  0x98   : > { %v807_v35 = vpop.permute.xlu2 %806 }
  0x99   : > { %v627_v36 = vpop.permute.xlu0 %626 }
  0x9a   : > { %v797_v42 = vpop.permute.xlu1 %796 }
  0xa1   : > { %v2444_v24 = vpop.f32.mrf.mxu0 }
  0xa7   : > { %v763_v30 = vpop.f32.mrf.mxu2 }
  0xa9   : > { %v2446_v25 = vpop.f32.mrf.mxu0 }
  0xb1   : > { %v2448_v26 = vpop.f32.mrf.mxu0 }
  0xb9   : > { %v2450_v27 = vpop.f32.mrf.mxu0 }
  0xc1   : > { %v2452_v28 = vpop.f32.mrf.mxu0 }
  0xc9   : > { %v2454_v29 = vpop.f32.mrf.mxu0 }
  0xd1   : > { %v2459_v31 = vpop.f32.mrf.mxu0 }
  0xd9   : > { %v2462_v33 = vpop.f32.mrf.mxu0 }
  0xe1   : > { %v754_v37 = vpop.f32.mrf.mxu0 }
  0xe2   : > { %v755_v38 = vadd.f32 %v754_v37, %v627_v36  ;;  %v764_v36 = vadd.f32 %v763_v30, %v642_v14  ;;  %v567_v37 = vld [vmem:[%s3065_s0 + $0x78] sm:$0xff]  ;;  %v1994_v14 = vld [vmem:[%s3028_s6 + $0x20] sm:$0xff] }
  0xe3   : > { %1979 = vmatmul.msk.f32.gmra.mxu2 %vm664_vm0, %v567_v37  ;;  %v766_v37 = vpop.f32.mrf.mxu2 }
  0xe4   : > { %v778_v41 = vmax.f32 %v755_v38, 0.0 }
  0xe6   : > { %v834_v45 = vmul.f32 %v797_v42, %v778_v41  ;;  %v781_v41 = vmax.f32 %v764_v36, 0.0  ;;  %v1983_v36 = vld [vmem:[%s3027_s5 + $0x18] sm:$0xff] }
  0xe8   : > { %v890_v50 = vadd.f32 %v853_v49, %v834_v45 }
  0xe9   : > { %v757_v44 = vpop.f32.mrf.mxu0 }
  0xea   : > { %v758_v46 = vadd.f32 %v757_v44, %v632_v32  ;;  %v900_v53 = vsel %vm551_vm1, %v890_v50, 0.0 }
  0xec   : > { %v779_v48 = vmax.f32 %v758_v46, 0.0 }
  0xee   : > { %v835_v51 = vmul.f32 %v802_v34, %v779_v48 }
  0xf0   : > { %v891_v52 = vadd.f32 %v858_v39, %v835_v51 }
  0xf1   : > { %v760_v19 = vpop.f32.mrf.mxu0 }
  0xf2   : > { %v901_v54 = vsel %vm551_vm1, %v891_v52, 0.0 }
  0xf3   : > { %v2101_v55 = vpack.i.bf16 %v900_v53, %v901_v54  ;;  %v998_v53 = vpop.permute.xlu2 %997 }
  0xf5   : > { %2102 = vrot.lane.b32.xlu1 %v2101_v55, %s3048_s24  ;;  %2097 = vrot.lane.b32.xlu0 %v2101_v55, %s3046_s20  ;;  %s539_s24 = sand.u32 1, %s2212_s25  }
  0xf6   : > { %s1961_s20 = sshll.u32 %s539_s24, 6 }
  0xf7   : > { %s2964_s23 = scalar_lea.vmem [#allocation4], %s1961_s20 }
  0xf8   : > { %s1892_s22 = sshll.u32 %s2964_s23, 4  ;;  %s1893_s22 = int_to_ptr.vmem [resolvable:$true] %s1892_s22 }
  0xfd   : > { %636 = vperm.xlu1 %2094, %v578_v56   ;;  %939 = vperm.xlu0 %2093, %v931_v57  }
 0x105   : > { %983 = vperm.xlu1 %2094, %v975_v58   ;;  %811 = vperm.xlu0 %2093, %v789_v59  }
 0x10d   : > { %978 = vperm.xlu1 %2094, %v974_v60   ;;  %867 = vperm.xlu0 %2093, %v845_v61  }
 0x115   : > { %992 = vperm.xlu1 %2094, %v988_v62   ;;  %862 = vperm.xlu0 %2093, %v844_v63   ;;  %v580_v62 = vld [vmem:[%s3066_s2 + $0x60] sm:$0xff]  ;;  %v1985_v63 = vld [vmem:[%s3028_s6 + $0x18] sm:$0xff] }
 0x11d   : > { %651 = vperm.xlu1 %2094, %v581_v0   ;;  %v1989_v0 = vld [vmem:[%s3029_s7 + $0x18] sm:$0xff] }
 0x125   : > { %1036 = vperm.xlu1 %2094, %v1984_v1   ;;  %v791_v1 = vld [vmem:[%s3067_s3 + $0x28] sm:$0xff] }
 0x12d   : > { %816 = vperm.xlu1 %2094, %v790_v2   ;;  %v1988_v2 = vld [vmem:[%s3029_s7 + $0x10] sm:$0xff] }
 0x135   : > { %1100 = vperm.xlu1 %2094, %v1991_v3   ;;  %v847_v3 = vld [vmem:[%s3026_s4 + $0x28] sm:$0xff] }
 0x167   : > { %v2098_v4 = vpop.permute.xlu0 %2097  ;;  %v2103_v7 = vpop.permute.xlu1 %2102 }
 0x168   : > { %v2099_v5 = vunpack.i.l.bf16 %v2098_v4  ;;  %v2100_v6 = vunpack.i.h.bf16 %v2098_v4  ;;  %v2104_v8 = vunpack.i.l.bf16 %v2103_v7  ;;  %v2105_v9 = vunpack.i.h.bf16 %v2103_v7  ;;  %v1990_v4 = vld [vmem:[%s3030_s8 + $0x10] sm:$0xff]  ;;  %v583_v7 = vld [vmem:[%s3066_s2 + $0x78] sm:$0xff] }
 0x16a   : > { %959 = vmatpush.msra.mxu1 %v2099_v5  ;;  %v846_v5 = vld [vmem:[%s3026_s4 + $0x20] sm:$0xff] }
 0x16c   : > { %960 = vmatpush.msra.mxu1 %v2100_v6  ;;  %v1237_v6 = vld [vmem:[%s3032_s10 + $0x38] sm:$0xff] }
 0x16e   : > { %2037 = vmatpush.msk.msra.mxu1 %vm551_vm1, %v891_v52 }
 0x16f   : > { %v637_v12 = vpop.permute.xlu1 %636  ;;  %v940_v13 = vpop.permute.xlu0 %939 }
 0x170   : > { %2038 = vmatpush.msk.msra.mxu1 %vm551_vm1, %v890_v50  ;;  %v761_v32 = vadd.f32 %v760_v19, %v637_v12  ;;  %v1415_v12 = vld [vmem:[%s3034_s12 + $0x38] sm:$0xff]  ;;  %v2603_v19 = vld [vmem:[%s3034_s12 + $0x30] sm:$0xff] }
 0x172   : > { %963 = vmatpush.msra.mxu1 %v2104_v8  ;;  %v780_v38 = vmax.f32 %v761_v32, 0.0  ;;  %v1471_v8 = vmax.f32 %v1237_v6, 0.0  ;;  %v2621_v32 = vld [vmem:[%s3034_s12 + $0x18] sm:$0xff] }
 0x174   : > { %964 = vmatpush.msra.mxu1 %v2105_v9  ;;  %v836_v46 = vmul.f32 %v807_v35, %v780_v38  ;;  %v1359_v9 = vld [vmem:[%s3033_s11 + $0x38] sm:$0xff]  ;;  %v2631_v35 = vld [vmem:[%s3033_s11] sm:$0xff]  ;;  %v769_v38 = vpop.f32.mrf.mxu2 }
 0x175   : > { %1980 = vmatmul.msk.f32.vlgmr.msra.gmra.mxu1 %vm942_vm2, %v922_v10  ;;  %v1479_v10 = vmul.f32 %v1471_v8, %v1359_v9 }
 0x177   : > { %v984_v15 = vpop.permute.xlu1 %983  ;;  %v812_v16 = vpop.permute.xlu0 %811 }
 0x178   : > { %v837_v45 = vmul.f32 %v812_v16, %v781_v41 }
 0x17c   : > { %v2638_v41 = vpop.f32.mrf.mxu2 }
 0x17d   : > { %1981 = vmatmul.msk.f32.gmra.mxu1 %vm942_vm2, %v923_v11  ;;  %v1995_v11 = vld [vmem:[%s3028_s6 + $0x28] sm:$0xff] }
 0x17f   : > { %v979_v20 = vpop.permute.xlu1 %978  ;;  %v868_v21 = vpop.permute.xlu0 %867 }
 0x180   : > { %v893_v50 = vadd.f32 %v868_v21, %v837_v45  ;;  %v2615_v21 = vld [vmem:[%s3034_s12 + $0x20] sm:$0xff] }
 0x182   : > { %v903_v56 = vsel %vm551_vm1, %v893_v50, 0.0 }
 0x184   : > { %v2640_v45 = vpop.f32.mrf.mxu2 }
 0x187   : > { %v993_v43 = vpop.permute.xlu1 %992  ;;  %v863_v44 = vpop.permute.xlu0 %862 }
 0x188   : > { %v892_v51 = vadd.f32 %v863_v44, %v836_v46 }
 0x18a   : > { %v902_v57 = vsel %vm551_vm1, %v892_v51, 0.0 }
 0x1f2   : > { %v966_v22 = vpop.f32.mrf.mxu1 }
 0x1f3   : > { %v967_v23 = vadd.f32 %v966_v22, %v935_v17 }
 0x1f5   : > { %v972_v34 = vmax.f32 %v967_v23, 0.0 }
 0x1f7   : > { %v986_v39 = vmul.f32 %v979_v20, %v972_v34  ;;  %v2609_v20 = vld [vmem:[%s3034_s12 + $0x28] sm:$0xff]  ;;  %v1982_v34 = vld [vmem:[%s3027_s5 + $0x10] sm:$0xff] }
 0x1f9   : > { %v2537_v48 = vadd.f32 %v993_v43, %v986_v39 }
 0x1fa   : > { %v969_v40 = vpop.f32.mrf.mxu1 }
 0x1fb   : > { %v970_v42 = vadd.f32 %v969_v40, %v940_v13  ;;  %v1002_v54 = vsel %vm551_vm1, %v2537_v48, 0.0  ;;  %v2592_v13 = vadd.f32 %v1479_v10, %v1415_v12 }
 0x1fc   : > { %v1006_v59 = vadd.f32 %v1002_v54, %v902_v57 }
 0x1fd   : > { %v973_v49 = vmax.f32 %v970_v42, 0.0  ;;  %v652_v42 = vpop.permute.xlu1 %651 }
 0x1fe   : > { %v770_v57 = vadd.f32 %v769_v38, %v652_v42  ;;  %v849_v38 = vld [vmem:[%s3026_s4 + $0x38] sm:$0xff]  ;;  %v1357_v42 = vld [vmem:[%s3033_s11 + $0x28] sm:$0xff] }
 0x1ff   : > { %v987_v52 = vmul.f32 %v984_v15, %v973_v49  ;;  %v1998_v15 = vld [vmem:[%s3029_s7 + $0x20] sm:$0xff] }
 0x201   : > { %v2542_v55 = vadd.f32 %v998_v53, %v987_v52 }
 0x203   : > { %v1003_v58 = vsel %vm551_vm1, %v2542_v55, 0.0 }
 0x204   : > { %v1007_v60 = vadd.f32 %v1003_v58, %v903_v56 }
 0x205   : > { %v1037_v46 = vpop.permute.xlu1 %1036 }
 0x206   : > { %v2111_v61 = vpack.i.bf16 %v1006_v59, %v1007_v60 }
 0x208   : > { %2112 = vrot.lane.b32.xlu0 %v2111_v61, %s3068_s30  ;;  %2107 = vrot.lane.b32.xlu2 %v2111_v61, %s3069_s18  ;;  %v783_v61 = vmax.f32 %v770_v57, 0.0 }
 0x20d   : > { %v817_v56 = vpop.permute.xlu1 %816 }
 0x210   : > { %646 = vperm.xlu0 %2093, %v580_v62   ;;  %1041 = vperm.xlu2 %2095, %v1985_v63  }
 0x215   : > { %v1101_v8 = vpop.permute.xlu1 %1100 }
 0x218   : > { %1085 = vperm.xlu0 %2093, %v1989_v0   ;;  %821 = vperm.xlu2 %2095, %v791_v1  }
 0x220   : > { %1080 = vperm.xlu0 %2093, %v1988_v2   ;;  %877 = vperm.xlu2 %2095, %v847_v3  }
 0x228   : > { %1095 = vperm.xlu0 %2093, %v1990_v4   ;;  %872 = vperm.xlu2 %2095, %v846_v5  }
 0x230   : > { %661 = vperm.xlu0 %2093, %v583_v7  }
 0x238   : > { %1144 = vperm.xlu0 %2093, %v1995_v11  }
 0x240   : > { %1139 = vperm.xlu0 %2093, %v1994_v14  }
 0x248   : > { %1183 = vperm.xlu0 %2093, %v1998_v15  }
 0x250   : > { %1275 = vperm.xlu0 %2093, %v1237_v6  }
 0x258   : > { %1397 = vperm.xlu0 %2093, %v1359_v9  }
 0x260   : > { %1453 = vperm.xlu0 %2093, %v1415_v12  }
 0x262   : > { %v2108_v16 = vpop.permute.xlu2 %2107 }
 0x263   : > { %v2109_v17 = vunpack.i.l.bf16 %v2108_v16  ;;  %v2110_v18 = vunpack.i.h.bf16 %v2108_v16 }
 0x265   : > { %1060 = vmatpush.msrb.mxu2 %v2109_v17 }
 0x267   : > { %1061 = vmatpush.msrb.mxu2 %v2110_v18  ;;  %v793_v18 = vld [vmem:[%s3067_s3 + $0x38] sm:$0xff] }
 0x268   : > { %1448 = vperm.xlu0 %2093, %v2603_v19  }
 0x269   : > { %1062 = vmatpush.msrb.mxu2 %v1007_v60 }
 0x26a   : > { %v1042_v40 = vpop.permute.xlu2 %1041 }
 0x26b   : > { %1063 = vmatpush.msrb.mxu2 %v1006_v59 }
 0x270   : > { %1443 = vperm.xlu0 %2093, %v2609_v20  }
 0x272   : > { %v822_v44 = vpop.permute.xlu2 %821 }
 0x273   : > { %v839_v1 = vmul.f32 %v822_v44, %v783_v61  ;;  %v1234_v44 = vld [vmem:[%s3032_s10 + $0x20] sm:$0xff] }
 0x278   : > { %1438 = vperm.xlu0 %2093, %v2615_v21  }
 0x27a   : > { %v2113_v22 = vpop.permute.xlu0 %2112  ;;  %v878_v53 = vpop.permute.xlu2 %877 }
 0x27b   : > { %v2114_v23 = vunpack.i.l.bf16 %v2113_v22  ;;  %v2115_v30 = vunpack.i.h.bf16 %v2113_v22  ;;  %v895_v5 = vadd.f32 %v878_v53, %v839_v1  ;;  %v582_v22 = vld [vmem:[%s3066_s2 + $0x70] sm:$0xff]  ;;  %v1233_v53 = vld [vmem:[%s3032_s10 + $0x18] sm:$0xff] }
 0x27c   : > { %v1467_v57 = vmax.f32 %v1233_v53, 0.0 }
 0x27d   : > { %1064 = vmatpush.msrb.mxu2 %v2114_v23  ;;  %v905_v11 = vsel %vm551_vm1, %v895_v5, 0.0  ;;  %v1236_v23 = vld [vmem:[%s3032_s10 + $0x30] sm:$0xff]  ;;  %v1230_v5 = vld [vmem:[%s3032_s10] sm:$0xff] }
 0x27f   : > { %1065 = vmatpush.msrb.mxu2 %v2115_v30  ;;  %v1470_v30 = vmax.f32 %v1236_v23, 0.0 }
 0x280   : > { %1433 = vperm.xlu0 %2093, %v2621_v32   ;;  %1986 = vmatmul.msk.f32.vlgmr.msrb.gmra.mxu2 %vm942_vm2, %v1982_v34  ;;  %v1358_v34 = vld [vmem:[%s3033_s11 + $0x30] sm:$0xff] }
 0x282   : > { %v647_v39 = vpop.permute.xlu0 %646  ;;  %v873_v4 = vpop.permute.xlu2 %872 }
 0x283   : > { %v767_v51 = vadd.f32 %v766_v37, %v647_v39  ;;  %v1235_v37 = vld [vmem:[%s3032_s10 + $0x28] sm:$0xff]  ;;  %v792_v39 = vld [vmem:[%s3067_s3 + $0x30] sm:$0xff] }
 0x285   : > { %v782_v58 = vmax.f32 %v767_v51, 0.0  ;;  %v1356_v51 = vld [vmem:[%s3033_s11 + $0x20] sm:$0xff] }
 0x287   : > { %v838_v62 = vmul.f32 %v817_v56, %v782_v58  ;;  %v2001_v56 = vld [vmem:[%s3030_s8 + $0x28] sm:$0xff]  ;;  %v1355_v58 = vld [vmem:[%s3033_s11 + $0x18] sm:$0xff] }
 0x288   : > { %1362 = vperm.xlu0 %2093, %v2631_v35   ;;  %1987 = vmatmul.msk.f32.gmra.mxu2 %vm942_vm2, %v1983_v36  ;;  %v2676_v36 = vmul.f32 %v1470_v30, %v1358_v34 }
 0x289   : > { %v894_v6 = vadd.f32 %v873_v4, %v838_v62  ;;  %v1354_v62 = vld [vmem:[%s3033_s11 + $0x10] sm:$0xff] }
 0x28a   : > { %v1086_v43 = vpop.permute.xlu0 %1085 }
 0x28b   : > { %v904_v12 = vsel %vm551_vm1, %v894_v6, 0.0  ;;  %v1464_v6 = vmax.f32 %v1230_v5, 0.0 }
 0x292   : > { %v1081_v49 = vpop.permute.xlu0 %1080 }
 0x29a   : > { %v1096_v0 = vpop.permute.xlu0 %1095 }
 0x303   : > { %v1067_v50 = vpop.f32.mrf.mxu2 }
 0x304   : > { %v1068_v52 = vadd.f32 %v1067_v50, %v1037_v46  ;;  %v1999_v46 = vld [vmem:[%s3029_s7 + $0x28] sm:$0xff]  ;;  %v1468_v50 = vmax.f32 %v1234_v44, 0.0 }
 0x306   : > { %v1073_v54 = vmax.f32 %v1068_v52, 0.0  ;;  %v2704_v52 = vmul.f32 %v1468_v50, %v1356_v51 }
 0x308   : > { %v1088_v59 = vmul.f32 %v1081_v49, %v1073_v54  ;;  %v848_v49 = vld [vmem:[%s3026_s4 + $0x30] sm:$0xff]  ;;  %v2000_v54 = vld [vmem:[%s3030_s8 + $0x20] sm:$0xff] }
 0x30a   : > { %v2642_v2 = vadd.f32 %v1096_v0, %v1088_v59  ;;  %v2718_v59 = vmul.f32 %v1467_v57, %v1355_v58  ;;  %v1410_v0 = vld [vmem:[%s3034_s12 + $0x10] sm:$0xff] }
 0x30b   : > { %v1070_v60 = vpop.f32.mrf.mxu2 }
 0x30c   : > { %v1071_v63 = vadd.f32 %v1070_v60, %v1042_v40  ;;  %v1105_v9 = vsel %vm551_vm1, %v2642_v2, 0.0  ;;  %v1469_v40 = vmax.f32 %v1235_v37, 0.0  ;;  %v1232_v60 = vld [vmem:[%s3032_s10 + $0x10] sm:$0xff] }
 0x30d   : > { %v2656_v15 = vadd.f32 %v1105_v9, %v904_v12  ;;  %v1466_v61 = vmax.f32 %v1232_v60, 0.0  ;;  %v1472_v9 = vmul.f32 %v1464_v6, %v2631_v35 }
 0x30e   : > { %v1074_v3 = vmax.f32 %v1071_v63, 0.0 }
 0x30f   : > { %v1474_v63 = vmul.f32 %v1466_v61, %v1354_v62 }
 0x310   : > { %v1089_v7 = vmul.f32 %v1086_v43, %v1074_v3  ;;  %v2690_v43 = vmul.f32 %v1469_v40, %v1357_v42  ;;  %v1231_v3 = vld [vmem:[%s3032_s10 + $0x8] sm:$0xff] }
 0x311   : > { %v2729_v1 = vadd.f32 %v1474_v63, %v1410_v0  ;;  %v1465_v4 = vmax.f32 %v1231_v3, 0.0 }
 0x312   : > { %v2647_v10 = vadd.f32 %v1101_v8, %v1089_v7  ;;  %v1353_v7 = vld [vmem:[%s3033_s11 + $0x8] sm:$0xff] }
 0x313   : > { %v1473_v8 = vmul.f32 %v1465_v4, %v1353_v7 }
 0x314   : > { %v1106_v14 = vsel %vm551_vm1, %v2647_v10, 0.0 }
 0x315   : > { %v2658_v16 = vadd.f32 %v1106_v14, %v905_v11  ;;  %v1408_v11 = vld [vmem:[%s3034_s12] sm:$0xff]  ;;  %v1409_v14 = vld [vmem:[%s3034_s12 + $0x8] sm:$0xff] }
 0x316   : > { %v2744_v12 = vadd.f32 %v1472_v9, %v1408_v11 }
 0x317   : > { %v2121_v17 = vpack.i.bf16 %v2656_v15, %v2658_v16 }
 0x319   : > { %2122 = vrot.lane.b32.xlu2 %v2121_v17, %s3068_s30  ;;  %2117 = vrot.lane.b32.xlu1 %v2121_v17, %s3069_s18  ;;  %v2749_v17 = vadd.f32 %v1473_v8, %v1409_v14  ;;  %s1894_s30 = sshll.u32 %s1891_s21, 4  ;;  %s1880_s18 = scalar_lea.sflag [#allocation5], %s539_s24  ;;  %s1895_s30 = int_to_ptr.hbm [resolvable:$true] %s1894_s30 }
 0x31a   : > { %s2172_s26 = sshra.s32 %s1895_s30, 4  ;;  %s2173_s26 = int_to_ptr.hbm [resolvable:$true] %s2172_s26 }
 0x31b   : > { %s2174_s28 = scalar_lea.hbm %s2173_s26, 64  ;;  %p2179_p0 = scmp.lt.s32.totalorder %s2173_s26, %s3039_s17 }
 0x31c   : > { %p2175_p11 = scmp.ne.s32.totalorder %s2173_s26, %s2174_s28  ;;  %p2180_p1 = scmp.lt.s32.totalorder %s2178_s29, %s2174_s28 }
 0x31e   : > { %p2176_p12 = pnand %p2175_p11, %p2355_p5  ;;  %p2181_p2 = por %p2180_p1, %p2179_p0 }
 0x320   : > { %p2177_p13 = pneg %p2176_p12 }
 0x321   : > { %831 = vperm.xlu2 %2095, %v793_v18   ;;  %656 = vperm.xlu1 %2094, %v582_v22   ;;  %v662_v18 = vpop.permute.xlu0 %661 }
 0x322   : > { %p2182_p3 = pnand %p2181_p2, %p2177_p13 }
 0x329   : > { %887 = vperm.xlu2 %2095, %v849_v38   ;;  %826 = vperm.xlu1 %2094, %v792_v39   ;;  %v1145_v57 = vpop.permute.xlu0 %1144 }
 0x331   : > { %1188 = vperm.xlu2 %2095, %v1999_v46   ;;  %882 = vperm.xlu1 %2094, %v848_v49   ;;  %v1992_v49 = vld [vmem:[%s3027_s5 + $0x20] sm:$0xff] }
 0x339   : > { %1198 = vperm.xlu2 %2095, %v2000_v54   ;;  %1203 = vperm.xlu1 %2094, %v2001_v56  }
 0x341   : > { %1265 = vperm.xlu2 %2095, %v1235_v37   ;;  %1270 = vperm.xlu1 %2094, %v1236_v23   ;;  %v776_v23 = vadd.f32 %v2640_v45, %v662_v18  ;;  %v1221_v18 = vld [vmem:[%s3031_s9 + $0x38] sm:$0xff] }
 0x343   : > { %v785_v30 = vmax.f32 %v776_v23, 0.0 }
 0x349   : > { %1392 = vperm.xlu2 %2095, %v1358_v34   ;;  %1260 = vperm.xlu1 %2094, %v1234_v44  }
 0x351   : > { %1387 = vperm.xlu2 %2095, %v1357_v42   ;;  %1255 = vperm.xlu1 %2094, %v1233_v53  }
 0x359   : > { %1382 = vperm.xlu2 %2095, %v1356_v51   ;;  %1250 = vperm.xlu1 %2094, %v1232_v60   ;;  %v1140_v60 = vpop.permute.xlu0 %1139 }
 0x361   : > { %1377 = vperm.xlu2 %2095, %v1355_v58   ;;  %1245 = vperm.xlu1 %2094, %v1231_v3   ;;  %v1184_v4 = vpop.permute.xlu0 %1183 }
 0x369   : > { %1372 = vperm.xlu2 %2095, %v1354_v62   ;;  %1240 = vperm.xlu1 %2094, %v1230_v5   ;;  %v1276_v23 = vpop.permute.xlu0 %1275 }
 0x371   : > { %1428 = vperm.xlu2 %2095, %v1410_v0   ;;  %1367 = vperm.xlu1 %2094, %v1353_v7  }
 0x373   : > { %v2123_v35 = vpop.permute.xlu2 %2122 }
 0x374   : > { %v2124_v46 = vunpack.i.l.bf16 %v2123_v35  ;;  %v2125_v45 = vunpack.i.h.bf16 %v2123_v35  ;;  %v1220_v35 = vld [vmem:[%s3031_s9 + $0x30] sm:$0xff] }
 0x379   : > { %1418 = vperm.xlu2 %2095, %v1408_v11   ;;  %1423 = vperm.xlu1 %2094, %v1409_v14   ;;  %v1214_v14 = vld [vmem:[%s3031_s9] sm:$0xff] }
 0x37b   : > { %v832_v22 = vpop.permute.xlu2 %831 }
 0x37c   : > { %v841_v34 = vmul.f32 %v832_v22, %v785_v30 }
 0x383   : > { %v888_v37 = vpop.permute.xlu2 %887 }
 0x384   : > { %v897_v38 = vadd.f32 %v888_v37, %v841_v34  ;;  %v1398_v34 = vpop.permute.xlu0 %1397 }
 0x386   : > { %2039 = vmatpush.msk.msrb.mxu1 %vm551_vm1, %v897_v38 }
 0x38b   : > { %v2118_v39 = vpop.permute.xlu1 %2117  ;;  %v1189_v62 = vpop.permute.xlu2 %1188 }
 0x38c   : > { %v2119_v40 = vunpack.i.l.bf16 %v2118_v39  ;;  %v2120_v42 = vunpack.i.h.bf16 %v2118_v39 }
 0x38e   : > { %1163 = vmatpush.msra.mxu3 %v2119_v40  ;;  %v1454_v40 = vpop.permute.xlu0 %1453 }
 0x390   : > { %1164 = vmatpush.msra.mxu3 %v2120_v42 }
 0x392   : > { %1165 = vmatpush.msra.mxu3 %v2658_v16  ;;  %v1993_v16 = vld [vmem:[%s3027_s5 + $0x28] sm:$0xff] }
 0x393   : > { %v657_v44 = vpop.permute.xlu1 %656  ;;  %v1199_v9 = vpop.permute.xlu2 %1198 }
 0x394   : > { %1166 = vmatpush.msra.mxu3 %v2656_v15  ;;  %v773_v51 = vadd.f32 %v2638_v41, %v657_v44 }
 0x396   : > { %1167 = vmatpush.msra.mxu3 %v2124_v46  ;;  %v784_v53 = vmax.f32 %v773_v51, 0.0 }
 0x398   : > { %1168 = vmatpush.msra.mxu3 %v2125_v45 }
 0x399   : > { %1996 = vmatmul.msk.f32.vlgmr.msra.gmra.mxu3 %vm942_vm2, %v1992_v49  ;;  %v1449_v49 = vpop.permute.xlu0 %1448 }
 0x39b   : > { %v827_v50 = vpop.permute.xlu1 %826  ;;  %v1266_v38 = vpop.permute.xlu2 %1265 }
 0x39c   : > { %v840_v15 = vmul.f32 %v827_v50, %v784_v53 }
 0x3a1   : > { %1997 = vmatmul.msk.f32.gmra.mxu3 %vm942_vm2, %v1993_v16  ;;  %v1444_v53 = vpop.permute.xlu0 %1443 }
 0x3a3   : > { %v883_v54 = vpop.permute.xlu1 %882  ;;  %v1393_v44 = vpop.permute.xlu2 %1392 }
 0x3a4   : > { %v896_v56 = vadd.f32 %v883_v54, %v840_v15 }
 0x3a6   : > { %2040 = vmatpush.msk.msrb.mxu1 %vm551_vm1, %v896_v56 }
 0x3ab   : > { %v1204_v7 = vpop.permute.xlu1 %1203  ;;  %v1388_v50 = vpop.permute.xlu2 %1387 }
 0x3b3   : > { %v1271_v22 = vpop.permute.xlu1 %1270  ;;  %v1383_v15 = vpop.permute.xlu2 %1382 }
 0x3bb   : > { %v1261_v30 = vpop.permute.xlu1 %1260 }
 0x3c3   : > { %v1256_v39 = vpop.permute.xlu1 %1255 }
 0x3cb   : > { %v1251_v46 = vpop.permute.xlu1 %1250 }
 0x3d3   : > { %v1246_v51 = vpop.permute.xlu1 %1245 }
 0x41c   : > { %v1170_v58 = vpop.f32.mrf.mxu3 }
 0x41d   : > { %v1171_v61 = vadd.f32 %v1170_v58, %v1140_v60 }
 0x41f   : > { %v1176_v41 = vmax.f32 %v1171_v61, 0.0  ;;  %v1439_v61 = vpop.permute.xlu0 %1438 }
 0x421   : > { %v1191_v5 = vmul.f32 %v1184_v4, %v1176_v41 }
 0x423   : > { %v1206_v11 = vadd.f32 %v1199_v9, %v1191_v5 }
 0x424   : > { %v1173_v63 = vpop.f32.mrf.mxu3 }
 0x425   : > { %v1174_v0 = vadd.f32 %v1173_v63, %v1145_v57  ;;  %v1241_v57 = vpop.permute.xlu1 %1240 }
 0x427   : > { %v1177_v3 = vmax.f32 %v1174_v0, 0.0  ;;  %v1378_v0 = vpop.permute.xlu2 %1377 }
 0x429   : > { %v1192_v6 = vmul.f32 %v1189_v62, %v1177_v3 }
 0x42b   : > { %v1207_v8 = vadd.f32 %v1204_v7, %v1192_v6 }
 0x42d   : > { %2041 = vmatpush.msk.msrb.mxu1 %vm551_vm1, %v1207_v8  ;;  %v1368_v5 = vpop.permute.xlu1 %1367 }
 0x42f   : > { %2042 = vmatpush.msk.msrb.mxu1 %vm551_vm1, %v1206_v11 }
 0x431   : > { %2043 = vmatpush.msk.msrb.mxu1 %vm551_vm1, %v2647_v10  ;;  %v1215_v10 = vld [vmem:[%s3031_s9 + $0x8] sm:$0xff] }
 0x433   : > { %2044 = vmatpush.msk.msrb.mxu1 %vm551_vm1, %v2642_v2  ;;  %v1217_v2 = vld [vmem:[%s3031_s9 + $0x18] sm:$0xff] }
 0x435   : > { %2045 = vmatpush.msk.msrb.mxu1 %vm551_vm1, %v2542_v55  ;;  %v1216_v55 = vld [vmem:[%s3031_s9 + $0x10] sm:$0xff] }
 0x437   : > { %2046 = vmatpush.msk.msrb.mxu1 %vm551_vm1, %v2537_v48  ;;  %v1219_v48 = vld [vmem:[%s3031_s9 + $0x28] sm:$0xff] }
 0x438   : > { %2002 = vmatmul.msk.f32.vlgmr.msrb.gmra.mxu1 %vm1278_vm3, %v1214_v14 }
 0x440   : > { %2003 = vmatmul.msk.f32.gmra.mxu1 %vm1278_vm3, %v1215_v10 }
 0x448   : > { %2004 = vmatmul.msk.f32.gmra.mxu1 %vm1278_vm3, %v1216_v55 }
 0x450   : > { %2005 = vmatmul.msk.f32.gmra.mxu1 %vm1278_vm3, %v1217_v2  ;;  %v1373_v2 = vpop.permute.xlu2 %1372 }
 0x458   : > { %2006 = vmatmul.msk.f32.gmra.mxu1 %vm1278_vm3, %v1218_v47 }
 0x460   : > { %2007 = vmatmul.msk.f32.gmra.mxu1 %vm1278_vm3, %v1219_v48  ;;  %v1424_v48 = vpop.permute.xlu1 %1423 }
 0x468   : > { %2008 = vmatmul.msk.f32.gmra.mxu1 %vm1278_vm3, %v1220_v35 }
 0x470   : > { %2009 = vmatmul.msk.f32.gmra.mxu1 %vm1278_vm3, %v1221_v18 }
 0x4b5   : > { %v1320_v37 = vpop.f32.mrf.mxu1 }
 0x4bd   : > { %v1323_v42 = vpop.f32.mrf.mxu1 }
 0x4be   : > { %v1324_v3 = vadd.f32 %v1323_v42, %v1246_v51 }
 0x4c0   : > { %v1345_v7 = vmax.f32 %v1324_v3, 0.0  ;;  %v575_v3 = vld [vmem:[%s3066_s2 + $0x38] sm:$0xff] }
 0x4c2   : > { %v1401_v14 = vmul.f32 %v1368_v5, %v1345_v7  ;;  %v1486_v5 = vadd.f32 %v2676_v36, %v2603_v19 }
 0x4c5   : > { %v1326_v45 = vpop.f32.mrf.mxu1 }
 0x4c6   : > { %v1327_v10 = vadd.f32 %v1326_v45, %v1251_v46  ;;  %v1429_v46 = vpop.permute.xlu2 %1428 }
 0x4c8   : > { %v1346_v35 = vmax.f32 %v1327_v10, 0.0 }
 0x4cd   : > { %v1329_v16 = vpop.f32.mrf.mxu1 }
 0x4d5   : > { %v1332_v54 = vpop.f32.mrf.mxu1 }
 0x4d6   : > { %v1333_v56 = vadd.f32 %v1332_v54, %v1261_v30  ;;  %v2823_v30 = vadd.f32 %v1424_v48, %v1401_v14  ;;  %v1511_v14 = vmul.f32 88.0, %v2592_v13  ;;  %v1505_v13 = vmul.f32 88.0, %v2749_v17 }
 0x4d8   : > { %v1348_v58 = vmax.f32 %v1333_v56, 0.0 }
 0x4da   : > { %v1404_v60 = vmul.f32 %v1383_v15, %v1348_v58 }
 0x4dc   : > { %v2815_v62 = vadd.f32 %v1439_v61, %v1404_v60  ;;  %v571_v61 = vld [vmem:[%s3066_s2 + $0x18] sm:$0xff] }
 0x4dd   : > { %v1335_v63 = vpop.f32.mrf.mxu1 }
 0x4de   : > { %v1336_v41 = vadd.f32 %v1335_v63, %v1266_v38  ;;  %1496 = vadd.xlane.f32.xlu2 %v2815_v62  ;;  %v570_v63 = vld [vmem:[%s3066_s2 + $0x10] sm:$0xff] }
 0x4e0   : > { %v1349_v4 = vmax.f32 %v1336_v41, 0.0  ;;  %v574_v41 = vld [vmem:[%s3066_s2 + $0x30] sm:$0xff] }
 0x4e2   : > { %v1405_v6 = vmul.f32 %v1388_v50, %v1349_v4  ;;  %v1330_v50 = vadd.f32 %v1329_v16, %v1256_v39  ;;  %v1419_v16 = vpop.permute.xlu2 %1418 }
 0x4e4   : > { %v2818_v8 = vadd.f32 %v1444_v53, %v1405_v6  ;;  %v1347_v45 = vmax.f32 %v1330_v50, 0.0  ;;  %v1485_v6 = vadd.f32 %v2690_v43, %v2609_v20  ;;  %v1506_v43 = vmul.f32 88.0, %v2729_v1 }
 0x4e5   : > { %v1338_v9 = vpop.f32.mrf.mxu1  ;;  %v1504_v1 = vmul.f32 88.0, %v2744_v12  ;;  %v1530_v12 = vld [vmem:[%s3035_s13 + $0x10] sm:$0xff] }
 0x4e6   : > { %v1339_v11 = vadd.f32 %v1338_v9, %v1271_v22  ;;  %1498 = vadd.xlane.f32.xlu2 %v2818_v8  ;;  %v1402_v22 = vmul.f32 %v1373_v2, %v1346_v35  ;;  %v1403_v54 = vmul.f32 %v1378_v0, %v1347_v45  ;;  %v572_v0 = vld [vmem:[%s3066_s2 + $0x20] sm:$0xff]  ;;  %v1484_v9 = vadd.f32 %v2704_v52, %v2615_v21 }
 0x4e8   : > { %v1350_v55 = vmax.f32 %v1339_v11, 0.0  ;;  %v1510_v11 = vmul.f32 88.0, %v1486_v5  ;;  %v1532_v5 = vld [vmem:[%s3036_s14] sm:$0xff] }
 0x4ea   : > { %v1406_v47 = vmul.f32 %v1393_v44, %v1350_v55  ;;  %v2829_v44 = vadd.f32 %v1429_v46, %v1402_v22  ;;  %v1509_v55 = vmul.f32 88.0, %v1485_v6 }
 0x4ec   : > { %v2821_v18 = vadd.f32 %v1449_v49, %v1406_v47  ;;  %v1434_v49 = vpop.permute.xlu0 %1433  ;;  %v1508_v47 = vmul.f32 88.0, %v1484_v9 }
 0x4ed   : > { %v1341_v38 = vpop.f32.mrf.mxu1  ;;  %v2833_v58 = vadd.f32 %v1434_v49, %v1403_v54 }
 0x4ee   : > { %v1342_v42 = vadd.f32 %v1341_v38, %v1276_v23  ;;  %1500 = vadd.xlane.f32.xlu1 %v2821_v18  ;;  %1490 = vadd.xlane.f32.xlu2 %v2823_v30  ;;  %v1321_v23 = vadd.f32 %v1320_v37, %v1241_v57  ;;  %v573_v37 = vld [vmem:[%s3066_s2 + $0x28] sm:$0xff]  ;;  %v568_v57 = vld [vmem:[%s3066_s2] sm:$0xff]  ;;  %v1483_v38 = vadd.f32 %v2718_v59, %v2621_v32 }
 0x4f0   : > { %v1351_v51 = vmax.f32 %v1342_v42, 0.0  ;;  %v1344_v56 = vmax.f32 %v1321_v23, 0.0  ;;  %v1507_v21 = vmul.f32 88.0, %v1483_v38  ;;  %v1586_v38 = vld [vmem:[%s3037_s15 + $0x28] sm:$0xff] }
 0x4f2   : > { %v1407_v53 = vmul.f32 %v1398_v34, %v1351_v51 }
 0x4f4   : > { %v2827_v15 = vadd.f32 %v1454_v40, %v1407_v53  ;;  %v1363_v39 = vpop.permute.xlu0 %1362  ;;  %v569_v40 = vld [vmem:[%s3066_s2 + $0x8] sm:$0xff] }
 0x4f5   : > { %v1400_v34 = vmul.f32 %v1363_v39, %v1344_v56  ;;  %v1528_v39 = vld [vmem:[%s3035_s13] sm:$0xff] }
 0x4f6   : > { %1502 = vadd.xlane.f32.xlu0 %v2827_v15  ;;  %1492 = vadd.xlane.f32.xlu1 %v2829_v44 }
 0x4f7   : > { %v2839_v60 = vadd.f32 %v1419_v16, %v1400_v34  ;;  %v1529_v34 = vld [vmem:[%s3035_s13 + $0x8] sm:$0xff]  ;;  %v1531_v16 = vld [vmem:[%s3035_s13 + $0x18] sm:$0xff] }
 0x4fe   : > { %1494 = vadd.xlane.f32.xlu0 %v2833_v58 }
 0x506   : > { %591 = vperm.xlu2 %2095, %v569_v40   ;;  %1488 = vadd.xlane.f32.xlu0 %v2839_v60 }
 0x50e   : > { %611 = vperm.xlu2 %2095, %v573_v37  }
 0x50f   : > { %586 = vperm.xlu1 %2094, %v568_v57  }
 0x517   : > { %601 = vperm.xlu1 %2094, %v571_v61   ;;  %v1534_v61 = vld [vmem:[%s3036_s14 + $0x10] sm:$0xff] }
 0x51a   : > { %596 = vperm.xlu0 %2093, %v570_v63   ;;  %v1535_v63 = vld [vmem:[%s3036_s14 + $0x18] sm:$0xff] }
 0x51f   : > { %616 = vperm.xlu1 %2094, %v574_v41   ;;  %v1533_v41 = vld [vmem:[%s3036_s14 + $0x8] sm:$0xff] }
 0x522   : > { %606 = vperm.xlu0 %2093, %v572_v0  }
 0x52a   : > { %621 = vperm.xlu0 %2093, %v575_v3  }
 0x551   : > { %v1497_v4 = vpop.xlane.xlu2 %1496 }
 0x552   : > { %v1516_v42 = vsub.f32 %v1497_v4, %v1508_v47  ;;  %v1583_v47 = vld [vmem:[%s3037_s15 + $0x10] sm:$0xff] }
 0x554   : > { %v1524_v53 = vmul.f32 0.025, %v1516_v42  ;;  %v1589_v42 = vld [vmem:[%s3038_s16] sm:$0xff] }
 0x559   : > { %v1499_v10 = vpop.xlane.xlu2 %1498 }
 0x55a   : > { %v1517_v19 = vsub.f32 %v1499_v10, %v1509_v55  ;;  %v1581_v55 = vld [vmem:[%s3037_s15] sm:$0xff] }
 0x55c   : > { %v1525_v22 = vmul.f32 0.025, %v1517_v19  ;;  %v1587_v19 = vld [vmem:[%s3037_s15 + $0x30] sm:$0xff] }
 0x561   : > { %v1501_v7 = vpop.xlane.xlu1 %1500  ;;  %v1491_v50 = vpop.xlane.xlu2 %1490 }
 0x562   : > { %v1518_v48 = vsub.f32 %v1501_v7, %v1510_v11  ;;  %v1513_v32 = vsub.f32 %v1491_v50, %v1505_v13 }
 0x564   : > { %v1526_v20 = vmul.f32 0.025, %v1518_v48  ;;  %v1521_v23 = vmul.f32 0.025, %v1513_v32  ;;  %v1584_v48 = vld [vmem:[%s3037_s15 + $0x18] sm:$0xff] }
 0x569   : > { %v1503_v2 = vpop.xlane.xlu0 %1502  ;;  %v1493_v52 = vpop.xlane.xlu1 %1492 }
 0x56a   : > { %v1519_v35 = vsub.f32 %v1503_v2, %v1511_v14  ;;  %v1514_v46 = vsub.f32 %v1493_v52, %v1506_v43  ;;  %v1582_v2 = vld [vmem:[%s3037_s15 + $0x8] sm:$0xff] }
 0x56b   : > { %v1590_v52 = vld [vmem:[%s3038_s16 + $0x8] sm:$0xff] }
 0x56c   : > { %v1527_v36 = vmul.f32 0.025, %v1519_v35  ;;  %v1522_v49 = vmul.f32 0.025, %v1514_v46  ;;  %v1585_v35 = vld [vmem:[%s3037_s15 + $0x20] sm:$0xff]  ;;  %v1591_v46 = vld [vmem:[%s3038_s16 + $0x10] sm:$0xff] }
 0x56e   : > { %1556 = vmatpush.msra.mxu2 %v1527_v36  ;;  %v1588_v36 = vld [vmem:[%s3037_s15 + $0x38] sm:$0xff] }
 0x570   : > { %1557 = vmatpush.msra.mxu2 %v1526_v20 }
 0x571   : > { %v1495_v51 = vpop.xlane.xlu0 %1494 }
 0x572   : > { %v1515_v45 = vsub.f32 %v1495_v51, %v1507_v21  ;;  %1558 = vmatpush.msra.mxu2 %v1525_v22 }
 0x574   : > { %v1523_v59 = vmul.f32 0.025, %v1515_v45  ;;  %1559 = vmatpush.msra.mxu2 %v1524_v53 }
 0x576   : > { %1560 = vmatpush.msra.mxu2 %v1523_v59 }
 0x578   : > { %1561 = vmatpush.msra.mxu2 %v1522_v49 }
 0x579   : > { %v1489_v54 = vpop.xlane.xlu0 %1488 }
 0x57a   : > { %v1512_v56 = vsub.f32 %v1489_v54, %v1504_v1  ;;  %1562 = vmatpush.msra.mxu2 %v1521_v23 }
 0x57c   : > { %v1520_v17 = vmul.f32 0.025, %v1512_v56  ;;  %v1592_v56 = vld [vmem:[%s3038_s16 + $0x18] sm:$0xff] }
 0x57e   : > { %1563 = vmatpush.msra.mxu2 %v1520_v17 }
 0x57f   : > { %2010 = vmatmul.msk.f32.vlgmr.msra.gmra.mxu2 %vm1278_vm3, %v1528_v39 }
 0x587   : > { %2011 = vmatmul.msk.f32.gmra.mxu2 %vm1278_vm3, %v1529_v34 }
 0x58f   : > { %2012 = vmatmul.msk.f32.gmra.mxu2 %vm1278_vm3, %v1530_v12 }
 0x597   : > { %2013 = vmatmul.msk.f32.gmra.mxu2 %vm1278_vm3, %v1531_v16 }
 0x602   : > { %v1565_v40 = vpop.f32.mrf.mxu2 }
 0x603   : > { %v1566_v9 = vadd.f32 %v1565_v40, %v1532_v5 }
 0x605   : > { %v1577_v10 = vmax.f32 %v1566_v9, 0.0 }
 0x60a   : > { %v1568_v37 = vpop.f32.mrf.mxu2 }
 0x60b   : > { %v1569_v6 = vadd.f32 %v1568_v37, %v1533_v41 }
 0x60d   : > { %v1578_v14 = vmax.f32 %v1569_v6, 0.0  ;;  %v1593_v6 = vld [vmem:[%s3038_s16 + $0x20] sm:$0xff] }
 0x612   : > { %v1571_v57 = vpop.f32.mrf.mxu2 }
 0x613   : > { %v1572_v3 = vadd.f32 %v1571_v57, %v1534_v61 }
 0x615   : > { %v1579_v11 = vmax.f32 %v1572_v3, 0.0 }
 0x61a   : > { %v1574_v0 = vpop.f32.mrf.mxu2 }
 0x61b   : > { %v1575_v4 = vadd.f32 %v1574_v0, %v1535_v63 }
 0x61d   : > { %v1580_v7 = vmax.f32 %v1575_v4, 0.0 }
 0x61f   : > { %1634 = vmatpush.msrb.mxu3 %v1580_v7 }
 0x621   : > { %1635 = vmatpush.msrb.mxu3 %v1579_v11 }
 0x623   : > { %1636 = vmatpush.msrb.mxu3 %v1578_v14 }
 0x625   : > { %1637 = vmatpush.msrb.mxu3 %v1577_v10 }
 0x626   : > { %2014 = vmatmul.msk.f32.vlgmr.msrb.gmra.mxu3 %vm1597_vm4, %v1581_v55 }
 0x62e   : > { %2015 = vmatmul.msk.f32.gmra.mxu3 %vm1597_vm4, %v1582_v2 }
 0x636   : > { %2016 = vmatmul.msk.f32.gmra.mxu3 %vm1597_vm4, %v1583_v47 }
 0x63e   : > { %2017 = vmatmul.msk.f32.gmra.mxu3 %vm1597_vm4, %v1584_v48 }
 0x646   : > { %2018 = vmatmul.msk.f32.gmra.mxu3 %vm1597_vm4, %v1585_v35 }
 0x64e   : > { %2019 = vmatmul.msk.f32.gmra.mxu3 %vm1597_vm4, %v1586_v38 }
 0x656   : > { %2020 = vmatmul.msk.f32.gmra.mxu3 %vm1597_vm4, %v1587_v19 }
 0x65e   : > { %2021 = vmatmul.msk.f32.gmra.mxu3 %vm1597_vm4, %v1588_v36 }
 0x6a9   : > { %v1639_v20 = vpop.f32.mrf.mxu3 }
 0x6aa   : > { %v1640_v43 = vadd.f32 %v1639_v20, %v1589_v42 }
 0x6ac   : > { %v2022_v21 = vmul.f32 -1.442695, %v1640_v43  ;;  %v1594_v43 = vld [vmem:[%s3038_s16 + $0x28] sm:$0xff] }
 0x6ae   : > { %2126 = vpow2.f32 %v2022_v21 }
 0x6b1   : > { %v1642_v22 = vpop.f32.mrf.mxu3 }
 0x6b2   : > { %v1643_v13 = vadd.f32 %v1642_v22, %v1590_v52 }
 0x6b4   : > { %v2127_v50 = vpop.eup %2126  ;;  %v2023_v51 = vmul.f32 -1.442695, %v1643_v13 }
 0x6b5   : > { %v1687_v53 = vadd.f32 1.0, %v2127_v50 }
 0x6b6   : > { %2128 = vpow2.f32 %v2023_v51 }
 0x6b7   : > { %2130 = vrcp.f32 %v1687_v53  ;;  %v1706_v34 = vand.u32 2147483648, %v1687_v53  ;;  %v1704_v40 = vand.u32 2147483647, %v1687_v53  ;;  %vm1700_vm6 = vweird.f32 %v1687_v53 }
 0x6b9   : > { %v1645_v45 = vpop.f32.mrf.mxu3  ;;  %v1707_v0 = vor.u32 1.1754944e-38, %v1706_v34  ;;  %vm1705_vm8 = vcmp.eq.f32.partialorder %v1704_v40, 8.507059e+37 }
 0x6ba   : > { %v1646_v32 = vadd.f32 %v1645_v45, %v1591_v46 }
 0x6bc   : > { %v2129_v59 = vpop.eup %2128  ;;  %v2024_v49 = vmul.f32 -1.442695, %v1646_v32 }
 0x6bd   : > { %v2131_v1 = vpop.eup %2130  ;;  %v1688_v23 = vadd.f32 1.0, %v2129_v59 }
 0x6be   : > { %2132 = vpow2.f32 %v2024_v49  ;;  %v1696_v54 = vmul.f32 %v2131_v1, %v1687_v53  ;;  %vm1701_vm5 = vweird.f32 %v2131_v1 }
 0x6bf   : > { %2134 = vrcp.f32 %v1688_v23  ;;  %vm1702_vm7 = vmor %vm1700_vm6, %vm1701_vm5  ;;  %v1721_v11 = vand.u32 2147483648, %v1688_v23  ;;  %v1719_v55 = vand.u32 2147483647, %v1688_v23  ;;  %vm1715_vm10 = vweird.f32 %v1688_v23 }
 0x6c0   : > { %v1697_v17 = vsub.f32 1.0, %v1696_v54 }
 0x6c1   : > { %v1648_v39 = vpop.f32.mrf.mxu3  ;;  %v1722_v19 = vor.u32 1.1754944e-38, %v1721_v11  ;;  %vm1720_vm12 = vcmp.eq.f32.partialorder %v1719_v55, 8.507059e+37 }
 0x6c2   : > { %v1649_v12 = vadd.f32 %v1648_v39, %v1592_v56  ;;  %v1698_v16 = vmul.f32 %v2131_v1, %v1697_v17  ;;  %v1595_v56 = vld [vmem:[%s3038_s16 + $0x30] sm:$0xff] }
 0x6c4   : > { %v2133_v37 = vpop.eup %2132  ;;  %v2025_v57 = vmul.f32 -1.442695, %v1649_v12  ;;  %v1699_v61 = vadd.f32 %v2131_v1, %v1698_v16 }
 0x6c5   : > { %v2135_v63 = vpop.eup %2134  ;;  %v1689_v41 = vadd.f32 1.0, %v2133_v37 }
 0x6c6   : > { %2136 = vpow2.f32 %v2025_v57  ;;  %v1703_v3 = vsel %vm1702_vm7, %v2131_v1, %v1699_v61  ;;  %v1711_v4 = vmul.f32 %v2135_v63, %v1688_v23  ;;  %vm1716_vm9 = vweird.f32 %v2135_v63 }
 0x6c7   : > { %2138 = vrcp.f32 %v1689_v41  ;;  %v1708_v5 = vsel %vm1705_vm8, %v1707_v0, %v1703_v3  ;;  %vm1717_vm11 = vmor %vm1715_vm10, %vm1716_vm9  ;;  %v1736_v22 = vand.u32 2147483648, %v1689_v41  ;;  %v1734_v51 = vand.u32 2147483647, %v1689_v41 }
 0x6c8   : > { %1817 = vperm.xlu2 %2095, %v1708_v5   ;;  %v1712_v7 = vsub.f32 1.0, %v1711_v4  ;;  %vm1730_vm14 = vweird.f32 %v1689_v41 }
 0x6c9   : > { %v1651_v9 = vpop.f32.mrf.mxu3  ;;  %v1737_v49 = vor.u32 1.1754944e-38, %v1736_v22  ;;  %vm1735_vm0 = vcmp.eq.f32.partialorder %v1734_v51, 8.507059e+37 }
 0x6ca   : > { %v1652_v14 = vadd.f32 %v1651_v9, %v1593_v6  ;;  %v1713_v10 = vmul.f32 %v2135_v63, %v1712_v7  ;;  %v1596_v6 = vld [vmem:[%s3038_s16 + $0x38] sm:$0xff] }
 0x6cc   : > { %v2137_v2 = vpop.eup %2136  ;;  %v2026_v47 = vmul.f32 -1.442695, %v1652_v14  ;;  %v1714_v48 = vadd.f32 %v2135_v63, %v1713_v10 }
 0x6cd   : > { %v2139_v35 = vpop.eup %2138  ;;  %v1690_v38 = vadd.f32 1.0, %v2137_v2 }
 0x6ce   : > { %2140 = vpow2.f32 %v2026_v47  ;;  %v1718_v36 = vsel %vm1717_vm11, %v2135_v63, %v1714_v48  ;;  %v1726_v42 = vmul.f32 %v2139_v35, %v1689_v41  ;;  %vm1731_vm13 = vweird.f32 %v2139_v35 }
 0x6cf   : > { %2142 = vrcp.f32 %v1690_v38  ;;  %v1723_v20 = vsel %vm1720_vm12, %v1722_v19, %v1718_v36  ;;  %vm1732_vm15 = vmor %vm1730_vm14, %vm1731_vm13  ;;  %v1751_v34 = vand.u32 2147483648, %v1690_v38  ;;  %v1749_v40 = vand.u32 2147483647, %v1690_v38 }
 0x6d0   : > { %1822 = vperm.xlu1 %2094, %v1723_v20   ;;  %v1727_v21 = vsub.f32 1.0, %v1726_v42  ;;  %vm1745_vm2 = vweird.f32 %v1690_v38 }
 0x6d1   : > { %v1654_v52 = vpop.f32.mrf.mxu3  ;;  %v1752_v0 = vor.u32 1.1754944e-38, %v1751_v34  ;;  %vm1750_vm4 = vcmp.eq.f32.partialorder %v1749_v40, 8.507059e+37 }
 0x6d2   : > { %v1655_v13 = vadd.f32 %v1654_v52, %v1594_v43  ;;  %v1728_v50 = vmul.f32 %v2139_v35, %v1727_v21 }
 0x6d4   : > { %v2141_v53 = vpop.eup %2140  ;;  %v2027_v46 = vmul.f32 -1.442695, %v1655_v13  ;;  %v1729_v45 = vadd.f32 %v2139_v35, %v1728_v50 }
 0x6d5   : > { %v2143_v32 = vpop.eup %2142  ;;  %v1691_v59 = vadd.f32 1.0, %v2141_v53 }
 0x6d6   : > { %2144 = vpow2.f32 %v2027_v46  ;;  %v1733_v1 = vsel %vm1732_vm15, %v2139_v35, %v1729_v45  ;;  %v1741_v23 = vmul.f32 %v2143_v32, %v1690_v38  ;;  %vm1746_vm1 = vweird.f32 %v2143_v32 }
 0x6d7   : > { %2146 = vrcp.f32 %v1691_v59  ;;  %v1738_v54 = vsel %vm1735_vm0, %v1737_v49, %v1733_v1  ;;  %vm1747_vm3 = vmor %vm1745_vm2, %vm1746_vm1  ;;  %v1766_v11 = vand.u32 2147483648, %v1691_v59  ;;  %v1764_v55 = vand.u32 2147483647, %v1691_v59 }
 0x6d8   : > { %1827 = vperm.xlu0 %2093, %v1738_v54   ;;  %v1742_v17 = vsub.f32 1.0, %v1741_v23  ;;  %vm1760_vm6 = vweird.f32 %v1691_v59 }
 0x6d9   : > { %v1657_v39 = vpop.f32.mrf.mxu3  ;;  %v1767_v19 = vor.u32 1.1754944e-38, %v1766_v11  ;;  %vm1765_vm8 = vcmp.eq.f32.partialorder %v1764_v55, 8.507059e+37 }
 0x6da   : > { %v1658_v12 = vadd.f32 %v1657_v39, %v1595_v56  ;;  %v1743_v16 = vmul.f32 %v2143_v32, %v1742_v17 }
 0x6dc   : > { %v2145_v37 = vpop.eup %2144  ;;  %v2028_v57 = vmul.f32 -1.442695, %v1658_v12  ;;  %v1744_v61 = vadd.f32 %v2143_v32, %v1743_v16 }
 0x6dd   : > { %v2147_v63 = vpop.eup %2146  ;;  %v1692_v41 = vadd.f32 1.0, %v2145_v37 }
 0x6de   : > { %2148 = vpow2.f32 %v2028_v57  ;;  %v1748_v3 = vsel %vm1747_vm3, %v2143_v32, %v1744_v61  ;;  %v1756_v4 = vmul.f32 %v2147_v63, %v1691_v59  ;;  %vm1761_vm5 = vweird.f32 %v2147_v63 }
 0x6df   : > { %2150 = vrcp.f32 %v1692_v41  ;;  %v1753_v5 = vsel %vm1750_vm4, %v1752_v0, %v1748_v3  ;;  %vm1762_vm7 = vmor %vm1760_vm6, %vm1761_vm5  ;;  %v1781_v21 = vand.u32 2147483648, %v1692_v41  ;;  %v1779_v22 = vand.u32 2147483647, %v1692_v41 }
 0x6e0   : > { %1832 = vperm.xlu2 %2095, %v1753_v5   ;;  %v1757_v7 = vsub.f32 1.0, %v1756_v4  ;;  %vm1775_vm10 = vweird.f32 %v1692_v41  ;;  %v592_v4 = vpop.permute.xlu2 %591 }
 0x6e1   : > { %v1660_v9 = vpop.f32.mrf.mxu3  ;;  %v1782_v46 = vor.u32 1.1754944e-38, %v1781_v21  ;;  %vm1780_vm12 = vcmp.eq.f32.partialorder %v1779_v22, 8.507059e+37 }
 0x6e2   : > { %v1661_v14 = vadd.f32 %v1660_v9, %v1596_v6  ;;  %v1758_v10 = vmul.f32 %v2147_v63, %v1757_v7  ;;  %v587_v6 = vpop.permute.xlu1 %586 }
 0x6e3   : > { %v731_v9 = vadd.f32 %v2444_v24, %v587_v6 }
 0x6e4   : > { %v2149_v2 = vpop.eup %2148  ;;  %v2029_v47 = vmul.f32 -1.442695, %v1661_v14  ;;  %v1759_v48 = vadd.f32 %v2147_v63, %v1758_v10  ;;  %v597_v10 = vpop.permute.xlu0 %596 }
 0x6e5   : > { %v2151_v35 = vpop.eup %2150  ;;  %v1693_v38 = vadd.f32 1.0, %v2149_v2  ;;  %v737_v21 = vadd.f32 %v2448_v26, %v597_v10 }
 0x6e6   : > { %2152 = vpow2.f32 %v2029_v47  ;;  %v1763_v36 = vsel %vm1762_vm7, %v2147_v63, %v1759_v48  ;;  %v1771_v42 = vmul.f32 %v2151_v35, %v1692_v41  ;;  %vm1776_vm9 = vweird.f32 %v2151_v35 }
 0x6e7   : > { %2154 = vrcp.f32 %v1693_v38  ;;  %v1768_v20 = vsel %vm1765_vm8, %v1767_v19, %v1763_v36  ;;  %vm1777_vm11 = vmor %vm1775_vm10, %vm1776_vm9  ;;  %v1796_v1 = vand.u32 2147483648, %v1693_v38  ;;  %v1794_v54 = vand.u32 2147483647, %v1693_v38 }
 0x6e8   : > { %1837 = vperm.xlu1 %2094, %v1768_v20   ;;  %v1772_v43 = vsub.f32 1.0, %v1771_v42  ;;  %vm1790_vm14 = vweird.f32 %v1693_v38  ;;  %v612_v5 = vpop.permute.xlu2 %611  ;;  %v734_v36 = vadd.f32 %v2446_v25, %v592_v4 }
 0x6e9   : > { %v1797_v39 = vor.u32 1.1754944e-38, %v1796_v1  ;;  %vm1795_vm0 = vcmp.eq.f32.partialorder %v1794_v54, 8.507059e+37 }
 0x6ea   : > { %v1773_v52 = vmul.f32 %v2151_v35, %v1772_v43  ;;  %v602_v55 = vpop.permute.xlu1 %601 }
 0x6ec   : > { %v2153_v13 = vpop.eup %2152  ;;  %v1774_v50 = vadd.f32 %v2151_v35, %v1773_v52  ;;  %v607_v2 = vpop.permute.xlu0 %606 }
 0x6ed   : > { %v2155_v51 = vpop.eup %2154  ;;  %v1694_v53 = vadd.f32 1.0, %v2153_v13 }
 0x6ee   : > { %v1778_v45 = vsel %vm1777_vm11, %v2151_v35, %v1774_v50  ;;  %v1786_v32 = vmul.f32 %v2155_v51, %v1693_v38  ;;  %vm1791_vm13 = vweird.f32 %v2155_v51  ;;  %v740_v35 = vadd.f32 %v2450_v27, %v602_v55 }
 0x6ef   : > { %2156 = vrcp.f32 %v1694_v53  ;;  %v1783_v59 = vsel %vm1780_vm12, %v1782_v46, %v1778_v45  ;;  %vm1792_vm15 = vmor %vm1790_vm14, %vm1791_vm13  ;;  %v1811_v37 = vand.u32 2147483648, %v1694_v53  ;;  %v1809_v61 = vand.u32 2147483647, %v1694_v53 }
 0x6f0   : > { %1842 = vperm.xlu0 %2093, %v1783_v59   ;;  %v1787_v49 = vsub.f32 1.0, %v1786_v32  ;;  %vm1805_vm2 = vweird.f32 %v1694_v53  ;;  %v743_v50 = vadd.f32 %v2452_v28, %v607_v2 }
 0x6f1   : > { %v1812_v41 = vor.u32 1.1754944e-38, %v1811_v37  ;;  %vm1810_vm4 = vcmp.eq.f32.partialorder %v1809_v61, 8.507059e+37 }
 0x6f2   : > { %v1788_v23 = vmul.f32 %v2155_v51, %v1787_v49  ;;  %v617_v47 = vpop.permute.xlu1 %616 }
 0x6f3   : > { %v749_v22 = vadd.f32 %v2459_v31, %v617_v47 }
 0x6f4   : > { %v1789_v56 = vadd.f32 %v2155_v51, %v1788_v23 }
 0x6f5   : > { %v2157_v17 = vpop.eup %2156 }
 0x6f6   : > { %v1793_v34 = vsel %vm1792_vm15, %v2155_v51, %v1789_v56  ;;  %v1801_v12 = vmul.f32 %v2157_v17, %v1694_v53  ;;  %vm1806_vm1 = vweird.f32 %v2157_v17  ;;  %v746_v53 = vadd.f32 %v2454_v29, %v612_v5 }
 0x6f7   : > { %v1798_v16 = vsel %vm1795_vm0, %v1797_v39, %v1793_v34  ;;  %vm1807_vm3 = vmor %vm1805_vm2, %vm1806_vm1 }
 0x6f8   : > { %1847 = vperm.xlu2 %2095, %v1798_v16   ;;  %v1802_v40 = vsub.f32 1.0, %v1801_v12 }
 0x6fa   : > { %v1803_v57 = vmul.f32 %v2157_v17, %v1802_v40 }
 0x6fc   : > { %v1804_v63 = vadd.f32 %v2157_v17, %v1803_v57 }
 0x6fe   : > { %v1808_v0 = vsel %vm1807_vm3, %v2157_v17, %v1804_v63 }
 0x6ff   : > { %v1813_v3 = vsel %vm1810_vm4, %v1812_v41, %v1808_v0 }
 0x700   : > { %1852 = vperm.xlu1 %2094, %v1813_v3  }
 0x722   : > { %v1818_v7 = vpop.permute.xlu2 %1817 }
 0x723   : > { %v1855_v11 = vmul.f32 %v1818_v7, %v2839_v60  ;;  %v622_v60 = vpop.permute.xlu0 %621 }
 0x725   : > { %v1863_v14 = vadd.f32 %v1855_v11, %v731_v9 }
 0x727   : > { %1871 = vst [vmem:[%s2964_s23] sm:$0xff] %v1863_v14 }
 0x73a   : > { %v1833_v48 = vpop.permute.xlu2 %1832 }
 0x73b   : > { %v1858_v38 = vmul.f32 %v1833_v48, %v2833_v58 }
 0x73d   : > { %v1866_v24 = vadd.f32 %v1858_v38, %v740_v35 }
 0x73f   : > { %1874 = vst [vmem:[%s2964_s23 + $0x18] sm:$0xff] %v1866_v24 }
 0x742   : > { %v1823_v19 = vpop.permute.xlu1 %1822 }
 0x743   : > { %v1856_v42 = vmul.f32 %v1823_v19, %v2823_v30 }
 0x745   : > { %v1864_v20 = vadd.f32 %v1856_v42, %v734_v36 }
 0x747   : > { %1872 = vst [vmem:[%s2964_s23 + $0x8] sm:$0xff] %v1864_v20 }
 0x74a   : > { %v1828_v43 = vpop.permute.xlu0 %1827 }
 0x74b   : > { %v1857_v52 = vmul.f32 %v1828_v43, %v2829_v44 }
 0x74d   : > { %v1865_v27 = vadd.f32 %v1857_v52, %v737_v21 }
 0x74f   : > { %1873 = vst [vmem:[%s2964_s23 + $0x10] sm:$0xff] %v1865_v27 }
 0x752   : > { %v1848_v58 = vpop.permute.xlu2 %1847 }
 0x753   : > { %v1861_v25 = vmul.f32 %v1848_v58, %v2821_v18 }
 0x755   : > { %v1869_v13 = vadd.f32 %v1861_v25, %v749_v22 }
 0x757   : > { %1877 = vst [vmem:[%s2964_s23 + $0x30] sm:$0xff] %v1869_v13 }
 0x75a   : > { %v1838_v30 = vpop.permute.xlu1 %1837 }
 0x75b   : > { %v1859_v51 = vmul.f32 %v1838_v30, %v2815_v62  ;;  %v752_v62 = vadd.f32 %v2462_v33, %v622_v60 }
 0x75d   : > { %v1867_v26 = vadd.f32 %v1859_v51, %v743_v50 }
 0x75f   : > { %1875 = vst [vmem:[%s2964_s23 + $0x20] sm:$0xff] %v1867_v26 }
 0x762   : > { %v1843_v44 = vpop.permute.xlu0 %1842 }
 0x763   : > { %v1860_v46 = vmul.f32 %v1843_v44, %v2818_v8 }
 0x765   : > { %v1868_v31 = vadd.f32 %v1860_v46, %v746_v53 }
 0x767   : > { %1876 = vst [vmem:[%s2964_s23 + $0x28] sm:$0xff] %v1868_v31 }
 0x772   : > { %v1853_v28 = vpop.permute.xlu1 %1852 }
 0x773   : > { %v1862_v18 = vmul.f32 %v1853_v28, %v2827_v15 }
 0x775   : > { %v1870_v29 = vadd.f32 %v1862_v18, %v752_v62 }
 0x777   : > { %1878 = vst [vmem:[%s2964_s23 + $0x38] sm:$0xff] %v1870_v29 }
 0x778   : > { %2185 = shalt.err (!%p2182_p3)
}
 0x779   : > { %s2225_s24 = smov 128   ;;  %s2226_s23 = smov 8  }
 0x77a   : > { %2049 = dma.vmem_to_hbm [thread:$0]  (%p2355_p5), %s1893_s22, 1024, %s1895_s30, %s1880_s18, %s2225_s24, %s2225_s24, %s2226_s23  }
 0x77b PF: > { %s3070_s21 = sld [smem:[#allocation9_spill]] }
 0x77c   : > { %s3071_s2 = sld [smem:[#allocation7_spill]] }
 0x781   : > { %p2055_p4 = scmp.ge.s32.totalorder %s3070_s21, 2 }
 0x782   : > { %s1909_s19 = sand.u32 1, %s3071_s2  }
 0x783   : > { %p2052_p7 = pnand %p2055_p4, %p2359_p6  ;;  %s1910_s20 = scalar_lea.sflag [#allocation5], %s1909_s19 }
 0x785   : > { %p2053_p8 = pneg %p2052_p7 }
 0x787   : > { %2203 = dma.done.wait (%p2053_p8), %s1910_s20, 1024  }
 0x788   : > { %2205 = vsyncadd (%p2053_p8), %s1910_s20, 4294966272  ;;  %s3073_s27 = sld [smem:[#allocation10_spill]]  ;;  %s3076_s24 = smov %s2212_s25 }
 0x789   : > { %s3074_s26 = sld [smem:[#allocation8_spill]] }
 0x78a   : > { %s3075_s28 = sld [smem:[#allocation11_spill]] }
 0x78e   : > { %p27_p9 = scmp.ge.s32.totalorder %s3073_s27, 4  }
 0x78f   : > { %s3077_s25 = smov %s3074_s26 }
 0x790   : > { %s3078_s26 = smov %s3075_s28  ;;  %29 = sbr.rel (!%p27_p9) target bundleno = 8 (0x8), region = 131 }
 0x795   :  { %1916 = vsyncpa [#allocation5], 1 }
 0x796   :  { %1918 = vsyncpa [#allocation5 + $0x1], 1 }

</bundles_post_ra>
